<compile_context>
chip_gen: v7x
topology: tpu7x:2x2x1
jax: 0.10.0
libtpu: 0.0.40
codegen_flags: <defaults>
</compile_context>

<pallas_src>
import functools

import jax
import jax.numpy as jnp
from jax.experimental import pallas as pl
from jax.experimental.pallas import tpu as pltpu

PRELU_ALPHA = 0.25   # nn.PReLU() default init
BN_EPS = 1e-5


# ---------------------------------------------------------------------------
# The fused Pallas kernel: whole BottleNeck1 forward in one body.
# Activation layout inside the kernel: [C, M] with M = N*Ho*Wo on the lane axis.
# ---------------------------------------------------------------------------
def _bottleneck1_kernel(xs2d_ref, ho_ref, wo_ref, base_ref, *rest,
                        treedef, nleaves, h_in, w_in):
    param_refs = rest[:nleaves]
    y_ref, idx_ref = rest[nleaves], rest[nleaves + 1]
    P = jax.tree_util.tree_unflatten(treedef, [r[...] for r in param_refs])

    xs2d = xs2d_ref[...]          # [4, Cin, M]  space-to-depth view of x
    ho = ho_ref[...]              # [1, M] int32: output-row coordinate per lane
    wo = wo_ref[...]              # [1, M] int32: output-col coordinate per lane
    base = base_ref[...]          # [1, M] int32: (2*ho)*W_in + 2*wo  (pool index base)

    ho_n, wo_n = h_in // 2, w_in // 2
    m = xs2d.shape[-1]

    def lane_shift(v, s):
        # out[:, i] = v[:, (i + s) % m]   (wrapped entries are masked by the caller)
        k = s % m
        if k == 0:
            return v
        return jnp.concatenate([v[:, k:], v[:, :k]], axis=1)

    def shifted(v, dr, dc):
        # spatially shifted view on the Ho x Wo grid with zero padding at boundaries
        vs = lane_shift(v, dr * wo_n + dc)
        hn = ho + dr
        wn = wo + dc
        ok = (hn >= 0) & (hn < ho_n) & (wn >= 0) & (wn < wo_n)
        return jnp.where(ok, vs, 0.0)

    relu = lambda v: jnp.maximum(v, 0.0)
    prelu = lambda v: jnp.where(v >= 0.0, v, PRELU_ALPHA * v)
    mm = lambda a, b: jnp.dot(a, b, preferred_element_type=jnp.float32)

    def conv3x3(x, w, b):
        # 3x3, stride 1, pad 1: 9 shifted accumulating MXU dots.  w: [3,3,Cout,Cin]
        acc = None
        for kh in range(3):
            for kw in range(3):
                t = mm(w[kh, kw], shifted(x, kh - 1, kw - 1))
                acc = t if acc is None else acc + t
        return acc + b

    def conv3x3_s2(w, b):
        # 3x3, stride 2, pad 1 on the ORIGINAL grid, expressed via the space-to-depth
        # groups: input row 2*ho + (kh-1) = 2*(ho + dH) + dh with (dH, dh) = divmod(kh-1, 2).
        acc = None
        for kh in range(3):
            d_h, dh = divmod(kh - 1, 2)
            for kw in range(3):
                d_w, dw = divmod(kw - 1, 2)
                t = mm(w[kh, kw], shifted(xs2d[dh * 2 + dw], d_h, d_w))
                acc = t if acc is None else acc + t
        return acc + b

    # ---------------- Bottleneck 'downsampling' ----------------
    d = P["down"]
    # right branch: ConvBNReLU(3x3, s2) -> ConvBNReLU(3x3) -> conv1x1 (+ Dropout = id)
    r = relu(conv3x3_s2(d["w1"], d["b1"]))            # [hid_d, M]
    r = relu(conv3x3(r, d["w2"], d["b2"]))            # [hid_d, M]
    r = mm(d["w3"], r)                                # [Cout,  M]  (no BN / bias / act)

    # left branch: MaxPool2d(2,2, return_indices) -> ConvBNReLU(1x1)
    # Tie-break: first window position in scan order (0,0),(0,1),(1,0),(1,1), strict '>'.
    best = xs2d[0]
    bidx = jnp.broadcast_to(base, best.shape)
    for dh in range(2):
        for dw in range(2):
            if dh == 0 and dw == 0:
                continue
            a = xs2d[dh * 2 + dw]
            take = a > best
            best = jnp.where(take, a, best)
            bidx = jnp.where(take, base + (dh * w_in + dw), bidx)
    idx_ref[...] = bidx                               # [Cin, M] int32, lane-dense store
    left = relu(mm(d["wl"], best) + d["bl"])          # [Cout, M]

    y = prelu(left + r)                               # [Cout, M]

    # ---------------- 4x Bottleneck 'regular' ----------------
    for rp in P["regular"]:
        t1 = relu(mm(rp["w1"], y) + rp["b1"])         # 1x1 ConvBNReLU
        t2 = relu(conv3x3(t1, rp["w2"], rp["b2"]))    # 3x3 ConvBNReLU
        y = prelu(y + mm(rp["w3"], t2))               # conv1x1 (+Dropout=id), residual, PReLU

    y_ref[...] = y                                    # [Cout, M] f32, lane-dense store


# ---------------------------------------------------------------------------
# Wrapper: layout plumbing (NCHW <-> [C, M]) + the single pallas_call.
# ---------------------------------------------------------------------------
def bottleneck1_forward(x_nchw, params, *, out_channels):
    n, cin, h, w = x_nchw.shape
    ho_n, wo_n = h // 2, w // 2
    m = n * ho_n * wo_n
    x = x_nchw.astype(jnp.float32)

    # space-to-depth: xs2d[dh*2+dw, c, (b,ho,wo)] = x[b, c, 2*ho+dh, 2*wo+dw]
    xs2d = (x.reshape(n, cin, ho_n, 2, wo_n, 2)
             .transpose(3, 5, 1, 0, 2, 4)
             .reshape(4, cin, m))

    # per-output-pixel coordinates along the lane axis (precomputed, keeps int div/mod
    # out of the kernel)
    lane = jnp.arange(m, dtype=jnp.int32)
    rem = lane % (ho_n * wo_n)
    ho = (rem // wo_n).reshape(1, m).astype(jnp.int32)
    wo = (rem % wo_n).reshape(1, m).astype(jnp.int32)
    base = ((2 * ho) * w + 2 * wo).astype(jnp.int32)

    leaves, treedef = jax.tree_util.tree_flatten(params)
    kernel = functools.partial(_bottleneck1_kernel, treedef=treedef,
                               nleaves=len(leaves), h_in=h, w_in=w)
    vmem = pl.BlockSpec(memory_space=pltpu.MemorySpace.VMEM)

    y_flat, idx_flat = pl.pallas_call(
        kernel,
        out_shape=(jax.ShapeDtypeStruct((out_channels, m), jnp.float32),
                   jax.ShapeDtypeStruct((cin, m), jnp.int32)),
        in_specs=[vmem] * (4 + len(leaves)),
        out_specs=(vmem, vmem),
    )(xs2d, ho, wo, base, *leaves)

    y = y_flat.reshape(out_channels, n, ho_n, wo_n).transpose(1, 0, 2, 3)      # NCHW
    idx = idx_flat.reshape(cin, n, ho_n, wo_n).transpose(1, 0, 2, 3)           # NCHW
    return y, idx


# ---------------------------------------------------------------------------
# Deterministic parameter construction with BatchNorm folded into the weights.
# Kernel weight layouts: 3x3 -> [3, 3, Cout, Cin];  1x1 -> [Cout, Cin];  bias -> [Cout, 1].
# ---------------------------------------------------------------------------
def init_params(key, in_channels, out_channels):
    hid_d = int(in_channels * 0.25)      # downsampling bottleneck hidden width
    hid_r = int(out_channels * 0.25)     # regular bottleneck hidden width
    keys = iter(jax.random.split(key, 64))

    def bn_fold(c):
        gamma = 1.0 + 0.1 * jax.random.normal(next(keys), (c,))
        beta = 0.1 * jax.random.normal(next(keys), (c,))
        mean = 0.1 * jax.random.normal(next(keys), (c,))
        var = jax.random.uniform(next(keys), (c,), minval=0.5, maxval=1.5)
        scale = gamma / jnp.sqrt(var + BN_EPS)
        shift = beta - mean * scale
        return scale.astype(jnp.float32), shift.astype(jnp.float32)

    def conv_bn(cout, cin, k):
        w = 0.1 * jax.random.normal(next(keys), (cout, cin, k, k), dtype=jnp.float32)
        scale, shift = bn_fold(cout)
        wf = w * scale[:, None, None, None]                 # fold BN scale into weights
        if k == 1:
            wmat = wf[:, :, 0, 0]                           # [Cout, Cin]
        else:
            wmat = jnp.transpose(wf, (2, 3, 0, 1))          # [k, k, Cout, Cin]
        return wmat, shift.reshape(cout, 1)

    def conv_plain(cout, cin):                              # conv1x1, bias=False, no BN
        w = 0.1 * jax.random.normal(next(keys), (cout, cin, 1, 1), dtype=jnp.float32)
        return w[:, :, 0, 0]

    w1, b1 = conv_bn(hid_d, in_channels, 3)
    w2, b2 = conv_bn(hid_d, hid_d, 3)
    w3 = conv_plain(out_channels, hid_d)
    wl, bl = conv_bn(out_channels, in_channels, 1)
    params = {"down": {"w1": w1, "b1": b1, "w2": w2, "b2": b2,
                       "w3": w3, "wl": wl, "bl": bl},
              "regular": []}
    for _ in range(4):
        rw1, rb1 = conv_bn(hid_r, out_channels, 1)
        rw2, rb2 = conv_bn(hid_r, hid_r, 3)
        rw3 = conv_plain(out_channels, hid_r)
        params["regular"].append({"w1": rw1, "b1": rb1, "w2": rw2, "b2": rb2, "w3": rw3})
    return params


# ---------------------------------------------------------------------------
# Pure-JAX reference (lax.conv) for in-script validation of the fused kernel.
# ---------------------------------------------------------------------------
def bottleneck1_reference(x, params):
    def conv(a, wmat, b=None, k=3, stride=1, pad=1):
        w = wmat[:, :, None, None] if k == 1 else jnp.transpose(wmat, (2, 3, 0, 1))
        y = jax.lax.conv_general_dilated(
            a, w, (stride, stride), [(pad, pad), (pad, pad)],
            dimension_numbers=("NCHW", "OIHW", "NCHW"))
        if b is not None:
            y = y + b.reshape(1, -1, 1, 1)
        return y

    relu = lambda v: jnp.maximum(v, 0.0)
    prelu = lambda v: jnp.where(v >= 0.0, v, PRELU_ALPHA * v)

    n, cin, h, w = x.shape
    ho_n, wo_n = h // 2, w // 2
    d = params["down"]

    r = relu(conv(x, d["w1"], d["b1"], k=3, stride=2, pad=1))
    r = relu(conv(r, d["w2"], d["b2"], k=3, stride=1, pad=1))
    r = conv(r, d["w3"], None, k=1, pad=0)

    a = x.reshape(n, cin, ho_n, 2, wo_n, 2)
    hh = jnp.arange(ho_n).reshape(1, 1, ho_n, 1)
    ww = jnp.arange(wo_n).reshape(1, 1, 1, wo_n)
    best = a[:, :, :, 0, :, 0]
    bidx = jnp.broadcast_to(((2 * hh) * w + 2 * ww).astype(jnp.int32), best.shape)
    for dh in range(2):
        for dw in range(2):
            if dh == 0 and dw == 0:
                continue
            v = a[:, :, :, dh, :, dw]
            idx = ((2 * hh + dh) * w + (2 * ww + dw)).astype(jnp.int32)
            take = v > best
            best = jnp.where(take, v, best)
            bidx = jnp.where(take, jnp.broadcast_to(idx, best.shape), bidx)
    left = relu(conv(best, d["wl"], d["bl"], k=1, pad=0))
    y = prelu(left + r)

    for rp in params["regular"]:
        t1 = relu(conv(y, rp["w1"], rp["b1"], k=1, pad=0))
        t2 = relu(conv(t1, rp["w2"], rp["b2"], k=3, stride=1, pad=1))
        y = prelu(y + conv(t2, rp["w3"], None, k=1, pad=0))
    return y, bidx


# ---------------------------------------------------------------------------
if __name__ == "__main__":
    key = jax.random.PRNGKey(0)
    kx, kp = jax.random.split(key)

    N, CIN, H, W = 2, 16, 16, 16
    COUT = 32

    x = jax.random.normal(kx, (N, CIN, H, W), dtype=jnp.float32)   # NCHW like PyTorch
    params = init_params(kp, CIN, COUT)

    fwd = jax.jit(functools.partial(bottleneck1_forward, out_channels=COUT))
    y, idx = fwd(x, params)
    jax.block_until_ready((y, idx))

    assert y.shape == (N, COUT, H // 2, W // 2), y.shape
    assert idx.shape == (N, CIN, H // 2, W // 2), idx.shape
    assert y.dtype == jnp.float32 and idx.dtype == jnp.int32

    # Validate the fused kernel against a pure-JAX (lax.conv) reference.
    y_ref, idx_ref = jax.jit(bottleneck1_reference)(x, params)
    jax.block_until_ready((y_ref, idx_ref))
    rel_err = float(jnp.max(jnp.abs(y - y_ref)) / (jnp.max(jnp.abs(y_ref)) + 1e-6))
    assert rel_err < 0.1, f"kernel/reference mismatch: rel_err={rel_err}"
    assert bool(jnp.all(idx == idx_ref)), "maxpool indices mismatch"

    print("KERNEL_OK")
</pallas_src>

<mosaic_0001>
module attributes {stable_mosaic.version = 11 : i64} {
  func.func @_bottleneck1_kernel(%arg0: memref<4x16x128xf32, #tpu.memory_space<vmem>>, %arg1: memref<1x128xi32, #tpu.memory_space<vmem>>, %arg2: memref<1x128xi32, #tpu.memory_space<vmem>>, %arg3: memref<1x128xi32, #tpu.memory_space<vmem>>, %arg4: memref<4x1xf32, #tpu.memory_space<vmem>>, %arg5: memref<4x1xf32, #tpu.memory_space<vmem>>, %arg6: memref<32x1xf32, #tpu.memory_space<vmem>>, %arg7: memref<3x3x4x16xf32, #tpu.memory_space<vmem>>, %arg8: memref<3x3x4x4xf32, #tpu.memory_space<vmem>>, %arg9: memref<32x4xf32, #tpu.memory_space<vmem>>, %arg10: memref<32x16xf32, #tpu.memory_space<vmem>>, %arg11: memref<8x1xf32, #tpu.memory_space<vmem>>, %arg12: memref<8x1xf32, #tpu.memory_space<vmem>>, %arg13: memref<8x32xf32, #tpu.memory_space<vmem>>, %arg14: memref<3x3x8x8xf32, #tpu.memory_space<vmem>>, %arg15: memref<32x8xf32, #tpu.memory_space<vmem>>, %arg16: memref<8x1xf32, #tpu.memory_space<vmem>>, %arg17: memref<8x1xf32, #tpu.memory_space<vmem>>, %arg18: memref<8x32xf32, #tpu.memory_space<vmem>>, %arg19: memref<3x3x8x8xf32, #tpu.memory_space<vmem>>, %arg20: memref<32x8xf32, #tpu.memory_space<vmem>>, %arg21: memref<8x1xf32, #tpu.memory_space<vmem>>, %arg22: memref<8x1xf32, #tpu.memory_space<vmem>>, %arg23: memref<8x32xf32, #tpu.memory_space<vmem>>, %arg24: memref<3x3x8x8xf32, #tpu.memory_space<vmem>>, %arg25: memref<32x8xf32, #tpu.memory_space<vmem>>, %arg26: memref<8x1xf32, #tpu.memory_space<vmem>>, %arg27: memref<8x1xf32, #tpu.memory_space<vmem>>, %arg28: memref<8x32xf32, #tpu.memory_space<vmem>>, %arg29: memref<3x3x8x8xf32, #tpu.memory_space<vmem>>, %arg30: memref<32x8xf32, #tpu.memory_space<vmem>>, %arg31: memref<32x128xf32, #tpu.memory_space<vmem>>, %arg32: memref<16x128xi32, #tpu.memory_space<vmem>>) attributes {dimension_semantics = [], scalar_prefetch = 0 : i64, scratch_operands = 0 : i64, tpu.core_type = #tpu.core_type<tc>} {
    %c0 = arith.constant 0 : index
    %c0_0 = arith.constant 0 : index
    %0 = vector.load %arg4[%c0, %c0_0] : memref<4x1xf32, #tpu.memory_space<vmem>>, vector<4x1xf32>
    %c0_1 = arith.constant 0 : index
    %c0_2 = arith.constant 0 : index
    %1 = vector.load %arg5[%c0_1, %c0_2] : memref<4x1xf32, #tpu.memory_space<vmem>>, vector<4x1xf32>
    %c0_3 = arith.constant 0 : index
    %c0_4 = arith.constant 0 : index
    %2 = vector.load %arg6[%c0_3, %c0_4] : memref<32x1xf32, #tpu.memory_space<vmem>>, vector<32x1xf32>
    %c0_5 = arith.constant 0 : index
    %c0_6 = arith.constant 0 : index
    %c0_7 = arith.constant 0 : index
    %c0_8 = arith.constant 0 : index
    %3 = vector.load %arg7[%c0_5, %c0_6, %c0_7, %c0_8] : memref<3x3x4x16xf32, #tpu.memory_space<vmem>>, vector<3x3x4x16xf32>
    %c0_9 = arith.constant 0 : index
    %c0_10 = arith.constant 0 : index
    %c0_11 = arith.constant 0 : index
    %c0_12 = arith.constant 0 : index
    %4 = vector.load %arg8[%c0_9, %c0_10, %c0_11, %c0_12] : memref<3x3x4x4xf32, #tpu.memory_space<vmem>>, vector<3x3x4x4xf32>
    %c0_13 = arith.constant 0 : index
    %c0_14 = arith.constant 0 : index
    %5 = vector.load %arg9[%c0_13, %c0_14] : memref<32x4xf32, #tpu.memory_space<vmem>>, vector<32x4xf32>
    %c0_15 = arith.constant 0 : index
    %c0_16 = arith.constant 0 : index
    %6 = vector.load %arg10[%c0_15, %c0_16] : memref<32x16xf32, #tpu.memory_space<vmem>>, vector<32x16xf32>
    %c0_17 = arith.constant 0 : index
    %c0_18 = arith.constant 0 : index
    %7 = vector.load %arg11[%c0_17, %c0_18] : memref<8x1xf32, #tpu.memory_space<vmem>>, vector<8x1xf32>
    %c0_19 = arith.constant 0 : index
    %c0_20 = arith.constant 0 : index
    %8 = vector.load %arg12[%c0_19, %c0_20] : memref<8x1xf32, #tpu.memory_space<vmem>>, vector<8x1xf32>
    %c0_21 = arith.constant 0 : index
    %c0_22 = arith.constant 0 : index
    %9 = vector.load %arg13[%c0_21, %c0_22] : memref<8x32xf32, #tpu.memory_space<vmem>>, vector<8x32xf32>
    %c0_23 = arith.constant 0 : index
    %c0_24 = arith.constant 0 : index
    %c0_25 = arith.constant 0 : index
    %c0_26 = arith.constant 0 : index
    %10 = vector.load %arg14[%c0_23, %c0_24, %c0_25, %c0_26] : memref<3x3x8x8xf32, #tpu.memory_space<vmem>>, vector<3x3x8x8xf32>
    %c0_27 = arith.constant 0 : index
    %c0_28 = arith.constant 0 : index
    %11 = vector.load %arg15[%c0_27, %c0_28] : memref<32x8xf32, #tpu.memory_space<vmem>>, vector<32x8xf32>
    %c0_29 = arith.constant 0 : index
    %c0_30 = arith.constant 0 : index
    %12 = vector.load %arg16[%c0_29, %c0_30] : memref<8x1xf32, #tpu.memory_space<vmem>>, vector<8x1xf32>
    %c0_31 = arith.constant 0 : index
    %c0_32 = arith.constant 0 : index
    %13 = vector.load %arg17[%c0_31, %c0_32] : memref<8x1xf32, #tpu.memory_space<vmem>>, vector<8x1xf32>
    %c0_33 = arith.constant 0 : index
    %c0_34 = arith.constant 0 : index
    %14 = vector.load %arg18[%c0_33, %c0_34] : memref<8x32xf32, #tpu.memory_space<vmem>>, vector<8x32xf32>
    %c0_35 = arith.constant 0 : index
    %c0_36 = arith.constant 0 : index
    %c0_37 = arith.constant 0 : index
    %c0_38 = arith.constant 0 : index
    %15 = vector.load %arg19[%c0_35, %c0_36, %c0_37, %c0_38] : memref<3x3x8x8xf32, #tpu.memory_space<vmem>>, vector<3x3x8x8xf32>
    %c0_39 = arith.constant 0 : index
    %c0_40 = arith.constant 0 : index
    %16 = vector.load %arg20[%c0_39, %c0_40] : memref<32x8xf32, #tpu.memory_space<vmem>>, vector<32x8xf32>
    %c0_41 = arith.constant 0 : index
    %c0_42 = arith.constant 0 : index
    %17 = vector.load %arg21[%c0_41, %c0_42] : memref<8x1xf32, #tpu.memory_space<vmem>>, vector<8x1xf32>
    %c0_43 = arith.constant 0 : index
    %c0_44 = arith.constant 0 : index
    %18 = vector.load %arg22[%c0_43, %c0_44] : memref<8x1xf32, #tpu.memory_space<vmem>>, vector<8x1xf32>
    %c0_45 = arith.constant 0 : index
    %c0_46 = arith.constant 0 : index
    %19 = vector.load %arg23[%c0_45, %c0_46] : memref<8x32xf32, #tpu.memory_space<vmem>>, vector<8x32xf32>
    %c0_47 = arith.constant 0 : index
    %c0_48 = arith.constant 0 : index
    %c0_49 = arith.constant 0 : index
    %c0_50 = arith.constant 0 : index
    %20 = vector.load %arg24[%c0_47, %c0_48, %c0_49, %c0_50] : memref<3x3x8x8xf32, #tpu.memory_space<vmem>>, vector<3x3x8x8xf32>
    %c0_51 = arith.constant 0 : index
    %c0_52 = arith.constant 0 : index
    %21 = vector.load %arg25[%c0_51, %c0_52] : memref<32x8xf32, #tpu.memory_space<vmem>>, vector<32x8xf32>
    %c0_53 = arith.constant 0 : index
    %c0_54 = arith.constant 0 : index
    %22 = vector.load %arg26[%c0_53, %c0_54] : memref<8x1xf32, #tpu.memory_space<vmem>>, vector<8x1xf32>
    %c0_55 = arith.constant 0 : index
    %c0_56 = arith.constant 0 : index
    %23 = vector.load %arg27[%c0_55, %c0_56] : memref<8x1xf32, #tpu.memory_space<vmem>>, vector<8x1xf32>
    %c0_57 = arith.constant 0 : index
    %c0_58 = arith.constant 0 : index
    %24 = vector.load %arg28[%c0_57, %c0_58] : memref<8x32xf32, #tpu.memory_space<vmem>>, vector<8x32xf32>
    %c0_59 = arith.constant 0 : index
    %c0_60 = arith.constant 0 : index
    %c0_61 = arith.constant 0 : index
    %c0_62 = arith.constant 0 : index
    %25 = vector.load %arg29[%c0_59, %c0_60, %c0_61, %c0_62] : memref<3x3x8x8xf32, #tpu.memory_space<vmem>>, vector<3x3x8x8xf32>
    %c0_63 = arith.constant 0 : index
    %c0_64 = arith.constant 0 : index
    %26 = vector.load %arg30[%c0_63, %c0_64] : memref<32x8xf32, #tpu.memory_space<vmem>>, vector<32x8xf32>
    %c0_65 = arith.constant 0 : index
    %c0_66 = arith.constant 0 : index
    %c0_67 = arith.constant 0 : index
    %27 = vector.load %arg0[%c0_65, %c0_66, %c0_67] : memref<4x16x128xf32, #tpu.memory_space<vmem>>, vector<4x16x128xf32>
    %c0_68 = arith.constant 0 : index
    %c0_69 = arith.constant 0 : index
    %28 = vector.load %arg1[%c0_68, %c0_69] : memref<1x128xi32, #tpu.memory_space<vmem>>, vector<1x128xi32>
    %c0_70 = arith.constant 0 : index
    %c0_71 = arith.constant 0 : index
    %29 = vector.load %arg2[%c0_70, %c0_71] : memref<1x128xi32, #tpu.memory_space<vmem>>, vector<1x128xi32>
    %c0_72 = arith.constant 0 : index
    %c0_73 = arith.constant 0 : index
    %30 = vector.load %arg3[%c0_72, %c0_73] : memref<1x128xi32, #tpu.memory_space<vmem>>, vector<1x128xi32>
    %31 = vector.extract_strided_slice %3 {offsets = [0, 0, 0, 0], sizes = [1, 1, 4, 16], strides = [1, 1, 1, 1]} : vector<3x3x4x16xf32> to vector<1x1x4x16xf32>
    %32 = vector.shape_cast %31 : vector<1x1x4x16xf32> to vector<4x16xf32>
    %33 = vector.extract_strided_slice %27 {offsets = [3, 0, 0], sizes = [1, 16, 128], strides = [1, 1, 1]} : vector<4x16x128xf32> to vector<1x16x128xf32>
    %34 = vector.shape_cast %33 : vector<1x16x128xf32> to vector<16x128xf32>
    %35 = vector.extract_strided_slice %34 {offsets = [0, 119], sizes = [16, 9], strides = [1, 1]} : vector<16x128xf32> to vector<16x9xf32>
    %36 = vector.extract_strided_slice %34 {offsets = [0, 0], sizes = [16, 119], strides = [1, 1]} : vector<16x128xf32> to vector<16x119xf32>
    %37 = tpu.concatenate %35, %36 in 1 : vector<16x9xf32>, vector<16x119xf32> -> vector<16x128xf32>
    %c-1_i32 = arith.constant -1 : i32
    %38 = vector.broadcast %c-1_i32 : i32 to vector<1x128xi32>
    %39 = arith.addi %28, %38 : vector<1x128xi32>
    %c-1_i32_74 = arith.constant -1 : i32
    %40 = vector.broadcast %c-1_i32_74 : i32 to vector<1x128xi32>
    %41 = arith.addi %29, %40 : vector<1x128xi32>
    %c0_i32 = arith.constant 0 : i32
    %42 = vector.broadcast %c0_i32 : i32 to vector<1x128xi32>
    %43 = arith.cmpi sge, %39, %42 : vector<1x128xi32>
    %c8_i32 = arith.constant 8 : i32
    %44 = vector.broadcast %c8_i32 : i32 to vector<1x128xi32>
    %45 = arith.cmpi slt, %39, %44 : vector<1x128xi32>
    %46 = arith.andi %43, %45 : vector<1x128xi1>
    %c0_i32_75 = arith.constant 0 : i32
    %47 = vector.broadcast %c0_i32_75 : i32 to vector<1x128xi32>
    %48 = arith.cmpi sge, %41, %47 : vector<1x128xi32>
    %49 = arith.andi %46, %48 : vector<1x128xi1>
    %c8_i32_76 = arith.constant 8 : i32
    %50 = vector.broadcast %c8_i32_76 : i32 to vector<1x128xi32>
    %51 = arith.cmpi slt, %41, %50 : vector<1x128xi32>
    %52 = arith.andi %49, %51 : vector<1x128xi1>
    %cst = arith.constant 0.000000e+00 : f32
    %53 = vector.shape_cast %52 : vector<1x128xi1> to vector<1x128xi1>
    %54 = vector.broadcast %53 : vector<1x128xi1> to vector<16x128xi1>
    %55 = vector.broadcast %cst : f32 to vector<16x128xf32>
    %56 = arith.select %54, %37, %55 : vector<16x128xi1>, vector<16x128xf32>
    %cst_77 = arith.constant dense<0.000000e+00> : vector<4x128xf32>
    %57 = tpu.matmul %32, %56, %cst_77 {dimension_numbers = #tpu.dot_dimension_numbers<[1], [0], [0], [1], [0, 0, 1, 1], [], []>} : vector<4x16xf32>, vector<16x128xf32>, vector<4x128xf32> -> vector<4x128xf32>
    %58 = vector.extract_strided_slice %3 {offsets = [0, 1, 0, 0], sizes = [1, 1, 4, 16], strides = [1, 1, 1, 1]} : vector<3x3x4x16xf32> to vector<1x1x4x16xf32>
    %59 = vector.shape_cast %58 : vector<1x1x4x16xf32> to vector<4x16xf32>
    %60 = vector.extract_strided_slice %27 {offsets = [2, 0, 0], sizes = [1, 16, 128], strides = [1, 1, 1]} : vector<4x16x128xf32> to vector<1x16x128xf32>
    %61 = vector.shape_cast %60 : vector<1x16x128xf32> to vector<16x128xf32>
    %62 = vector.extract_strided_slice %61 {offsets = [0, 120], sizes = [16, 8], strides = [1, 1]} : vector<16x128xf32> to vector<16x8xf32>
    %63 = vector.extract_strided_slice %61 {offsets = [0, 0], sizes = [16, 120], strides = [1, 1]} : vector<16x128xf32> to vector<16x120xf32>
    %64 = tpu.concatenate %62, %63 in 1 : vector<16x8xf32>, vector<16x120xf32> -> vector<16x128xf32>
    %c-1_i32_78 = arith.constant -1 : i32
    %65 = vector.broadcast %c-1_i32_78 : i32 to vector<1x128xi32>
    %66 = arith.addi %28, %65 : vector<1x128xi32>
    %c0_i32_79 = arith.constant 0 : i32
    %67 = vector.broadcast %c0_i32_79 : i32 to vector<1x128xi32>
    %68 = arith.addi %29, %67 : vector<1x128xi32>
    %c0_i32_80 = arith.constant 0 : i32
    %69 = vector.broadcast %c0_i32_80 : i32 to vector<1x128xi32>
    %70 = arith.cmpi sge, %66, %69 : vector<1x128xi32>
    %c8_i32_81 = arith.constant 8 : i32
    %71 = vector.broadcast %c8_i32_81 : i32 to vector<1x128xi32>
    %72 = arith.cmpi slt, %66, %71 : vector<1x128xi32>
    %73 = arith.andi %70, %72 : vector<1x128xi1>
    %c0_i32_82 = arith.constant 0 : i32
    %74 = vector.broadcast %c0_i32_82 : i32 to vector<1x128xi32>
    %75 = arith.cmpi sge, %68, %74 : vector<1x128xi32>
    %76 = arith.andi %73, %75 : vector<1x128xi1>
    %c8_i32_83 = arith.constant 8 : i32
    %77 = vector.broadcast %c8_i32_83 : i32 to vector<1x128xi32>
    %78 = arith.cmpi slt, %68, %77 : vector<1x128xi32>
    %79 = arith.andi %76, %78 : vector<1x128xi1>
    %cst_84 = arith.constant 0.000000e+00 : f32
    %80 = vector.shape_cast %79 : vector<1x128xi1> to vector<1x128xi1>
    %81 = vector.broadcast %80 : vector<1x128xi1> to vector<16x128xi1>
    %82 = vector.broadcast %cst_84 : f32 to vector<16x128xf32>
    %83 = arith.select %81, %64, %82 : vector<16x128xi1>, vector<16x128xf32>
    %cst_85 = arith.constant dense<0.000000e+00> : vector<4x128xf32>
    %84 = tpu.matmul %59, %83, %cst_85 {dimension_numbers = #tpu.dot_dimension_numbers<[1], [0], [0], [1], [0, 0, 1, 1], [], []>} : vector<4x16xf32>, vector<16x128xf32>, vector<4x128xf32> -> vector<4x128xf32>
    %85 = arith.addf %57, %84 : vector<4x128xf32>
    %86 = vector.extract_strided_slice %3 {offsets = [0, 2, 0, 0], sizes = [1, 1, 4, 16], strides = [1, 1, 1, 1]} : vector<3x3x4x16xf32> to vector<1x1x4x16xf32>
    %87 = vector.shape_cast %86 : vector<1x1x4x16xf32> to vector<4x16xf32>
    %88 = vector.extract_strided_slice %27 {offsets = [3, 0, 0], sizes = [1, 16, 128], strides = [1, 1, 1]} : vector<4x16x128xf32> to vector<1x16x128xf32>
    %89 = vector.shape_cast %88 : vector<1x16x128xf32> to vector<16x128xf32>
    %90 = vector.extract_strided_slice %89 {offsets = [0, 120], sizes = [16, 8], strides = [1, 1]} : vector<16x128xf32> to vector<16x8xf32>
    %91 = vector.extract_strided_slice %89 {offsets = [0, 0], sizes = [16, 120], strides = [1, 1]} : vector<16x128xf32> to vector<16x120xf32>
    %92 = tpu.concatenate %90, %91 in 1 : vector<16x8xf32>, vector<16x120xf32> -> vector<16x128xf32>
    %c-1_i32_86 = arith.constant -1 : i32
    %93 = vector.broadcast %c-1_i32_86 : i32 to vector<1x128xi32>
    %94 = arith.addi %28, %93 : vector<1x128xi32>
    %c0_i32_87 = arith.constant 0 : i32
    %95 = vector.broadcast %c0_i32_87 : i32 to vector<1x128xi32>
    %96 = arith.addi %29, %95 : vector<1x128xi32>
    %c0_i32_88 = arith.constant 0 : i32
    %97 = vector.broadcast %c0_i32_88 : i32 to vector<1x128xi32>
    %98 = arith.cmpi sge, %94, %97 : vector<1x128xi32>
    %c8_i32_89 = arith.constant 8 : i32
    %99 = vector.broadcast %c8_i32_89 : i32 to vector<1x128xi32>
    %100 = arith.cmpi slt, %94, %99 : vector<1x128xi32>
    %101 = arith.andi %98, %100 : vector<1x128xi1>
    %c0_i32_90 = arith.constant 0 : i32
    %102 = vector.broadcast %c0_i32_90 : i32 to vector<1x128xi32>
    %103 = arith.cmpi sge, %96, %102 : vector<1x128xi32>
    %104 = arith.andi %101, %103 : vector<1x128xi1>
    %c8_i32_91 = arith.constant 8 : i32
    %105 = vector.broadcast %c8_i32_91 : i32 to vector<1x128xi32>
    %106 = arith.cmpi slt, %96, %105 : vector<1x128xi32>
    %107 = arith.andi %104, %106 : vector<1x128xi1>
    %cst_92 = arith.constant 0.000000e+00 : f32
    %108 = vector.shape_cast %107 : vector<1x128xi1> to vector<1x128xi1>
    %109 = vector.broadcast %108 : vector<1x128xi1> to vector<16x128xi1>
    %110 = vector.broadcast %cst_92 : f32 to vector<16x128xf32>
    %111 = arith.select %109, %92, %110 : vector<16x128xi1>, vector<16x128xf32>
    %cst_93 = arith.constant dense<0.000000e+00> : vector<4x128xf32>
    %112 = tpu.matmul %87, %111, %cst_93 {dimension_numbers = #tpu.dot_dimension_numbers<[1], [0], [0], [1], [0, 0, 1, 1], [], []>} : vector<4x16xf32>, vector<16x128xf32>, vector<4x128xf32> -> vector<4x128xf32>
    %113 = arith.addf %85, %112 : vector<4x128xf32>
    %114 = vector.extract_strided_slice %3 {offsets = [1, 0, 0, 0], sizes = [1, 1, 4, 16], strides = [1, 1, 1, 1]} : vector<3x3x4x16xf32> to vector<1x1x4x16xf32>
    %115 = vector.shape_cast %114 : vector<1x1x4x16xf32> to vector<4x16xf32>
    %116 = vector.extract_strided_slice %27 {offsets = [1, 0, 0], sizes = [1, 16, 128], strides = [1, 1, 1]} : vector<4x16x128xf32> to vector<1x16x128xf32>
    %117 = vector.shape_cast %116 : vector<1x16x128xf32> to vector<16x128xf32>
    %118 = vector.extract_strided_slice %117 {offsets = [0, 127], sizes = [16, 1], strides = [1, 1]} : vector<16x128xf32> to vector<16x1xf32>
    %119 = vector.extract_strided_slice %117 {offsets = [0, 0], sizes = [16, 127], strides = [1, 1]} : vector<16x128xf32> to vector<16x127xf32>
    %120 = tpu.concatenate %118, %119 in 1 : vector<16x1xf32>, vector<16x127xf32> -> vector<16x128xf32>
    %c0_i32_94 = arith.constant 0 : i32
    %121 = vector.broadcast %c0_i32_94 : i32 to vector<1x128xi32>
    %122 = arith.addi %28, %121 : vector<1x128xi32>
    %c-1_i32_95 = arith.constant -1 : i32
    %123 = vector.broadcast %c-1_i32_95 : i32 to vector<1x128xi32>
    %124 = arith.addi %29, %123 : vector<1x128xi32>
    %c0_i32_96 = arith.constant 0 : i32
    %125 = vector.broadcast %c0_i32_96 : i32 to vector<1x128xi32>
    %126 = arith.cmpi sge, %122, %125 : vector<1x128xi32>
    %c8_i32_97 = arith.constant 8 : i32
    %127 = vector.broadcast %c8_i32_97 : i32 to vector<1x128xi32>
    %128 = arith.cmpi slt, %122, %127 : vector<1x128xi32>
    %129 = arith.andi %126, %128 : vector<1x128xi1>
    %c0_i32_98 = arith.constant 0 : i32
    %130 = vector.broadcast %c0_i32_98 : i32 to vector<1x128xi32>
    %131 = arith.cmpi sge, %124, %130 : vector<1x128xi32>
    %132 = arith.andi %129, %131 : vector<1x128xi1>
    %c8_i32_99 = arith.constant 8 : i32
    %133 = vector.broadcast %c8_i32_99 : i32 to vector<1x128xi32>
    %134 = arith.cmpi slt, %124, %133 : vector<1x128xi32>
    %135 = arith.andi %132, %134 : vector<1x128xi1>
    %cst_100 = arith.constant 0.000000e+00 : f32
    %136 = vector.shape_cast %135 : vector<1x128xi1> to vector<1x128xi1>
    %137 = vector.broadcast %136 : vector<1x128xi1> to vector<16x128xi1>
    %138 = vector.broadcast %cst_100 : f32 to vector<16x128xf32>
    %139 = arith.select %137, %120, %138 : vector<16x128xi1>, vector<16x128xf32>
    %cst_101 = arith.constant dense<0.000000e+00> : vector<4x128xf32>
    %140 = tpu.matmul %115, %139, %cst_101 {dimension_numbers = #tpu.dot_dimension_numbers<[1], [0], [0], [1], [0, 0, 1, 1], [], []>} : vector<4x16xf32>, vector<16x128xf32>, vector<4x128xf32> -> vector<4x128xf32>
    %141 = arith.addf %113, %140 : vector<4x128xf32>
    %142 = vector.extract_strided_slice %3 {offsets = [1, 1, 0, 0], sizes = [1, 1, 4, 16], strides = [1, 1, 1, 1]} : vector<3x3x4x16xf32> to vector<1x1x4x16xf32>
    %143 = vector.shape_cast %142 : vector<1x1x4x16xf32> to vector<4x16xf32>
    %144 = vector.extract_strided_slice %27 {offsets = [0, 0, 0], sizes = [1, 16, 128], strides = [1, 1, 1]} : vector<4x16x128xf32> to vector<1x16x128xf32>
    %145 = vector.shape_cast %144 : vector<1x16x128xf32> to vector<16x128xf32>
    %c0_i32_102 = arith.constant 0 : i32
    %146 = vector.broadcast %c0_i32_102 : i32 to vector<1x128xi32>
    %147 = arith.addi %28, %146 : vector<1x128xi32>
    %c0_i32_103 = arith.constant 0 : i32
    %148 = vector.broadcast %c0_i32_103 : i32 to vector<1x128xi32>
    %149 = arith.addi %29, %148 : vector<1x128xi32>
    %c0_i32_104 = arith.constant 0 : i32
    %150 = vector.broadcast %c0_i32_104 : i32 to vector<1x128xi32>
    %151 = arith.cmpi sge, %147, %150 : vector<1x128xi32>
    %c8_i32_105 = arith.constant 8 : i32
    %152 = vector.broadcast %c8_i32_105 : i32 to vector<1x128xi32>
    %153 = arith.cmpi slt, %147, %152 : vector<1x128xi32>
    %154 = arith.andi %151, %153 : vector<1x128xi1>
    %c0_i32_106 = arith.constant 0 : i32
    %155 = vector.broadcast %c0_i32_106 : i32 to vector<1x128xi32>
    %156 = arith.cmpi sge, %149, %155 : vector<1x128xi32>
    %157 = arith.andi %154, %156 : vector<1x128xi1>
    %c8_i32_107 = arith.constant 8 : i32
    %158 = vector.broadcast %c8_i32_107 : i32 to vector<1x128xi32>
    %159 = arith.cmpi slt, %149, %158 : vector<1x128xi32>
    %160 = arith.andi %157, %159 : vector<1x128xi1>
    %cst_108 = arith.constant 0.000000e+00 : f32
    %161 = vector.shape_cast %160 : vector<1x128xi1> to vector<1x128xi1>
    %162 = vector.broadcast %161 : vector<1x128xi1> to vector<16x128xi1>
    %163 = vector.broadcast %cst_108 : f32 to vector<16x128xf32>
    %164 = arith.select %162, %145, %163 : vector<16x128xi1>, vector<16x128xf32>
    %cst_109 = arith.constant dense<0.000000e+00> : vector<4x128xf32>
    %165 = tpu.matmul %143, %164, %cst_109 {dimension_numbers = #tpu.dot_dimension_numbers<[1], [0], [0], [1], [0, 0, 1, 1], [], []>} : vector<4x16xf32>, vector<16x128xf32>, vector<4x128xf32> -> vector<4x128xf32>
    %166 = arith.addf %141, %165 : vector<4x128xf32>
    %167 = vector.extract_strided_slice %3 {offsets = [1, 2, 0, 0], sizes = [1, 1, 4, 16], strides = [1, 1, 1, 1]} : vector<3x3x4x16xf32> to vector<1x1x4x16xf32>
    %168 = vector.shape_cast %167 : vector<1x1x4x16xf32> to vector<4x16xf32>
    %169 = vector.extract_strided_slice %27 {offsets = [1, 0, 0], sizes = [1, 16, 128], strides = [1, 1, 1]} : vector<4x16x128xf32> to vector<1x16x128xf32>
    %170 = vector.shape_cast %169 : vector<1x16x128xf32> to vector<16x128xf32>
    %c0_i32_110 = arith.constant 0 : i32
    %171 = vector.broadcast %c0_i32_110 : i32 to vector<1x128xi32>
    %172 = arith.addi %28, %171 : vector<1x128xi32>
    %c0_i32_111 = arith.constant 0 : i32
    %173 = vector.broadcast %c0_i32_111 : i32 to vector<1x128xi32>
    %174 = arith.addi %29, %173 : vector<1x128xi32>
    %c0_i32_112 = arith.constant 0 : i32
    %175 = vector.broadcast %c0_i32_112 : i32 to vector<1x128xi32>
    %176 = arith.cmpi sge, %172, %175 : vector<1x128xi32>
    %c8_i32_113 = arith.constant 8 : i32
    %177 = vector.broadcast %c8_i32_113 : i32 to vector<1x128xi32>
    %178 = arith.cmpi slt, %172, %177 : vector<1x128xi32>
    %179 = arith.andi %176, %178 : vector<1x128xi1>
    %c0_i32_114 = arith.constant 0 : i32
    %180 = vector.broadcast %c0_i32_114 : i32 to vector<1x128xi32>
    %181 = arith.cmpi sge, %174, %180 : vector<1x128xi32>
    %182 = arith.andi %179, %181 : vector<1x128xi1>
    %c8_i32_115 = arith.constant 8 : i32
    %183 = vector.broadcast %c8_i32_115 : i32 to vector<1x128xi32>
    %184 = arith.cmpi slt, %174, %183 : vector<1x128xi32>
    %185 = arith.andi %182, %184 : vector<1x128xi1>
    %cst_116 = arith.constant 0.000000e+00 : f32
    %186 = vector.shape_cast %185 : vector<1x128xi1> to vector<1x128xi1>
    %187 = vector.broadcast %186 : vector<1x128xi1> to vector<16x128xi1>
    %188 = vector.broadcast %cst_116 : f32 to vector<16x128xf32>
    %189 = arith.select %187, %170, %188 : vector<16x128xi1>, vector<16x128xf32>
    %cst_117 = arith.constant dense<0.000000e+00> : vector<4x128xf32>
    %190 = tpu.matmul %168, %189, %cst_117 {dimension_numbers = #tpu.dot_dimension_numbers<[1], [0], [0], [1], [0, 0, 1, 1], [], []>} : vector<4x16xf32>, vector<16x128xf32>, vector<4x128xf32> -> vector<4x128xf32>
    %191 = arith.addf %166, %190 : vector<4x128xf32>
    %192 = vector.extract_strided_slice %3 {offsets = [2, 0, 0, 0], sizes = [1, 1, 4, 16], strides = [1, 1, 1, 1]} : vector<3x3x4x16xf32> to vector<1x1x4x16xf32>
    %193 = vector.shape_cast %192 : vector<1x1x4x16xf32> to vector<4x16xf32>
    %194 = vector.extract_strided_slice %27 {offsets = [3, 0, 0], sizes = [1, 16, 128], strides = [1, 1, 1]} : vector<4x16x128xf32> to vector<1x16x128xf32>
    %195 = vector.shape_cast %194 : vector<1x16x128xf32> to vector<16x128xf32>
    %196 = vector.extract_strided_slice %195 {offsets = [0, 127], sizes = [16, 1], strides = [1, 1]} : vector<16x128xf32> to vector<16x1xf32>
    %197 = vector.extract_strided_slice %195 {offsets = [0, 0], sizes = [16, 127], strides = [1, 1]} : vector<16x128xf32> to vector<16x127xf32>
    %198 = tpu.concatenate %196, %197 in 1 : vector<16x1xf32>, vector<16x127xf32> -> vector<16x128xf32>
    %c0_i32_118 = arith.constant 0 : i32
    %199 = vector.broadcast %c0_i32_118 : i32 to vector<1x128xi32>
    %200 = arith.addi %28, %199 : vector<1x128xi32>
    %c-1_i32_119 = arith.constant -1 : i32
    %201 = vector.broadcast %c-1_i32_119 : i32 to vector<1x128xi32>
    %202 = arith.addi %29, %201 : vector<1x128xi32>
    %c0_i32_120 = arith.constant 0 : i32
    %203 = vector.broadcast %c0_i32_120 : i32 to vector<1x128xi32>
    %204 = arith.cmpi sge, %200, %203 : vector<1x128xi32>
    %c8_i32_121 = arith.constant 8 : i32
    %205 = vector.broadcast %c8_i32_121 : i32 to vector<1x128xi32>
    %206 = arith.cmpi slt, %200, %205 : vector<1x128xi32>
    %207 = arith.andi %204, %206 : vector<1x128xi1>
    %c0_i32_122 = arith.constant 0 : i32
    %208 = vector.broadcast %c0_i32_122 : i32 to vector<1x128xi32>
    %209 = arith.cmpi sge, %202, %208 : vector<1x128xi32>
    %210 = arith.andi %207, %209 : vector<1x128xi1>
    %c8_i32_123 = arith.constant 8 : i32
    %211 = vector.broadcast %c8_i32_123 : i32 to vector<1x128xi32>
    %212 = arith.cmpi slt, %202, %211 : vector<1x128xi32>
    %213 = arith.andi %210, %212 : vector<1x128xi1>
    %cst_124 = arith.constant 0.000000e+00 : f32
    %214 = vector.shape_cast %213 : vector<1x128xi1> to vector<1x128xi1>
    %215 = vector.broadcast %214 : vector<1x128xi1> to vector<16x128xi1>
    %216 = vector.broadcast %cst_124 : f32 to vector<16x128xf32>
    %217 = arith.select %215, %198, %216 : vector<16x128xi1>, vector<16x128xf32>
    %cst_125 = arith.constant dense<0.000000e+00> : vector<4x128xf32>
    %218 = tpu.matmul %193, %217, %cst_125 {dimension_numbers = #tpu.dot_dimension_numbers<[1], [0], [0], [1], [0, 0, 1, 1], [], []>} : vector<4x16xf32>, vector<16x128xf32>, vector<4x128xf32> -> vector<4x128xf32>
    %219 = arith.addf %191, %218 : vector<4x128xf32>
    %220 = vector.extract_strided_slice %3 {offsets = [2, 1, 0, 0], sizes = [1, 1, 4, 16], strides = [1, 1, 1, 1]} : vector<3x3x4x16xf32> to vector<1x1x4x16xf32>
    %221 = vector.shape_cast %220 : vector<1x1x4x16xf32> to vector<4x16xf32>
    %222 = vector.extract_strided_slice %27 {offsets = [2, 0, 0], sizes = [1, 16, 128], strides = [1, 1, 1]} : vector<4x16x128xf32> to vector<1x16x128xf32>
    %223 = vector.shape_cast %222 : vector<1x16x128xf32> to vector<16x128xf32>
    %c0_i32_126 = arith.constant 0 : i32
    %224 = vector.broadcast %c0_i32_126 : i32 to vector<1x128xi32>
    %225 = arith.addi %28, %224 : vector<1x128xi32>
    %c0_i32_127 = arith.constant 0 : i32
    %226 = vector.broadcast %c0_i32_127 : i32 to vector<1x128xi32>
    %227 = arith.addi %29, %226 : vector<1x128xi32>
    %c0_i32_128 = arith.constant 0 : i32
    %228 = vector.broadcast %c0_i32_128 : i32 to vector<1x128xi32>
    %229 = arith.cmpi sge, %225, %228 : vector<1x128xi32>
    %c8_i32_129 = arith.constant 8 : i32
    %230 = vector.broadcast %c8_i32_129 : i32 to vector<1x128xi32>
    %231 = arith.cmpi slt, %225, %230 : vector<1x128xi32>
    %232 = arith.andi %229, %231 : vector<1x128xi1>
    %c0_i32_130 = arith.constant 0 : i32
    %233 = vector.broadcast %c0_i32_130 : i32 to vector<1x128xi32>
    %234 = arith.cmpi sge, %227, %233 : vector<1x128xi32>
    %235 = arith.andi %232, %234 : vector<1x128xi1>
    %c8_i32_131 = arith.constant 8 : i32
    %236 = vector.broadcast %c8_i32_131 : i32 to vector<1x128xi32>
    %237 = arith.cmpi slt, %227, %236 : vector<1x128xi32>
    %238 = arith.andi %235, %237 : vector<1x128xi1>
    %cst_132 = arith.constant 0.000000e+00 : f32
    %239 = vector.shape_cast %238 : vector<1x128xi1> to vector<1x128xi1>
    %240 = vector.broadcast %239 : vector<1x128xi1> to vector<16x128xi1>
    %241 = vector.broadcast %cst_132 : f32 to vector<16x128xf32>
    %242 = arith.select %240, %223, %241 : vector<16x128xi1>, vector<16x128xf32>
    %cst_133 = arith.constant dense<0.000000e+00> : vector<4x128xf32>
    %243 = tpu.matmul %221, %242, %cst_133 {dimension_numbers = #tpu.dot_dimension_numbers<[1], [0], [0], [1], [0, 0, 1, 1], [], []>} : vector<4x16xf32>, vector<16x128xf32>, vector<4x128xf32> -> vector<4x128xf32>
    %244 = arith.addf %219, %243 : vector<4x128xf32>
    %245 = vector.extract_strided_slice %3 {offsets = [2, 2, 0, 0], sizes = [1, 1, 4, 16], strides = [1, 1, 1, 1]} : vector<3x3x4x16xf32> to vector<1x1x4x16xf32>
    %246 = vector.shape_cast %245 : vector<1x1x4x16xf32> to vector<4x16xf32>
    %247 = vector.extract_strided_slice %27 {offsets = [3, 0, 0], sizes = [1, 16, 128], strides = [1, 1, 1]} : vector<4x16x128xf32> to vector<1x16x128xf32>
    %248 = vector.shape_cast %247 : vector<1x16x128xf32> to vector<16x128xf32>
    %c0_i32_134 = arith.constant 0 : i32
    %249 = vector.broadcast %c0_i32_134 : i32 to vector<1x128xi32>
    %250 = arith.addi %28, %249 : vector<1x128xi32>
    %c0_i32_135 = arith.constant 0 : i32
    %251 = vector.broadcast %c0_i32_135 : i32 to vector<1x128xi32>
    %252 = arith.addi %29, %251 : vector<1x128xi32>
    %c0_i32_136 = arith.constant 0 : i32
    %253 = vector.broadcast %c0_i32_136 : i32 to vector<1x128xi32>
    %254 = arith.cmpi sge, %250, %253 : vector<1x128xi32>
    %c8_i32_137 = arith.constant 8 : i32
    %255 = vector.broadcast %c8_i32_137 : i32 to vector<1x128xi32>
    %256 = arith.cmpi slt, %250, %255 : vector<1x128xi32>
    %257 = arith.andi %254, %256 : vector<1x128xi1>
    %c0_i32_138 = arith.constant 0 : i32
    %258 = vector.broadcast %c0_i32_138 : i32 to vector<1x128xi32>
    %259 = arith.cmpi sge, %252, %258 : vector<1x128xi32>
    %260 = arith.andi %257, %259 : vector<1x128xi1>
    %c8_i32_139 = arith.constant 8 : i32
    %261 = vector.broadcast %c8_i32_139 : i32 to vector<1x128xi32>
    %262 = arith.cmpi slt, %252, %261 : vector<1x128xi32>
    %263 = arith.andi %260, %262 : vector<1x128xi1>
    %cst_140 = arith.constant 0.000000e+00 : f32
    %264 = vector.shape_cast %263 : vector<1x128xi1> to vector<1x128xi1>
    %265 = vector.broadcast %264 : vector<1x128xi1> to vector<16x128xi1>
    %266 = vector.broadcast %cst_140 : f32 to vector<16x128xf32>
    %267 = arith.select %265, %248, %266 : vector<16x128xi1>, vector<16x128xf32>
    %cst_141 = arith.constant dense<0.000000e+00> : vector<4x128xf32>
    %268 = tpu.matmul %246, %267, %cst_141 {dimension_numbers = #tpu.dot_dimension_numbers<[1], [0], [0], [1], [0, 0, 1, 1], [], []>} : vector<4x16xf32>, vector<16x128xf32>, vector<4x128xf32> -> vector<4x128xf32>
    %269 = arith.addf %244, %268 : vector<4x128xf32>
    %270 = vector.broadcast %0 : vector<4x1xf32> to vector<4x128xf32>
    %271 = arith.addf %269, %270 : vector<4x128xf32>
    %cst_142 = arith.constant 0.000000e+00 : f32
    %272 = vector.broadcast %cst_142 : f32 to vector<4x128xf32>
    %273 = arith.maximumf %271, %272 : vector<4x128xf32>
    %274 = vector.extract_strided_slice %4 {offsets = [0, 0, 0, 0], sizes = [1, 1, 4, 4], strides = [1, 1, 1, 1]} : vector<3x3x4x4xf32> to vector<1x1x4x4xf32>
    %275 = vector.shape_cast %274 : vector<1x1x4x4xf32> to vector<4x4xf32>
    %276 = vector.extract_strided_slice %273 {offsets = [0, 119], sizes = [4, 9], strides = [1, 1]} : vector<4x128xf32> to vector<4x9xf32>
    %277 = vector.extract_strided_slice %273 {offsets = [0, 0], sizes = [4, 119], strides = [1, 1]} : vector<4x128xf32> to vector<4x119xf32>
    %278 = tpu.concatenate %276, %277 in 1 : vector<4x9xf32>, vector<4x119xf32> -> vector<4x128xf32>
    %c-1_i32_143 = arith.constant -1 : i32
    %279 = vector.broadcast %c-1_i32_143 : i32 to vector<1x128xi32>
    %280 = arith.addi %28, %279 : vector<1x128xi32>
    %c-1_i32_144 = arith.constant -1 : i32
    %281 = vector.broadcast %c-1_i32_144 : i32 to vector<1x128xi32>
    %282 = arith.addi %29, %281 : vector<1x128xi32>
    %c0_i32_145 = arith.constant 0 : i32
    %283 = vector.broadcast %c0_i32_145 : i32 to vector<1x128xi32>
    %284 = arith.cmpi sge, %280, %283 : vector<1x128xi32>
    %c8_i32_146 = arith.constant 8 : i32
    %285 = vector.broadcast %c8_i32_146 : i32 to vector<1x128xi32>
    %286 = arith.cmpi slt, %280, %285 : vector<1x128xi32>
    %287 = arith.andi %284, %286 : vector<1x128xi1>
    %c0_i32_147 = arith.constant 0 : i32
    %288 = vector.broadcast %c0_i32_147 : i32 to vector<1x128xi32>
    %289 = arith.cmpi sge, %282, %288 : vector<1x128xi32>
    %290 = arith.andi %287, %289 : vector<1x128xi1>
    %c8_i32_148 = arith.constant 8 : i32
    %291 = vector.broadcast %c8_i32_148 : i32 to vector<1x128xi32>
    %292 = arith.cmpi slt, %282, %291 : vector<1x128xi32>
    %293 = arith.andi %290, %292 : vector<1x128xi1>
    %cst_149 = arith.constant 0.000000e+00 : f32
    %294 = vector.shape_cast %293 : vector<1x128xi1> to vector<1x128xi1>
    %295 = vector.broadcast %294 : vector<1x128xi1> to vector<4x128xi1>
    %296 = vector.broadcast %cst_149 : f32 to vector<4x128xf32>
    %297 = arith.select %295, %278, %296 : vector<4x128xi1>, vector<4x128xf32>
    %cst_150 = arith.constant dense<0.000000e+00> : vector<4x128xf32>
    %298 = tpu.matmul %275, %297, %cst_150 {dimension_numbers = #tpu.dot_dimension_numbers<[1], [0], [0], [1], [0, 0, 1, 1], [], []>} : vector<4x4xf32>, vector<4x128xf32>, vector<4x128xf32> -> vector<4x128xf32>
    %299 = vector.extract_strided_slice %4 {offsets = [0, 1, 0, 0], sizes = [1, 1, 4, 4], strides = [1, 1, 1, 1]} : vector<3x3x4x4xf32> to vector<1x1x4x4xf32>
    %300 = vector.shape_cast %299 : vector<1x1x4x4xf32> to vector<4x4xf32>
    %301 = vector.extract_strided_slice %273 {offsets = [0, 120], sizes = [4, 8], strides = [1, 1]} : vector<4x128xf32> to vector<4x8xf32>
    %302 = vector.extract_strided_slice %273 {offsets = [0, 0], sizes = [4, 120], strides = [1, 1]} : vector<4x128xf32> to vector<4x120xf32>
    %303 = tpu.concatenate %301, %302 in 1 : vector<4x8xf32>, vector<4x120xf32> -> vector<4x128xf32>
    %c-1_i32_151 = arith.constant -1 : i32
    %304 = vector.broadcast %c-1_i32_151 : i32 to vector<1x128xi32>
    %305 = arith.addi %28, %304 : vector<1x128xi32>
    %c0_i32_152 = arith.constant 0 : i32
    %306 = vector.broadcast %c0_i32_152 : i32 to vector<1x128xi32>
    %307 = arith.addi %29, %306 : vector<1x128xi32>
    %c0_i32_153 = arith.constant 0 : i32
    %308 = vector.broadcast %c0_i32_153 : i32 to vector<1x128xi32>
    %309 = arith.cmpi sge, %305, %308 : vector<1x128xi32>
    %c8_i32_154 = arith.constant 8 : i32
    %310 = vector.broadcast %c8_i32_154 : i32 to vector<1x128xi32>
    %311 = arith.cmpi slt, %305, %310 : vector<1x128xi32>
    %312 = arith.andi %309, %311 : vector<1x128xi1>
    %c0_i32_155 = arith.constant 0 : i32
    %313 = vector.broadcast %c0_i32_155 : i32 to vector<1x128xi32>
    %314 = arith.cmpi sge, %307, %313 : vector<1x128xi32>
    %315 = arith.andi %312, %314 : vector<1x128xi1>
    %c8_i32_156 = arith.constant 8 : i32
    %316 = vector.broadcast %c8_i32_156 : i32 to vector<1x128xi32>
    %317 = arith.cmpi slt, %307, %316 : vector<1x128xi32>
    %318 = arith.andi %315, %317 : vector<1x128xi1>
    %cst_157 = arith.constant 0.000000e+00 : f32
    %319 = vector.shape_cast %318 : vector<1x128xi1> to vector<1x128xi1>
    %320 = vector.broadcast %319 : vector<1x128xi1> to vector<4x128xi1>
    %321 = vector.broadcast %cst_157 : f32 to vector<4x128xf32>
    %322 = arith.select %320, %303, %321 : vector<4x128xi1>, vector<4x128xf32>
    %cst_158 = arith.constant dense<0.000000e+00> : vector<4x128xf32>
    %323 = tpu.matmul %300, %322, %cst_158 {dimension_numbers = #tpu.dot_dimension_numbers<[1], [0], [0], [1], [0, 0, 1, 1], [], []>} : vector<4x4xf32>, vector<4x128xf32>, vector<4x128xf32> -> vector<4x128xf32>
    %324 = arith.addf %298, %323 : vector<4x128xf32>
    %325 = vector.extract_strided_slice %4 {offsets = [0, 2, 0, 0], sizes = [1, 1, 4, 4], strides = [1, 1, 1, 1]} : vector<3x3x4x4xf32> to vector<1x1x4x4xf32>
    %326 = vector.shape_cast %325 : vector<1x1x4x4xf32> to vector<4x4xf32>
    %327 = vector.extract_strided_slice %273 {offsets = [0, 121], sizes = [4, 7], strides = [1, 1]} : vector<4x128xf32> to vector<4x7xf32>
    %328 = vector.extract_strided_slice %273 {offsets = [0, 0], sizes = [4, 121], strides = [1, 1]} : vector<4x128xf32> to vector<4x121xf32>
    %329 = tpu.concatenate %327, %328 in 1 : vector<4x7xf32>, vector<4x121xf32> -> vector<4x128xf32>
    %c-1_i32_159 = arith.constant -1 : i32
    %330 = vector.broadcast %c-1_i32_159 : i32 to vector<1x128xi32>
    %331 = arith.addi %28, %330 : vector<1x128xi32>
    %c1_i32 = arith.constant 1 : i32
    %332 = vector.broadcast %c1_i32 : i32 to vector<1x128xi32>
    %333 = arith.addi %29, %332 : vector<1x128xi32>
    %c0_i32_160 = arith.constant 0 : i32
    %334 = vector.broadcast %c0_i32_160 : i32 to vector<1x128xi32>
    %335 = arith.cmpi sge, %331, %334 : vector<1x128xi32>
    %c8_i32_161 = arith.constant 8 : i32
    %336 = vector.broadcast %c8_i32_161 : i32 to vector<1x128xi32>
    %337 = arith.cmpi slt, %331, %336 : vector<1x128xi32>
    %338 = arith.andi %335, %337 : vector<1x128xi1>
    %c0_i32_162 = arith.constant 0 : i32
    %339 = vector.broadcast %c0_i32_162 : i32 to vector<1x128xi32>
    %340 = arith.cmpi sge, %333, %339 : vector<1x128xi32>
    %341 = arith.andi %338, %340 : vector<1x128xi1>
    %c8_i32_163 = arith.constant 8 : i32
    %342 = vector.broadcast %c8_i32_163 : i32 to vector<1x128xi32>
    %343 = arith.cmpi slt, %333, %342 : vector<1x128xi32>
    %344 = arith.andi %341, %343 : vector<1x128xi1>
    %cst_164 = arith.constant 0.000000e+00 : f32
    %345 = vector.shape_cast %344 : vector<1x128xi1> to vector<1x128xi1>
    %346 = vector.broadcast %345 : vector<1x128xi1> to vector<4x128xi1>
    %347 = vector.broadcast %cst_164 : f32 to vector<4x128xf32>
    %348 = arith.select %346, %329, %347 : vector<4x128xi1>, vector<4x128xf32>
    %cst_165 = arith.constant dense<0.000000e+00> : vector<4x128xf32>
    %349 = tpu.matmul %326, %348, %cst_165 {dimension_numbers = #tpu.dot_dimension_numbers<[1], [0], [0], [1], [0, 0, 1, 1], [], []>} : vector<4x4xf32>, vector<4x128xf32>, vector<4x128xf32> -> vector<4x128xf32>
    %350 = arith.addf %324, %349 : vector<4x128xf32>
    %351 = vector.extract_strided_slice %4 {offsets = [1, 0, 0, 0], sizes = [1, 1, 4, 4], strides = [1, 1, 1, 1]} : vector<3x3x4x4xf32> to vector<1x1x4x4xf32>
    %352 = vector.shape_cast %351 : vector<1x1x4x4xf32> to vector<4x4xf32>
    %353 = vector.extract_strided_slice %273 {offsets = [0, 127], sizes = [4, 1], strides = [1, 1]} : vector<4x128xf32> to vector<4x1xf32>
    %354 = vector.extract_strided_slice %273 {offsets = [0, 0], sizes = [4, 127], strides = [1, 1]} : vector<4x128xf32> to vector<4x127xf32>
    %355 = tpu.concatenate %353, %354 in 1 : vector<4x1xf32>, vector<4x127xf32> -> vector<4x128xf32>
    %c0_i32_166 = arith.constant 0 : i32
    %356 = vector.broadcast %c0_i32_166 : i32 to vector<1x128xi32>
    %357 = arith.addi %28, %356 : vector<1x128xi32>
    %c-1_i32_167 = arith.constant -1 : i32
    %358 = vector.broadcast %c-1_i32_167 : i32 to vector<1x128xi32>
    %359 = arith.addi %29, %358 : vector<1x128xi32>
    %c0_i32_168 = arith.constant 0 : i32
    %360 = vector.broadcast %c0_i32_168 : i32 to vector<1x128xi32>
    %361 = arith.cmpi sge, %357, %360 : vector<1x128xi32>
    %c8_i32_169 = arith.constant 8 : i32
    %362 = vector.broadcast %c8_i32_169 : i32 to vector<1x128xi32>
    %363 = arith.cmpi slt, %357, %362 : vector<1x128xi32>
    %364 = arith.andi %361, %363 : vector<1x128xi1>
    %c0_i32_170 = arith.constant 0 : i32
    %365 = vector.broadcast %c0_i32_170 : i32 to vector<1x128xi32>
    %366 = arith.cmpi sge, %359, %365 : vector<1x128xi32>
    %367 = arith.andi %364, %366 : vector<1x128xi1>
    %c8_i32_171 = arith.constant 8 : i32
    %368 = vector.broadcast %c8_i32_171 : i32 to vector<1x128xi32>
    %369 = arith.cmpi slt, %359, %368 : vector<1x128xi32>
    %370 = arith.andi %367, %369 : vector<1x128xi1>
    %cst_172 = arith.constant 0.000000e+00 : f32
    %371 = vector.shape_cast %370 : vector<1x128xi1> to vector<1x128xi1>
    %372 = vector.broadcast %371 : vector<1x128xi1> to vector<4x128xi1>
    %373 = vector.broadcast %cst_172 : f32 to vector<4x128xf32>
    %374 = arith.select %372, %355, %373 : vector<4x128xi1>, vector<4x128xf32>
    %cst_173 = arith.constant dense<0.000000e+00> : vector<4x128xf32>
    %375 = tpu.matmul %352, %374, %cst_173 {dimension_numbers = #tpu.dot_dimension_numbers<[1], [0], [0], [1], [0, 0, 1, 1], [], []>} : vector<4x4xf32>, vector<4x128xf32>, vector<4x128xf32> -> vector<4x128xf32>
    %376 = arith.addf %350, %375 : vector<4x128xf32>
    %377 = vector.extract_strided_slice %4 {offsets = [1, 1, 0, 0], sizes = [1, 1, 4, 4], strides = [1, 1, 1, 1]} : vector<3x3x4x4xf32> to vector<1x1x4x4xf32>
    %378 = vector.shape_cast %377 : vector<1x1x4x4xf32> to vector<4x4xf32>
    %c0_i32_174 = arith.constant 0 : i32
    %379 = vector.broadcast %c0_i32_174 : i32 to vector<1x128xi32>
    %380 = arith.addi %28, %379 : vector<1x128xi32>
    %c0_i32_175 = arith.constant 0 : i32
    %381 = vector.broadcast %c0_i32_175 : i32 to vector<1x128xi32>
    %382 = arith.addi %29, %381 : vector<1x128xi32>
    %c0_i32_176 = arith.constant 0 : i32
    %383 = vector.broadcast %c0_i32_176 : i32 to vector<1x128xi32>
    %384 = arith.cmpi sge, %380, %383 : vector<1x128xi32>
    %c8_i32_177 = arith.constant 8 : i32
    %385 = vector.broadcast %c8_i32_177 : i32 to vector<1x128xi32>
    %386 = arith.cmpi slt, %380, %385 : vector<1x128xi32>
    %387 = arith.andi %384, %386 : vector<1x128xi1>
    %c0_i32_178 = arith.constant 0 : i32
    %388 = vector.broadcast %c0_i32_178 : i32 to vector<1x128xi32>
    %389 = arith.cmpi sge, %382, %388 : vector<1x128xi32>
    %390 = arith.andi %387, %389 : vector<1x128xi1>
    %c8_i32_179 = arith.constant 8 : i32
    %391 = vector.broadcast %c8_i32_179 : i32 to vector<1x128xi32>
    %392 = arith.cmpi slt, %382, %391 : vector<1x128xi32>
    %393 = arith.andi %390, %392 : vector<1x128xi1>
    %cst_180 = arith.constant 0.000000e+00 : f32
    %394 = vector.shape_cast %393 : vector<1x128xi1> to vector<1x128xi1>
    %395 = vector.broadcast %394 : vector<1x128xi1> to vector<4x128xi1>
    %396 = vector.broadcast %cst_180 : f32 to vector<4x128xf32>
    %397 = arith.select %395, %273, %396 : vector<4x128xi1>, vector<4x128xf32>
    %cst_181 = arith.constant dense<0.000000e+00> : vector<4x128xf32>
    %398 = tpu.matmul %378, %397, %cst_181 {dimension_numbers = #tpu.dot_dimension_numbers<[1], [0], [0], [1], [0, 0, 1, 1], [], []>} : vector<4x4xf32>, vector<4x128xf32>, vector<4x128xf32> -> vector<4x128xf32>
    %399 = arith.addf %376, %398 : vector<4x128xf32>
    %400 = vector.extract_strided_slice %4 {offsets = [1, 2, 0, 0], sizes = [1, 1, 4, 4], strides = [1, 1, 1, 1]} : vector<3x3x4x4xf32> to vector<1x1x4x4xf32>
    %401 = vector.shape_cast %400 : vector<1x1x4x4xf32> to vector<4x4xf32>
    %402 = vector.extract_strided_slice %273 {offsets = [0, 1], sizes = [4, 127], strides = [1, 1]} : vector<4x128xf32> to vector<4x127xf32>
    %403 = vector.extract_strided_slice %273 {offsets = [0, 0], sizes = [4, 1], strides = [1, 1]} : vector<4x128xf32> to vector<4x1xf32>
    %404 = tpu.concatenate %402, %403 in 1 : vector<4x127xf32>, vector<4x1xf32> -> vector<4x128xf32>
    %c0_i32_182 = arith.constant 0 : i32
    %405 = vector.broadcast %c0_i32_182 : i32 to vector<1x128xi32>
    %406 = arith.addi %28, %405 : vector<1x128xi32>
    %c1_i32_183 = arith.constant 1 : i32
    %407 = vector.broadcast %c1_i32_183 : i32 to vector<1x128xi32>
    %408 = arith.addi %29, %407 : vector<1x128xi32>
    %c0_i32_184 = arith.constant 0 : i32
    %409 = vector.broadcast %c0_i32_184 : i32 to vector<1x128xi32>
    %410 = arith.cmpi sge, %406, %409 : vector<1x128xi32>
    %c8_i32_185 = arith.constant 8 : i32
    %411 = vector.broadcast %c8_i32_185 : i32 to vector<1x128xi32>
    %412 = arith.cmpi slt, %406, %411 : vector<1x128xi32>
    %413 = arith.andi %410, %412 : vector<1x128xi1>
    %c0_i32_186 = arith.constant 0 : i32
    %414 = vector.broadcast %c0_i32_186 : i32 to vector<1x128xi32>
    %415 = arith.cmpi sge, %408, %414 : vector<1x128xi32>
    %416 = arith.andi %413, %415 : vector<1x128xi1>
    %c8_i32_187 = arith.constant 8 : i32
    %417 = vector.broadcast %c8_i32_187 : i32 to vector<1x128xi32>
    %418 = arith.cmpi slt, %408, %417 : vector<1x128xi32>
    %419 = arith.andi %416, %418 : vector<1x128xi1>
    %cst_188 = arith.constant 0.000000e+00 : f32
    %420 = vector.shape_cast %419 : vector<1x128xi1> to vector<1x128xi1>
    %421 = vector.broadcast %420 : vector<1x128xi1> to vector<4x128xi1>
    %422 = vector.broadcast %cst_188 : f32 to vector<4x128xf32>
    %423 = arith.select %421, %404, %422 : vector<4x128xi1>, vector<4x128xf32>
    %cst_189 = arith.constant dense<0.000000e+00> : vector<4x128xf32>
    %424 = tpu.matmul %401, %423, %cst_189 {dimension_numbers = #tpu.dot_dimension_numbers<[1], [0], [0], [1], [0, 0, 1, 1], [], []>} : vector<4x4xf32>, vector<4x128xf32>, vector<4x128xf32> -> vector<4x128xf32>
    %425 = arith.addf %399, %424 : vector<4x128xf32>
    %426 = vector.extract_strided_slice %4 {offsets = [2, 0, 0, 0], sizes = [1, 1, 4, 4], strides = [1, 1, 1, 1]} : vector<3x3x4x4xf32> to vector<1x1x4x4xf32>
    %427 = vector.shape_cast %426 : vector<1x1x4x4xf32> to vector<4x4xf32>
    %428 = vector.extract_strided_slice %273 {offsets = [0, 7], sizes = [4, 121], strides = [1, 1]} : vector<4x128xf32> to vector<4x121xf32>
    %429 = vector.extract_strided_slice %273 {offsets = [0, 0], sizes = [4, 7], strides = [1, 1]} : vector<4x128xf32> to vector<4x7xf32>
    %430 = tpu.concatenate %428, %429 in 1 : vector<4x121xf32>, vector<4x7xf32> -> vector<4x128xf32>
    %c1_i32_190 = arith.constant 1 : i32
    %431 = vector.broadcast %c1_i32_190 : i32 to vector<1x128xi32>
    %432 = arith.addi %28, %431 : vector<1x128xi32>
    %c-1_i32_191 = arith.constant -1 : i32
    %433 = vector.broadcast %c-1_i32_191 : i32 to vector<1x128xi32>
    %434 = arith.addi %29, %433 : vector<1x128xi32>
    %c0_i32_192 = arith.constant 0 : i32
    %435 = vector.broadcast %c0_i32_192 : i32 to vector<1x128xi32>
    %436 = arith.cmpi sge, %432, %435 : vector<1x128xi32>
    %c8_i32_193 = arith.constant 8 : i32
    %437 = vector.broadcast %c8_i32_193 : i32 to vector<1x128xi32>
    %438 = arith.cmpi slt, %432, %437 : vector<1x128xi32>
    %439 = arith.andi %436, %438 : vector<1x128xi1>
    %c0_i32_194 = arith.constant 0 : i32
    %440 = vector.broadcast %c0_i32_194 : i32 to vector<1x128xi32>
    %441 = arith.cmpi sge, %434, %440 : vector<1x128xi32>
    %442 = arith.andi %439, %441 : vector<1x128xi1>
    %c8_i32_195 = arith.constant 8 : i32
    %443 = vector.broadcast %c8_i32_195 : i32 to vector<1x128xi32>
    %444 = arith.cmpi slt, %434, %443 : vector<1x128xi32>
    %445 = arith.andi %442, %444 : vector<1x128xi1>
    %cst_196 = arith.constant 0.000000e+00 : f32
    %446 = vector.shape_cast %445 : vector<1x128xi1> to vector<1x128xi1>
    %447 = vector.broadcast %446 : vector<1x128xi1> to vector<4x128xi1>
    %448 = vector.broadcast %cst_196 : f32 to vector<4x128xf32>
    %449 = arith.select %447, %430, %448 : vector<4x128xi1>, vector<4x128xf32>
    %cst_197 = arith.constant dense<0.000000e+00> : vector<4x128xf32>
    %450 = tpu.matmul %427, %449, %cst_197 {dimension_numbers = #tpu.dot_dimension_numbers<[1], [0], [0], [1], [0, 0, 1, 1], [], []>} : vector<4x4xf32>, vector<4x128xf32>, vector<4x128xf32> -> vector<4x128xf32>
    %451 = arith.addf %425, %450 : vector<4x128xf32>
    %452 = vector.extract_strided_slice %4 {offsets = [2, 1, 0, 0], sizes = [1, 1, 4, 4], strides = [1, 1, 1, 1]} : vector<3x3x4x4xf32> to vector<1x1x4x4xf32>
    %453 = vector.shape_cast %452 : vector<1x1x4x4xf32> to vector<4x4xf32>
    %454 = vector.extract_strided_slice %273 {offsets = [0, 8], sizes = [4, 120], strides = [1, 1]} : vector<4x128xf32> to vector<4x120xf32>
    %455 = vector.extract_strided_slice %273 {offsets = [0, 0], sizes = [4, 8], strides = [1, 1]} : vector<4x128xf32> to vector<4x8xf32>
    %456 = tpu.concatenate %454, %455 in 1 : vector<4x120xf32>, vector<4x8xf32> -> vector<4x128xf32>
    %c1_i32_198 = arith.constant 1 : i32
    %457 = vector.broadcast %c1_i32_198 : i32 to vector<1x128xi32>
    %458 = arith.addi %28, %457 : vector<1x128xi32>
    %c0_i32_199 = arith.constant 0 : i32
    %459 = vector.broadcast %c0_i32_199 : i32 to vector<1x128xi32>
    %460 = arith.addi %29, %459 : vector<1x128xi32>
    %c0_i32_200 = arith.constant 0 : i32
    %461 = vector.broadcast %c0_i32_200 : i32 to vector<1x128xi32>
    %462 = arith.cmpi sge, %458, %461 : vector<1x128xi32>
    %c8_i32_201 = arith.constant 8 : i32
    %463 = vector.broadcast %c8_i32_201 : i32 to vector<1x128xi32>
    %464 = arith.cmpi slt, %458, %463 : vector<1x128xi32>
    %465 = arith.andi %462, %464 : vector<1x128xi1>
    %c0_i32_202 = arith.constant 0 : i32
    %466 = vector.broadcast %c0_i32_202 : i32 to vector<1x128xi32>
    %467 = arith.cmpi sge, %460, %466 : vector<1x128xi32>
    %468 = arith.andi %465, %467 : vector<1x128xi1>
    %c8_i32_203 = arith.constant 8 : i32
    %469 = vector.broadcast %c8_i32_203 : i32 to vector<1x128xi32>
    %470 = arith.cmpi slt, %460, %469 : vector<1x128xi32>
    %471 = arith.andi %468, %470 : vector<1x128xi1>
    %cst_204 = arith.constant 0.000000e+00 : f32
    %472 = vector.shape_cast %471 : vector<1x128xi1> to vector<1x128xi1>
    %473 = vector.broadcast %472 : vector<1x128xi1> to vector<4x128xi1>
    %474 = vector.broadcast %cst_204 : f32 to vector<4x128xf32>
    %475 = arith.select %473, %456, %474 : vector<4x128xi1>, vector<4x128xf32>
    %cst_205 = arith.constant dense<0.000000e+00> : vector<4x128xf32>
    %476 = tpu.matmul %453, %475, %cst_205 {dimension_numbers = #tpu.dot_dimension_numbers<[1], [0], [0], [1], [0, 0, 1, 1], [], []>} : vector<4x4xf32>, vector<4x128xf32>, vector<4x128xf32> -> vector<4x128xf32>
    %477 = arith.addf %451, %476 : vector<4x128xf32>
    %478 = vector.extract_strided_slice %4 {offsets = [2, 2, 0, 0], sizes = [1, 1, 4, 4], strides = [1, 1, 1, 1]} : vector<3x3x4x4xf32> to vector<1x1x4x4xf32>
    %479 = vector.shape_cast %478 : vector<1x1x4x4xf32> to vector<4x4xf32>
    %480 = vector.extract_strided_slice %273 {offsets = [0, 9], sizes = [4, 119], strides = [1, 1]} : vector<4x128xf32> to vector<4x119xf32>
    %481 = vector.extract_strided_slice %273 {offsets = [0, 0], sizes = [4, 9], strides = [1, 1]} : vector<4x128xf32> to vector<4x9xf32>
    %482 = tpu.concatenate %480, %481 in 1 : vector<4x119xf32>, vector<4x9xf32> -> vector<4x128xf32>
    %c1_i32_206 = arith.constant 1 : i32
    %483 = vector.broadcast %c1_i32_206 : i32 to vector<1x128xi32>
    %484 = arith.addi %28, %483 : vector<1x128xi32>
    %c1_i32_207 = arith.constant 1 : i32
    %485 = vector.broadcast %c1_i32_207 : i32 to vector<1x128xi32>
    %486 = arith.addi %29, %485 : vector<1x128xi32>
    %c0_i32_208 = arith.constant 0 : i32
    %487 = vector.broadcast %c0_i32_208 : i32 to vector<1x128xi32>
    %488 = arith.cmpi sge, %484, %487 : vector<1x128xi32>
    %c8_i32_209 = arith.constant 8 : i32
    %489 = vector.broadcast %c8_i32_209 : i32 to vector<1x128xi32>
    %490 = arith.cmpi slt, %484, %489 : vector<1x128xi32>
    %491 = arith.andi %488, %490 : vector<1x128xi1>
    %c0_i32_210 = arith.constant 0 : i32
    %492 = vector.broadcast %c0_i32_210 : i32 to vector<1x128xi32>
    %493 = arith.cmpi sge, %486, %492 : vector<1x128xi32>
    %494 = arith.andi %491, %493 : vector<1x128xi1>
    %c8_i32_211 = arith.constant 8 : i32
    %495 = vector.broadcast %c8_i32_211 : i32 to vector<1x128xi32>
    %496 = arith.cmpi slt, %486, %495 : vector<1x128xi32>
    %497 = arith.andi %494, %496 : vector<1x128xi1>
    %cst_212 = arith.constant 0.000000e+00 : f32
    %498 = vector.shape_cast %497 : vector<1x128xi1> to vector<1x128xi1>
    %499 = vector.broadcast %498 : vector<1x128xi1> to vector<4x128xi1>
    %500 = vector.broadcast %cst_212 : f32 to vector<4x128xf32>
    %501 = arith.select %499, %482, %500 : vector<4x128xi1>, vector<4x128xf32>
    %cst_213 = arith.constant dense<0.000000e+00> : vector<4x128xf32>
    %502 = tpu.matmul %479, %501, %cst_213 {dimension_numbers = #tpu.dot_dimension_numbers<[1], [0], [0], [1], [0, 0, 1, 1], [], []>} : vector<4x4xf32>, vector<4x128xf32>, vector<4x128xf32> -> vector<4x128xf32>
    %503 = arith.addf %477, %502 : vector<4x128xf32>
    %504 = vector.broadcast %1 : vector<4x1xf32> to vector<4x128xf32>
    %505 = arith.addf %503, %504 : vector<4x128xf32>
    %cst_214 = arith.constant 0.000000e+00 : f32
    %506 = vector.broadcast %cst_214 : f32 to vector<4x128xf32>
    %507 = arith.maximumf %505, %506 : vector<4x128xf32>
    %cst_215 = arith.constant dense<0.000000e+00> : vector<32x128xf32>
    %508 = tpu.matmul %5, %507, %cst_215 {dimension_numbers = #tpu.dot_dimension_numbers<[1], [0], [0], [1], [0, 0, 1, 1], [], []>} : vector<32x4xf32>, vector<4x128xf32>, vector<32x128xf32> -> vector<32x128xf32>
    %509 = vector.extract_strided_slice %27 {offsets = [0, 0, 0], sizes = [1, 16, 128], strides = [1, 1, 1]} : vector<4x16x128xf32> to vector<1x16x128xf32>
    %510 = vector.shape_cast %509 : vector<1x16x128xf32> to vector<16x128xf32>
    %511 = vector.shape_cast %30 : vector<1x128xi32> to vector<1x128xi32>
    %512 = vector.broadcast %511 : vector<1x128xi32> to vector<16x128xi32>
    %513 = vector.extract_strided_slice %27 {offsets = [1, 0, 0], sizes = [1, 16, 128], strides = [1, 1, 1]} : vector<4x16x128xf32> to vector<1x16x128xf32>
    %514 = vector.shape_cast %513 : vector<1x16x128xf32> to vector<16x128xf32>
    %515 = arith.cmpf ogt, %514, %510 : vector<16x128xf32>
    %516 = arith.select %515, %514, %510 : vector<16x128xi1>, vector<16x128xf32>
    %c1_i32_216 = arith.constant 1 : i32
    %517 = vector.broadcast %c1_i32_216 : i32 to vector<1x128xi32>
    %518 = arith.addi %30, %517 : vector<1x128xi32>
    %519 = vector.shape_cast %518 : vector<1x128xi32> to vector<1x128xi32>
    %520 = vector.broadcast %519 : vector<1x128xi32> to vector<16x128xi32>
    %521 = arith.select %515, %520, %512 : vector<16x128xi1>, vector<16x128xi32>
    %522 = vector.extract_strided_slice %27 {offsets = [2, 0, 0], sizes = [1, 16, 128], strides = [1, 1, 1]} : vector<4x16x128xf32> to vector<1x16x128xf32>
    %523 = vector.shape_cast %522 : vector<1x16x128xf32> to vector<16x128xf32>
    %524 = arith.cmpf ogt, %523, %516 : vector<16x128xf32>
    %525 = arith.select %524, %523, %516 : vector<16x128xi1>, vector<16x128xf32>
    %c16_i32 = arith.constant 16 : i32
    %526 = vector.broadcast %c16_i32 : i32 to vector<1x128xi32>
    %527 = arith.addi %30, %526 : vector<1x128xi32>
    %528 = vector.shape_cast %527 : vector<1x128xi32> to vector<1x128xi32>
    %529 = vector.broadcast %528 : vector<1x128xi32> to vector<16x128xi32>
    %530 = arith.select %524, %529, %521 : vector<16x128xi1>, vector<16x128xi32>
    %531 = vector.extract_strided_slice %27 {offsets = [3, 0, 0], sizes = [1, 16, 128], strides = [1, 1, 1]} : vector<4x16x128xf32> to vector<1x16x128xf32>
    %532 = vector.shape_cast %531 : vector<1x16x128xf32> to vector<16x128xf32>
    %533 = arith.cmpf ogt, %532, %525 : vector<16x128xf32>
    %534 = arith.select %533, %532, %525 : vector<16x128xi1>, vector<16x128xf32>
    %c17_i32 = arith.constant 17 : i32
    %535 = vector.broadcast %c17_i32 : i32 to vector<1x128xi32>
    %536 = arith.addi %30, %535 : vector<1x128xi32>
    %537 = vector.shape_cast %536 : vector<1x128xi32> to vector<1x128xi32>
    %538 = vector.broadcast %537 : vector<1x128xi32> to vector<16x128xi32>
    %539 = arith.select %533, %538, %530 : vector<16x128xi1>, vector<16x128xi32>
    %c0_217 = arith.constant 0 : index
    %c0_218 = arith.constant 0 : index
    %540 = vector.load %arg32[%c0_217, %c0_218] : memref<16x128xi32, #tpu.memory_space<vmem>>, vector<16x128xi32>
    tpu.vector_store %arg32[%c0_217, %c0_218], %539 {strides = array<i32>} : memref<16x128xi32, #tpu.memory_space<vmem>>, vector<16x128xi32>,
    %cst_219 = arith.constant dense<0.000000e+00> : vector<32x128xf32>
    %541 = tpu.matmul %6, %534, %cst_219 {dimension_numbers = #tpu.dot_dimension_numbers<[1], [0], [0], [1], [0, 0, 1, 1], [], []>} : vector<32x16xf32>, vector<16x128xf32>, vector<32x128xf32> -> vector<32x128xf32>
    %542 = vector.broadcast %2 : vector<32x1xf32> to vector<32x128xf32>
    %543 = arith.addf %541, %542 : vector<32x128xf32>
    %cst_220 = arith.constant 0.000000e+00 : f32
    %544 = vector.broadcast %cst_220 : f32 to vector<32x128xf32>
    %545 = arith.maximumf %543, %544 : vector<32x128xf32>
    %546 = arith.addf %545, %508 : vector<32x128xf32>
    %cst_221 = arith.constant 0.000000e+00 : f32
    %547 = vector.broadcast %cst_221 : f32 to vector<32x128xf32>
    %548 = arith.cmpf oge, %546, %547 : vector<32x128xf32>
    %cst_222 = arith.constant 2.500000e-01 : f32
    %549 = vector.broadcast %cst_222 : f32 to vector<32x128xf32>
    %550 = arith.mulf %549, %546 : vector<32x128xf32>
    %551 = arith.select %548, %546, %550 : vector<32x128xi1>, vector<32x128xf32>
    %cst_223 = arith.constant dense<0.000000e+00> : vector<8x128xf32>
    %552 = tpu.matmul %9, %551, %cst_223 {dimension_numbers = #tpu.dot_dimension_numbers<[1], [0], [0], [1], [0, 0, 1, 1], [], []>} : vector<8x32xf32>, vector<32x128xf32>, vector<8x128xf32> -> vector<8x128xf32>
    %553 = vector.broadcast %7 : vector<8x1xf32> to vector<8x128xf32>
    %554 = arith.addf %552, %553 : vector<8x128xf32>
    %cst_224 = arith.constant 0.000000e+00 : f32
    %555 = vector.broadcast %cst_224 : f32 to vector<8x128xf32>
    %556 = arith.maximumf %554, %555 : vector<8x128xf32>
    %557 = vector.extract_strided_slice %10 {offsets = [0, 0, 0, 0], sizes = [1, 1, 8, 8], strides = [1, 1, 1, 1]} : vector<3x3x8x8xf32> to vector<1x1x8x8xf32>
    %558 = vector.shape_cast %557 : vector<1x1x8x8xf32> to vector<8x8xf32>
    %559 = vector.extract_strided_slice %556 {offsets = [0, 119], sizes = [8, 9], strides = [1, 1]} : vector<8x128xf32> to vector<8x9xf32>
    %560 = vector.extract_strided_slice %556 {offsets = [0, 0], sizes = [8, 119], strides = [1, 1]} : vector<8x128xf32> to vector<8x119xf32>
    %561 = tpu.concatenate %559, %560 in 1 : vector<8x9xf32>, vector<8x119xf32> -> vector<8x128xf32>
    %c-1_i32_225 = arith.constant -1 : i32
    %562 = vector.broadcast %c-1_i32_225 : i32 to vector<1x128xi32>
    %563 = arith.addi %28, %562 : vector<1x128xi32>
    %c-1_i32_226 = arith.constant -1 : i32
    %564 = vector.broadcast %c-1_i32_226 : i32 to vector<1x128xi32>
    %565 = arith.addi %29, %564 : vector<1x128xi32>
    %c0_i32_227 = arith.constant 0 : i32
    %566 = vector.broadcast %c0_i32_227 : i32 to vector<1x128xi32>
    %567 = arith.cmpi sge, %563, %566 : vector<1x128xi32>
    %c8_i32_228 = arith.constant 8 : i32
    %568 = vector.broadcast %c8_i32_228 : i32 to vector<1x128xi32>
    %569 = arith.cmpi slt, %563, %568 : vector<1x128xi32>
    %570 = arith.andi %567, %569 : vector<1x128xi1>
    %c0_i32_229 = arith.constant 0 : i32
    %571 = vector.broadcast %c0_i32_229 : i32 to vector<1x128xi32>
    %572 = arith.cmpi sge, %565, %571 : vector<1x128xi32>
    %573 = arith.andi %570, %572 : vector<1x128xi1>
    %c8_i32_230 = arith.constant 8 : i32
    %574 = vector.broadcast %c8_i32_230 : i32 to vector<1x128xi32>
    %575 = arith.cmpi slt, %565, %574 : vector<1x128xi32>
    %576 = arith.andi %573, %575 : vector<1x128xi1>
    %cst_231 = arith.constant 0.000000e+00 : f32
    %577 = vector.shape_cast %576 : vector<1x128xi1> to vector<1x128xi1>
    %578 = vector.broadcast %577 : vector<1x128xi1> to vector<8x128xi1>
    %579 = vector.broadcast %cst_231 : f32 to vector<8x128xf32>
    %580 = arith.select %578, %561, %579 : vector<8x128xi1>, vector<8x128xf32>
    %cst_232 = arith.constant dense<0.000000e+00> : vector<8x128xf32>
    %581 = tpu.matmul %558, %580, %cst_232 {dimension_numbers = #tpu.dot_dimension_numbers<[1], [0], [0], [1], [0, 0, 1, 1], [], []>} : vector<8x8xf32>, vector<8x128xf32>, vector<8x128xf32> -> vector<8x128xf32>
    %582 = vector.extract_strided_slice %10 {offsets = [0, 1, 0, 0], sizes = [1, 1, 8, 8], strides = [1, 1, 1, 1]} : vector<3x3x8x8xf32> to vector<1x1x8x8xf32>
    %583 = vector.shape_cast %582 : vector<1x1x8x8xf32> to vector<8x8xf32>
    %584 = vector.extract_strided_slice %556 {offsets = [0, 120], sizes = [8, 8], strides = [1, 1]} : vector<8x128xf32> to vector<8x8xf32>
    %585 = vector.extract_strided_slice %556 {offsets = [0, 0], sizes = [8, 120], strides = [1, 1]} : vector<8x128xf32> to vector<8x120xf32>
    %586 = tpu.concatenate %584, %585 in 1 : vector<8x8xf32>, vector<8x120xf32> -> vector<8x128xf32>
    %c-1_i32_233 = arith.constant -1 : i32
    %587 = vector.broadcast %c-1_i32_233 : i32 to vector<1x128xi32>
    %588 = arith.addi %28, %587 : vector<1x128xi32>
    %c0_i32_234 = arith.constant 0 : i32
    %589 = vector.broadcast %c0_i32_234 : i32 to vector<1x128xi32>
    %590 = arith.addi %29, %589 : vector<1x128xi32>
    %c0_i32_235 = arith.constant 0 : i32
    %591 = vector.broadcast %c0_i32_235 : i32 to vector<1x128xi32>
    %592 = arith.cmpi sge, %588, %591 : vector<1x128xi32>
    %c8_i32_236 = arith.constant 8 : i32
    %593 = vector.broadcast %c8_i32_236 : i32 to vector<1x128xi32>
    %594 = arith.cmpi slt, %588, %593 : vector<1x128xi32>
    %595 = arith.andi %592, %594 : vector<1x128xi1>
    %c0_i32_237 = arith.constant 0 : i32
    %596 = vector.broadcast %c0_i32_237 : i32 to vector<1x128xi32>
    %597 = arith.cmpi sge, %590, %596 : vector<1x128xi32>
    %598 = arith.andi %595, %597 : vector<1x128xi1>
    %c8_i32_238 = arith.constant 8 : i32
    %599 = vector.broadcast %c8_i32_238 : i32 to vector<1x128xi32>
    %600 = arith.cmpi slt, %590, %599 : vector<1x128xi32>
    %601 = arith.andi %598, %600 : vector<1x128xi1>
    %cst_239 = arith.constant 0.000000e+00 : f32
    %602 = vector.shape_cast %601 : vector<1x128xi1> to vector<1x128xi1>
    %603 = vector.broadcast %602 : vector<1x128xi1> to vector<8x128xi1>
    %604 = vector.broadcast %cst_239 : f32 to vector<8x128xf32>
    %605 = arith.select %603, %586, %604 : vector<8x128xi1>, vector<8x128xf32>
    %cst_240 = arith.constant dense<0.000000e+00> : vector<8x128xf32>
    %606 = tpu.matmul %583, %605, %cst_240 {dimension_numbers = #tpu.dot_dimension_numbers<[1], [0], [0], [1], [0, 0, 1, 1], [], []>} : vector<8x8xf32>, vector<8x128xf32>, vector<8x128xf32> -> vector<8x128xf32>
    %607 = arith.addf %581, %606 : vector<8x128xf32>
    %608 = vector.extract_strided_slice %10 {offsets = [0, 2, 0, 0], sizes = [1, 1, 8, 8], strides = [1, 1, 1, 1]} : vector<3x3x8x8xf32> to vector<1x1x8x8xf32>
    %609 = vector.shape_cast %608 : vector<1x1x8x8xf32> to vector<8x8xf32>
    %610 = vector.extract_strided_slice %556 {offsets = [0, 121], sizes = [8, 7], strides = [1, 1]} : vector<8x128xf32> to vector<8x7xf32>
    %611 = vector.extract_strided_slice %556 {offsets = [0, 0], sizes = [8, 121], strides = [1, 1]} : vector<8x128xf32> to vector<8x121xf32>
    %612 = tpu.concatenate %610, %611 in 1 : vector<8x7xf32>, vector<8x121xf32> -> vector<8x128xf32>
    %c-1_i32_241 = arith.constant -1 : i32
    %613 = vector.broadcast %c-1_i32_241 : i32 to vector<1x128xi32>
    %614 = arith.addi %28, %613 : vector<1x128xi32>
    %c1_i32_242 = arith.constant 1 : i32
    %615 = vector.broadcast %c1_i32_242 : i32 to vector<1x128xi32>
    %616 = arith.addi %29, %615 : vector<1x128xi32>
    %c0_i32_243 = arith.constant 0 : i32
    %617 = vector.broadcast %c0_i32_243 : i32 to vector<1x128xi32>
    %618 = arith.cmpi sge, %614, %617 : vector<1x128xi32>
    %c8_i32_244 = arith.constant 8 : i32
    %619 = vector.broadcast %c8_i32_244 : i32 to vector<1x128xi32>
    %620 = arith.cmpi slt, %614, %619 : vector<1x128xi32>
    %621 = arith.andi %618, %620 : vector<1x128xi1>
    %c0_i32_245 = arith.constant 0 : i32
    %622 = vector.broadcast %c0_i32_245 : i32 to vector<1x128xi32>
    %623 = arith.cmpi sge, %616, %622 : vector<1x128xi32>
    %624 = arith.andi %621, %623 : vector<1x128xi1>
    %c8_i32_246 = arith.constant 8 : i32
    %625 = vector.broadcast %c8_i32_246 : i32 to vector<1x128xi32>
    %626 = arith.cmpi slt, %616, %625 : vector<1x128xi32>
    %627 = arith.andi %624, %626 : vector<1x128xi1>
    %cst_247 = arith.constant 0.000000e+00 : f32
    %628 = vector.shape_cast %627 : vector<1x128xi1> to vector<1x128xi1>
    %629 = vector.broadcast %628 : vector<1x128xi1> to vector<8x128xi1>
    %630 = vector.broadcast %cst_247 : f32 to vector<8x128xf32>
    %631 = arith.select %629, %612, %630 : vector<8x128xi1>, vector<8x128xf32>
    %cst_248 = arith.constant dense<0.000000e+00> : vector<8x128xf32>
    %632 = tpu.matmul %609, %631, %cst_248 {dimension_numbers = #tpu.dot_dimension_numbers<[1], [0], [0], [1], [0, 0, 1, 1], [], []>} : vector<8x8xf32>, vector<8x128xf32>, vector<8x128xf32> -> vector<8x128xf32>
    %633 = arith.addf %607, %632 : vector<8x128xf32>
    %634 = vector.extract_strided_slice %10 {offsets = [1, 0, 0, 0], sizes = [1, 1, 8, 8], strides = [1, 1, 1, 1]} : vector<3x3x8x8xf32> to vector<1x1x8x8xf32>
    %635 = vector.shape_cast %634 : vector<1x1x8x8xf32> to vector<8x8xf32>
    %636 = vector.extract_strided_slice %556 {offsets = [0, 127], sizes = [8, 1], strides = [1, 1]} : vector<8x128xf32> to vector<8x1xf32>
    %637 = vector.extract_strided_slice %556 {offsets = [0, 0], sizes = [8, 127], strides = [1, 1]} : vector<8x128xf32> to vector<8x127xf32>
    %638 = tpu.concatenate %636, %637 in 1 : vector<8x1xf32>, vector<8x127xf32> -> vector<8x128xf32>
    %c0_i32_249 = arith.constant 0 : i32
    %639 = vector.broadcast %c0_i32_249 : i32 to vector<1x128xi32>
    %640 = arith.addi %28, %639 : vector<1x128xi32>
    %c-1_i32_250 = arith.constant -1 : i32
    %641 = vector.broadcast %c-1_i32_250 : i32 to vector<1x128xi32>
    %642 = arith.addi %29, %641 : vector<1x128xi32>
    %c0_i32_251 = arith.constant 0 : i32
    %643 = vector.broadcast %c0_i32_251 : i32 to vector<1x128xi32>
    %644 = arith.cmpi sge, %640, %643 : vector<1x128xi32>
    %c8_i32_252 = arith.constant 8 : i32
    %645 = vector.broadcast %c8_i32_252 : i32 to vector<1x128xi32>
    %646 = arith.cmpi slt, %640, %645 : vector<1x128xi32>
    %647 = arith.andi %644, %646 : vector<1x128xi1>
    %c0_i32_253 = arith.constant 0 : i32
    %648 = vector.broadcast %c0_i32_253 : i32 to vector<1x128xi32>
    %649 = arith.cmpi sge, %642, %648 : vector<1x128xi32>
    %650 = arith.andi %647, %649 : vector<1x128xi1>
    %c8_i32_254 = arith.constant 8 : i32
    %651 = vector.broadcast %c8_i32_254 : i32 to vector<1x128xi32>
    %652 = arith.cmpi slt, %642, %651 : vector<1x128xi32>
    %653 = arith.andi %650, %652 : vector<1x128xi1>
    %cst_255 = arith.constant 0.000000e+00 : f32
    %654 = vector.shape_cast %653 : vector<1x128xi1> to vector<1x128xi1>
    %655 = vector.broadcast %654 : vector<1x128xi1> to vector<8x128xi1>
    %656 = vector.broadcast %cst_255 : f32 to vector<8x128xf32>
    %657 = arith.select %655, %638, %656 : vector<8x128xi1>, vector<8x128xf32>
    %cst_256 = arith.constant dense<0.000000e+00> : vector<8x128xf32>
    %658 = tpu.matmul %635, %657, %cst_256 {dimension_numbers = #tpu.dot_dimension_numbers<[1], [0], [0], [1], [0, 0, 1, 1], [], []>} : vector<8x8xf32>, vector<8x128xf32>, vector<8x128xf32> -> vector<8x128xf32>
    %659 = arith.addf %633, %658 : vector<8x128xf32>
    %660 = vector.extract_strided_slice %10 {offsets = [1, 1, 0, 0], sizes = [1, 1, 8, 8], strides = [1, 1, 1, 1]} : vector<3x3x8x8xf32> to vector<1x1x8x8xf32>
    %661 = vector.shape_cast %660 : vector<1x1x8x8xf32> to vector<8x8xf32>
    %c0_i32_257 = arith.constant 0 : i32
    %662 = vector.broadcast %c0_i32_257 : i32 to vector<1x128xi32>
    %663 = arith.addi %28, %662 : vector<1x128xi32>
    %c0_i32_258 = arith.constant 0 : i32
    %664 = vector.broadcast %c0_i32_258 : i32 to vector<1x128xi32>
    %665 = arith.addi %29, %664 : vector<1x128xi32>
    %c0_i32_259 = arith.constant 0 : i32
    %666 = vector.broadcast %c0_i32_259 : i32 to vector<1x128xi32>
    %667 = arith.cmpi sge, %663, %666 : vector<1x128xi32>
    %c8_i32_260 = arith.constant 8 : i32
    %668 = vector.broadcast %c8_i32_260 : i32 to vector<1x128xi32>
    %669 = arith.cmpi slt, %663, %668 : vector<1x128xi32>
    %670 = arith.andi %667, %669 : vector<1x128xi1>
    %c0_i32_261 = arith.constant 0 : i32
    %671 = vector.broadcast %c0_i32_261 : i32 to vector<1x128xi32>
    %672 = arith.cmpi sge, %665, %671 : vector<1x128xi32>
    %673 = arith.andi %670, %672 : vector<1x128xi1>
    %c8_i32_262 = arith.constant 8 : i32
    %674 = vector.broadcast %c8_i32_262 : i32 to vector<1x128xi32>
    %675 = arith.cmpi slt, %665, %674 : vector<1x128xi32>
    %676 = arith.andi %673, %675 : vector<1x128xi1>
    %cst_263 = arith.constant 0.000000e+00 : f32
    %677 = vector.shape_cast %676 : vector<1x128xi1> to vector<1x128xi1>
    %678 = vector.broadcast %677 : vector<1x128xi1> to vector<8x128xi1>
    %679 = vector.broadcast %cst_263 : f32 to vector<8x128xf32>
    %680 = arith.select %678, %556, %679 : vector<8x128xi1>, vector<8x128xf32>
    %cst_264 = arith.constant dense<0.000000e+00> : vector<8x128xf32>
    %681 = tpu.matmul %661, %680, %cst_264 {dimension_numbers = #tpu.dot_dimension_numbers<[1], [0], [0], [1], [0, 0, 1, 1], [], []>} : vector<8x8xf32>, vector<8x128xf32>, vector<8x128xf32> -> vector<8x128xf32>
    %682 = arith.addf %659, %681 : vector<8x128xf32>
    %683 = vector.extract_strided_slice %10 {offsets = [1, 2, 0, 0], sizes = [1, 1, 8, 8], strides = [1, 1, 1, 1]} : vector<3x3x8x8xf32> to vector<1x1x8x8xf32>
    %684 = vector.shape_cast %683 : vector<1x1x8x8xf32> to vector<8x8xf32>
    %685 = vector.extract_strided_slice %556 {offsets = [0, 1], sizes = [8, 127], strides = [1, 1]} : vector<8x128xf32> to vector<8x127xf32>
    %686 = vector.extract_strided_slice %556 {offsets = [0, 0], sizes = [8, 1], strides = [1, 1]} : vector<8x128xf32> to vector<8x1xf32>
    %687 = tpu.concatenate %685, %686 in 1 : vector<8x127xf32>, vector<8x1xf32> -> vector<8x128xf32>
    %c0_i32_265 = arith.constant 0 : i32
    %688 = vector.broadcast %c0_i32_265 : i32 to vector<1x128xi32>
    %689 = arith.addi %28, %688 : vector<1x128xi32>
    %c1_i32_266 = arith.constant 1 : i32
    %690 = vector.broadcast %c1_i32_266 : i32 to vector<1x128xi32>
    %691 = arith.addi %29, %690 : vector<1x128xi32>
    %c0_i32_267 = arith.constant 0 : i32
    %692 = vector.broadcast %c0_i32_267 : i32 to vector<1x128xi32>
    %693 = arith.cmpi sge, %689, %692 : vector<1x128xi32>
    %c8_i32_268 = arith.constant 8 : i32
    %694 = vector.broadcast %c8_i32_268 : i32 to vector<1x128xi32>
    %695 = arith.cmpi slt, %689, %694 : vector<1x128xi32>
    %696 = arith.andi %693, %695 : vector<1x128xi1>
    %c0_i32_269 = arith.constant 0 : i32
    %697 = vector.broadcast %c0_i32_269 : i32 to vector<1x128xi32>
    %698 = arith.cmpi sge, %691, %697 : vector<1x128xi32>
    %699 = arith.andi %696, %698 : vector<1x128xi1>
    %c8_i32_270 = arith.constant 8 : i32
    %700 = vector.broadcast %c8_i32_270 : i32 to vector<1x128xi32>
    %701 = arith.cmpi slt, %691, %700 : vector<1x128xi32>
    %702 = arith.andi %699, %701 : vector<1x128xi1>
    %cst_271 = arith.constant 0.000000e+00 : f32
    %703 = vector.shape_cast %702 : vector<1x128xi1> to vector<1x128xi1>
    %704 = vector.broadcast %703 : vector<1x128xi1> to vector<8x128xi1>
    %705 = vector.broadcast %cst_271 : f32 to vector<8x128xf32>
    %706 = arith.select %704, %687, %705 : vector<8x128xi1>, vector<8x128xf32>
    %cst_272 = arith.constant dense<0.000000e+00> : vector<8x128xf32>
    %707 = tpu.matmul %684, %706, %cst_272 {dimension_numbers = #tpu.dot_dimension_numbers<[1], [0], [0], [1], [0, 0, 1, 1], [], []>} : vector<8x8xf32>, vector<8x128xf32>, vector<8x128xf32> -> vector<8x128xf32>
    %708 = arith.addf %682, %707 : vector<8x128xf32>
    %709 = vector.extract_strided_slice %10 {offsets = [2, 0, 0, 0], sizes = [1, 1, 8, 8], strides = [1, 1, 1, 1]} : vector<3x3x8x8xf32> to vector<1x1x8x8xf32>
    %710 = vector.shape_cast %709 : vector<1x1x8x8xf32> to vector<8x8xf32>
    %711 = vector.extract_strided_slice %556 {offsets = [0, 7], sizes = [8, 121], strides = [1, 1]} : vector<8x128xf32> to vector<8x121xf32>
    %712 = vector.extract_strided_slice %556 {offsets = [0, 0], sizes = [8, 7], strides = [1, 1]} : vector<8x128xf32> to vector<8x7xf32>
    %713 = tpu.concatenate %711, %712 in 1 : vector<8x121xf32>, vector<8x7xf32> -> vector<8x128xf32>
    %c1_i32_273 = arith.constant 1 : i32
    %714 = vector.broadcast %c1_i32_273 : i32 to vector<1x128xi32>
    %715 = arith.addi %28, %714 : vector<1x128xi32>
    %c-1_i32_274 = arith.constant -1 : i32
    %716 = vector.broadcast %c-1_i32_274 : i32 to vector<1x128xi32>
    %717 = arith.addi %29, %716 : vector<1x128xi32>
    %c0_i32_275 = arith.constant 0 : i32
    %718 = vector.broadcast %c0_i32_275 : i32 to vector<1x128xi32>
    %719 = arith.cmpi sge, %715, %718 : vector<1x128xi32>
    %c8_i32_276 = arith.constant 8 : i32
    %720 = vector.broadcast %c8_i32_276 : i32 to vector<1x128xi32>
    %721 = arith.cmpi slt, %715, %720 : vector<1x128xi32>
    %722 = arith.andi %719, %721 : vector<1x128xi1>
    %c0_i32_277 = arith.constant 0 : i32
    %723 = vector.broadcast %c0_i32_277 : i32 to vector<1x128xi32>
    %724 = arith.cmpi sge, %717, %723 : vector<1x128xi32>
    %725 = arith.andi %722, %724 : vector<1x128xi1>
    %c8_i32_278 = arith.constant 8 : i32
    %726 = vector.broadcast %c8_i32_278 : i32 to vector<1x128xi32>
    %727 = arith.cmpi slt, %717, %726 : vector<1x128xi32>
    %728 = arith.andi %725, %727 : vector<1x128xi1>
    %cst_279 = arith.constant 0.000000e+00 : f32
    %729 = vector.shape_cast %728 : vector<1x128xi1> to vector<1x128xi1>
    %730 = vector.broadcast %729 : vector<1x128xi1> to vector<8x128xi1>
    %731 = vector.broadcast %cst_279 : f32 to vector<8x128xf32>
    %732 = arith.select %730, %713, %731 : vector<8x128xi1>, vector<8x128xf32>
    %cst_280 = arith.constant dense<0.000000e+00> : vector<8x128xf32>
    %733 = tpu.matmul %710, %732, %cst_280 {dimension_numbers = #tpu.dot_dimension_numbers<[1], [0], [0], [1], [0, 0, 1, 1], [], []>} : vector<8x8xf32>, vector<8x128xf32>, vector<8x128xf32> -> vector<8x128xf32>
    %734 = arith.addf %708, %733 : vector<8x128xf32>
    %735 = vector.extract_strided_slice %10 {offsets = [2, 1, 0, 0], sizes = [1, 1, 8, 8], strides = [1, 1, 1, 1]} : vector<3x3x8x8xf32> to vector<1x1x8x8xf32>
    %736 = vector.shape_cast %735 : vector<1x1x8x8xf32> to vector<8x8xf32>
    %737 = vector.extract_strided_slice %556 {offsets = [0, 8], sizes = [8, 120], strides = [1, 1]} : vector<8x128xf32> to vector<8x120xf32>
    %738 = vector.extract_strided_slice %556 {offsets = [0, 0], sizes = [8, 8], strides = [1, 1]} : vector<8x128xf32> to vector<8x8xf32>
    %739 = tpu.concatenate %737, %738 in 1 : vector<8x120xf32>, vector<8x8xf32> -> vector<8x128xf32>
    %c1_i32_281 = arith.constant 1 : i32
    %740 = vector.broadcast %c1_i32_281 : i32 to vector<1x128xi32>
    %741 = arith.addi %28, %740 : vector<1x128xi32>
    %c0_i32_282 = arith.constant 0 : i32
    %742 = vector.broadcast %c0_i32_282 : i32 to vector<1x128xi32>
    %743 = arith.addi %29, %742 : vector<1x128xi32>
    %c0_i32_283 = arith.constant 0 : i32
    %744 = vector.broadcast %c0_i32_283 : i32 to vector<1x128xi32>
    %745 = arith.cmpi sge, %741, %744 : vector<1x128xi32>
    %c8_i32_284 = arith.constant 8 : i32
    %746 = vector.broadcast %c8_i32_284 : i32 to vector<1x128xi32>
    %747 = arith.cmpi slt, %741, %746 : vector<1x128xi32>
    %748 = arith.andi %745, %747 : vector<1x128xi1>
    %c0_i32_285 = arith.constant 0 : i32
    %749 = vector.broadcast %c0_i32_285 : i32 to vector<1x128xi32>
    %750 = arith.cmpi sge, %743, %749 : vector<1x128xi32>
    %751 = arith.andi %748, %750 : vector<1x128xi1>
    %c8_i32_286 = arith.constant 8 : i32
    %752 = vector.broadcast %c8_i32_286 : i32 to vector<1x128xi32>
    %753 = arith.cmpi slt, %743, %752 : vector<1x128xi32>
    %754 = arith.andi %751, %753 : vector<1x128xi1>
    %cst_287 = arith.constant 0.000000e+00 : f32
    %755 = vector.shape_cast %754 : vector<1x128xi1> to vector<1x128xi1>
    %756 = vector.broadcast %755 : vector<1x128xi1> to vector<8x128xi1>
    %757 = vector.broadcast %cst_287 : f32 to vector<8x128xf32>
    %758 = arith.select %756, %739, %757 : vector<8x128xi1>, vector<8x128xf32>
    %cst_288 = arith.constant dense<0.000000e+00> : vector<8x128xf32>
    %759 = tpu.matmul %736, %758, %cst_288 {dimension_numbers = #tpu.dot_dimension_numbers<[1], [0], [0], [1], [0, 0, 1, 1], [], []>} : vector<8x8xf32>, vector<8x128xf32>, vector<8x128xf32> -> vector<8x128xf32>
    %760 = arith.addf %734, %759 : vector<8x128xf32>
    %761 = vector.extract_strided_slice %10 {offsets = [2, 2, 0, 0], sizes = [1, 1, 8, 8], strides = [1, 1, 1, 1]} : vector<3x3x8x8xf32> to vector<1x1x8x8xf32>
    %762 = vector.shape_cast %761 : vector<1x1x8x8xf32> to vector<8x8xf32>
    %763 = vector.extract_strided_slice %556 {offsets = [0, 9], sizes = [8, 119], strides = [1, 1]} : vector<8x128xf32> to vector<8x119xf32>
    %764 = vector.extract_strided_slice %556 {offsets = [0, 0], sizes = [8, 9], strides = [1, 1]} : vector<8x128xf32> to vector<8x9xf32>
    %765 = tpu.concatenate %763, %764 in 1 : vector<8x119xf32>, vector<8x9xf32> -> vector<8x128xf32>
    %c1_i32_289 = arith.constant 1 : i32
    %766 = vector.broadcast %c1_i32_289 : i32 to vector<1x128xi32>
    %767 = arith.addi %28, %766 : vector<1x128xi32>
    %c1_i32_290 = arith.constant 1 : i32
    %768 = vector.broadcast %c1_i32_290 : i32 to vector<1x128xi32>
    %769 = arith.addi %29, %768 : vector<1x128xi32>
    %c0_i32_291 = arith.constant 0 : i32
    %770 = vector.broadcast %c0_i32_291 : i32 to vector<1x128xi32>
    %771 = arith.cmpi sge, %767, %770 : vector<1x128xi32>
    %c8_i32_292 = arith.constant 8 : i32
    %772 = vector.broadcast %c8_i32_292 : i32 to vector<1x128xi32>
    %773 = arith.cmpi slt, %767, %772 : vector<1x128xi32>
    %774 = arith.andi %771, %773 : vector<1x128xi1>
    %c0_i32_293 = arith.constant 0 : i32
    %775 = vector.broadcast %c0_i32_293 : i32 to vector<1x128xi32>
    %776 = arith.cmpi sge, %769, %775 : vector<1x128xi32>
    %777 = arith.andi %774, %776 : vector<1x128xi1>
    %c8_i32_294 = arith.constant 8 : i32
    %778 = vector.broadcast %c8_i32_294 : i32 to vector<1x128xi32>
    %779 = arith.cmpi slt, %769, %778 : vector<1x128xi32>
    %780 = arith.andi %777, %779 : vector<1x128xi1>
    %cst_295 = arith.constant 0.000000e+00 : f32
    %781 = vector.shape_cast %780 : vector<1x128xi1> to vector<1x128xi1>
    %782 = vector.broadcast %781 : vector<1x128xi1> to vector<8x128xi1>
    %783 = vector.broadcast %cst_295 : f32 to vector<8x128xf32>
    %784 = arith.select %782, %765, %783 : vector<8x128xi1>, vector<8x128xf32>
    %cst_296 = arith.constant dense<0.000000e+00> : vector<8x128xf32>
    %785 = tpu.matmul %762, %784, %cst_296 {dimension_numbers = #tpu.dot_dimension_numbers<[1], [0], [0], [1], [0, 0, 1, 1], [], []>} : vector<8x8xf32>, vector<8x128xf32>, vector<8x128xf32> -> vector<8x128xf32>
    %786 = arith.addf %760, %785 : vector<8x128xf32>
    %787 = vector.broadcast %8 : vector<8x1xf32> to vector<8x128xf32>
    %788 = arith.addf %786, %787 : vector<8x128xf32>
    %cst_297 = arith.constant 0.000000e+00 : f32
    %789 = vector.broadcast %cst_297 : f32 to vector<8x128xf32>
    %790 = arith.maximumf %788, %789 : vector<8x128xf32>
    %cst_298 = arith.constant dense<0.000000e+00> : vector<32x128xf32>
    %791 = tpu.matmul %11, %790, %cst_298 {dimension_numbers = #tpu.dot_dimension_numbers<[1], [0], [0], [1], [0, 0, 1, 1], [], []>} : vector<32x8xf32>, vector<8x128xf32>, vector<32x128xf32> -> vector<32x128xf32>
    %792 = arith.addf %551, %791 : vector<32x128xf32>
    %cst_299 = arith.constant 0.000000e+00 : f32
    %793 = vector.broadcast %cst_299 : f32 to vector<32x128xf32>
    %794 = arith.cmpf oge, %792, %793 : vector<32x128xf32>
    %cst_300 = arith.constant 2.500000e-01 : f32
    %795 = vector.broadcast %cst_300 : f32 to vector<32x128xf32>
    %796 = arith.mulf %795, %792 : vector<32x128xf32>
    %797 = arith.select %794, %792, %796 : vector<32x128xi1>, vector<32x128xf32>
    %cst_301 = arith.constant dense<0.000000e+00> : vector<8x128xf32>
    %798 = tpu.matmul %14, %797, %cst_301 {dimension_numbers = #tpu.dot_dimension_numbers<[1], [0], [0], [1], [0, 0, 1, 1], [], []>} : vector<8x32xf32>, vector<32x128xf32>, vector<8x128xf32> -> vector<8x128xf32>
    %799 = vector.broadcast %12 : vector<8x1xf32> to vector<8x128xf32>
    %800 = arith.addf %798, %799 : vector<8x128xf32>
    %cst_302 = arith.constant 0.000000e+00 : f32
    %801 = vector.broadcast %cst_302 : f32 to vector<8x128xf32>
    %802 = arith.maximumf %800, %801 : vector<8x128xf32>
    %803 = vector.extract_strided_slice %15 {offsets = [0, 0, 0, 0], sizes = [1, 1, 8, 8], strides = [1, 1, 1, 1]} : vector<3x3x8x8xf32> to vector<1x1x8x8xf32>
    %804 = vector.shape_cast %803 : vector<1x1x8x8xf32> to vector<8x8xf32>
    %805 = vector.extract_strided_slice %802 {offsets = [0, 119], sizes = [8, 9], strides = [1, 1]} : vector<8x128xf32> to vector<8x9xf32>
    %806 = vector.extract_strided_slice %802 {offsets = [0, 0], sizes = [8, 119], strides = [1, 1]} : vector<8x128xf32> to vector<8x119xf32>
    %807 = tpu.concatenate %805, %806 in 1 : vector<8x9xf32>, vector<8x119xf32> -> vector<8x128xf32>
    %c-1_i32_303 = arith.constant -1 : i32
    %808 = vector.broadcast %c-1_i32_303 : i32 to vector<1x128xi32>
    %809 = arith.addi %28, %808 : vector<1x128xi32>
    %c-1_i32_304 = arith.constant -1 : i32
    %810 = vector.broadcast %c-1_i32_304 : i32 to vector<1x128xi32>
    %811 = arith.addi %29, %810 : vector<1x128xi32>
    %c0_i32_305 = arith.constant 0 : i32
    %812 = vector.broadcast %c0_i32_305 : i32 to vector<1x128xi32>
    %813 = arith.cmpi sge, %809, %812 : vector<1x128xi32>
    %c8_i32_306 = arith.constant 8 : i32
    %814 = vector.broadcast %c8_i32_306 : i32 to vector<1x128xi32>
    %815 = arith.cmpi slt, %809, %814 : vector<1x128xi32>
    %816 = arith.andi %813, %815 : vector<1x128xi1>
    %c0_i32_307 = arith.constant 0 : i32
    %817 = vector.broadcast %c0_i32_307 : i32 to vector<1x128xi32>
    %818 = arith.cmpi sge, %811, %817 : vector<1x128xi32>
    %819 = arith.andi %816, %818 : vector<1x128xi1>
    %c8_i32_308 = arith.constant 8 : i32
    %820 = vector.broadcast %c8_i32_308 : i32 to vector<1x128xi32>
    %821 = arith.cmpi slt, %811, %820 : vector<1x128xi32>
    %822 = arith.andi %819, %821 : vector<1x128xi1>
    %cst_309 = arith.constant 0.000000e+00 : f32
    %823 = vector.shape_cast %822 : vector<1x128xi1> to vector<1x128xi1>
    %824 = vector.broadcast %823 : vector<1x128xi1> to vector<8x128xi1>
    %825 = vector.broadcast %cst_309 : f32 to vector<8x128xf32>
    %826 = arith.select %824, %807, %825 : vector<8x128xi1>, vector<8x128xf32>
    %cst_310 = arith.constant dense<0.000000e+00> : vector<8x128xf32>
    %827 = tpu.matmul %804, %826, %cst_310 {dimension_numbers = #tpu.dot_dimension_numbers<[1], [0], [0], [1], [0, 0, 1, 1], [], []>} : vector<8x8xf32>, vector<8x128xf32>, vector<8x128xf32> -> vector<8x128xf32>
    %828 = vector.extract_strided_slice %15 {offsets = [0, 1, 0, 0], sizes = [1, 1, 8, 8], strides = [1, 1, 1, 1]} : vector<3x3x8x8xf32> to vector<1x1x8x8xf32>
    %829 = vector.shape_cast %828 : vector<1x1x8x8xf32> to vector<8x8xf32>
    %830 = vector.extract_strided_slice %802 {offsets = [0, 120], sizes = [8, 8], strides = [1, 1]} : vector<8x128xf32> to vector<8x8xf32>
    %831 = vector.extract_strided_slice %802 {offsets = [0, 0], sizes = [8, 120], strides = [1, 1]} : vector<8x128xf32> to vector<8x120xf32>
    %832 = tpu.concatenate %830, %831 in 1 : vector<8x8xf32>, vector<8x120xf32> -> vector<8x128xf32>
    %c-1_i32_311 = arith.constant -1 : i32
    %833 = vector.broadcast %c-1_i32_311 : i32 to vector<1x128xi32>
    %834 = arith.addi %28, %833 : vector<1x128xi32>
    %c0_i32_312 = arith.constant 0 : i32
    %835 = vector.broadcast %c0_i32_312 : i32 to vector<1x128xi32>
    %836 = arith.addi %29, %835 : vector<1x128xi32>
    %c0_i32_313 = arith.constant 0 : i32
    %837 = vector.broadcast %c0_i32_313 : i32 to vector<1x128xi32>
    %838 = arith.cmpi sge, %834, %837 : vector<1x128xi32>
    %c8_i32_314 = arith.constant 8 : i32
    %839 = vector.broadcast %c8_i32_314 : i32 to vector<1x128xi32>
    %840 = arith.cmpi slt, %834, %839 : vector<1x128xi32>
    %841 = arith.andi %838, %840 : vector<1x128xi1>
    %c0_i32_315 = arith.constant 0 : i32
    %842 = vector.broadcast %c0_i32_315 : i32 to vector<1x128xi32>
    %843 = arith.cmpi sge, %836, %842 : vector<1x128xi32>
    %844 = arith.andi %841, %843 : vector<1x128xi1>
    %c8_i32_316 = arith.constant 8 : i32
    %845 = vector.broadcast %c8_i32_316 : i32 to vector<1x128xi32>
    %846 = arith.cmpi slt, %836, %845 : vector<1x128xi32>
    %847 = arith.andi %844, %846 : vector<1x128xi1>
    %cst_317 = arith.constant 0.000000e+00 : f32
    %848 = vector.shape_cast %847 : vector<1x128xi1> to vector<1x128xi1>
    %849 = vector.broadcast %848 : vector<1x128xi1> to vector<8x128xi1>
    %850 = vector.broadcast %cst_317 : f32 to vector<8x128xf32>
    %851 = arith.select %849, %832, %850 : vector<8x128xi1>, vector<8x128xf32>
    %cst_318 = arith.constant dense<0.000000e+00> : vector<8x128xf32>
    %852 = tpu.matmul %829, %851, %cst_318 {dimension_numbers = #tpu.dot_dimension_numbers<[1], [0], [0], [1], [0, 0, 1, 1], [], []>} : vector<8x8xf32>, vector<8x128xf32>, vector<8x128xf32> -> vector<8x128xf32>
    %853 = arith.addf %827, %852 : vector<8x128xf32>
    %854 = vector.extract_strided_slice %15 {offsets = [0, 2, 0, 0], sizes = [1, 1, 8, 8], strides = [1, 1, 1, 1]} : vector<3x3x8x8xf32> to vector<1x1x8x8xf32>
    %855 = vector.shape_cast %854 : vector<1x1x8x8xf32> to vector<8x8xf32>
    %856 = vector.extract_strided_slice %802 {offsets = [0, 121], sizes = [8, 7], strides = [1, 1]} : vector<8x128xf32> to vector<8x7xf32>
    %857 = vector.extract_strided_slice %802 {offsets = [0, 0], sizes = [8, 121], strides = [1, 1]} : vector<8x128xf32> to vector<8x121xf32>
    %858 = tpu.concatenate %856, %857 in 1 : vector<8x7xf32>, vector<8x121xf32> -> vector<8x128xf32>
    %c-1_i32_319 = arith.constant -1 : i32
    %859 = vector.broadcast %c-1_i32_319 : i32 to vector<1x128xi32>
    %860 = arith.addi %28, %859 : vector<1x128xi32>
    %c1_i32_320 = arith.constant 1 : i32
    %861 = vector.broadcast %c1_i32_320 : i32 to vector<1x128xi32>
    %862 = arith.addi %29, %861 : vector<1x128xi32>
    %c0_i32_321 = arith.constant 0 : i32
    %863 = vector.broadcast %c0_i32_321 : i32 to vector<1x128xi32>
    %864 = arith.cmpi sge, %860, %863 : vector<1x128xi32>
    %c8_i32_322 = arith.constant 8 : i32
    %865 = vector.broadcast %c8_i32_322 : i32 to vector<1x128xi32>
    %866 = arith.cmpi slt, %860, %865 : vector<1x128xi32>
    %867 = arith.andi %864, %866 : vector<1x128xi1>
    %c0_i32_323 = arith.constant 0 : i32
    %868 = vector.broadcast %c0_i32_323 : i32 to vector<1x128xi32>
    %869 = arith.cmpi sge, %862, %868 : vector<1x128xi32>
    %870 = arith.andi %867, %869 : vector<1x128xi1>
    %c8_i32_324 = arith.constant 8 : i32
    %871 = vector.broadcast %c8_i32_324 : i32 to vector<1x128xi32>
    %872 = arith.cmpi slt, %862, %871 : vector<1x128xi32>
    %873 = arith.andi %870, %872 : vector<1x128xi1>
    %cst_325 = arith.constant 0.000000e+00 : f32
    %874 = vector.shape_cast %873 : vector<1x128xi1> to vector<1x128xi1>
    %875 = vector.broadcast %874 : vector<1x128xi1> to vector<8x128xi1>
    %876 = vector.broadcast %cst_325 : f32 to vector<8x128xf32>
    %877 = arith.select %875, %858, %876 : vector<8x128xi1>, vector<8x128xf32>
    %cst_326 = arith.constant dense<0.000000e+00> : vector<8x128xf32>
    %878 = tpu.matmul %855, %877, %cst_326 {dimension_numbers = #tpu.dot_dimension_numbers<[1], [0], [0], [1], [0, 0, 1, 1], [], []>} : vector<8x8xf32>, vector<8x128xf32>, vector<8x128xf32> -> vector<8x128xf32>
    %879 = arith.addf %853, %878 : vector<8x128xf32>
    %880 = vector.extract_strided_slice %15 {offsets = [1, 0, 0, 0], sizes = [1, 1, 8, 8], strides = [1, 1, 1, 1]} : vector<3x3x8x8xf32> to vector<1x1x8x8xf32>
    %881 = vector.shape_cast %880 : vector<1x1x8x8xf32> to vector<8x8xf32>
    %882 = vector.extract_strided_slice %802 {offsets = [0, 127], sizes = [8, 1], strides = [1, 1]} : vector<8x128xf32> to vector<8x1xf32>
    %883 = vector.extract_strided_slice %802 {offsets = [0, 0], sizes = [8, 127], strides = [1, 1]} : vector<8x128xf32> to vector<8x127xf32>
    %884 = tpu.concatenate %882, %883 in 1 : vector<8x1xf32>, vector<8x127xf32> -> vector<8x128xf32>
    %c0_i32_327 = arith.constant 0 : i32
    %885 = vector.broadcast %c0_i32_327 : i32 to vector<1x128xi32>
    %886 = arith.addi %28, %885 : vector<1x128xi32>
    %c-1_i32_328 = arith.constant -1 : i32
    %887 = vector.broadcast %c-1_i32_328 : i32 to vector<1x128xi32>
    %888 = arith.addi %29, %887 : vector<1x128xi32>
    %c0_i32_329 = arith.constant 0 : i32
    %889 = vector.broadcast %c0_i32_329 : i32 to vector<1x128xi32>
    %890 = arith.cmpi sge, %886, %889 : vector<1x128xi32>
    %c8_i32_330 = arith.constant 8 : i32
    %891 = vector.broadcast %c8_i32_330 : i32 to vector<1x128xi32>
    %892 = arith.cmpi slt, %886, %891 : vector<1x128xi32>
    %893 = arith.andi %890, %892 : vector<1x128xi1>
    %c0_i32_331 = arith.constant 0 : i32
    %894 = vector.broadcast %c0_i32_331 : i32 to vector<1x128xi32>
    %895 = arith.cmpi sge, %888, %894 : vector<1x128xi32>
    %896 = arith.andi %893, %895 : vector<1x128xi1>
    %c8_i32_332 = arith.constant 8 : i32
    %897 = vector.broadcast %c8_i32_332 : i32 to vector<1x128xi32>
    %898 = arith.cmpi slt, %888, %897 : vector<1x128xi32>
    %899 = arith.andi %896, %898 : vector<1x128xi1>
    %cst_333 = arith.constant 0.000000e+00 : f32
    %900 = vector.shape_cast %899 : vector<1x128xi1> to vector<1x128xi1>
    %901 = vector.broadcast %900 : vector<1x128xi1> to vector<8x128xi1>
    %902 = vector.broadcast %cst_333 : f32 to vector<8x128xf32>
    %903 = arith.select %901, %884, %902 : vector<8x128xi1>, vector<8x128xf32>
    %cst_334 = arith.constant dense<0.000000e+00> : vector<8x128xf32>
    %904 = tpu.matmul %881, %903, %cst_334 {dimension_numbers = #tpu.dot_dimension_numbers<[1], [0], [0], [1], [0, 0, 1, 1], [], []>} : vector<8x8xf32>, vector<8x128xf32>, vector<8x128xf32> -> vector<8x128xf32>
    %905 = arith.addf %879, %904 : vector<8x128xf32>
    %906 = vector.extract_strided_slice %15 {offsets = [1, 1, 0, 0], sizes = [1, 1, 8, 8], strides = [1, 1, 1, 1]} : vector<3x3x8x8xf32> to vector<1x1x8x8xf32>
    %907 = vector.shape_cast %906 : vector<1x1x8x8xf32> to vector<8x8xf32>
    %c0_i32_335 = arith.constant 0 : i32
    %908 = vector.broadcast %c0_i32_335 : i32 to vector<1x128xi32>
    %909 = arith.addi %28, %908 : vector<1x128xi32>
    %c0_i32_336 = arith.constant 0 : i32
    %910 = vector.broadcast %c0_i32_336 : i32 to vector<1x128xi32>
    %911 = arith.addi %29, %910 : vector<1x128xi32>
    %c0_i32_337 = arith.constant 0 : i32
    %912 = vector.broadcast %c0_i32_337 : i32 to vector<1x128xi32>
    %913 = arith.cmpi sge, %909, %912 : vector<1x128xi32>
    %c8_i32_338 = arith.constant 8 : i32
    %914 = vector.broadcast %c8_i32_338 : i32 to vector<1x128xi32>
    %915 = arith.cmpi slt, %909, %914 : vector<1x128xi32>
    %916 = arith.andi %913, %915 : vector<1x128xi1>
    %c0_i32_339 = arith.constant 0 : i32
    %917 = vector.broadcast %c0_i32_339 : i32 to vector<1x128xi32>
    %918 = arith.cmpi sge, %911, %917 : vector<1x128xi32>
    %919 = arith.andi %916, %918 : vector<1x128xi1>
    %c8_i32_340 = arith.constant 8 : i32
    %920 = vector.broadcast %c8_i32_340 : i32 to vector<1x128xi32>
    %921 = arith.cmpi slt, %911, %920 : vector<1x128xi32>
    %922 = arith.andi %919, %921 : vector<1x128xi1>
    %cst_341 = arith.constant 0.000000e+00 : f32
    %923 = vector.shape_cast %922 : vector<1x128xi1> to vector<1x128xi1>
    %924 = vector.broadcast %923 : vector<1x128xi1> to vector<8x128xi1>
    %925 = vector.broadcast %cst_341 : f32 to vector<8x128xf32>
    %926 = arith.select %924, %802, %925 : vector<8x128xi1>, vector<8x128xf32>
    %cst_342 = arith.constant dense<0.000000e+00> : vector<8x128xf32>
    %927 = tpu.matmul %907, %926, %cst_342 {dimension_numbers = #tpu.dot_dimension_numbers<[1], [0], [0], [1], [0, 0, 1, 1], [], []>} : vector<8x8xf32>, vector<8x128xf32>, vector<8x128xf32> -> vector<8x128xf32>
    %928 = arith.addf %905, %927 : vector<8x128xf32>
    %929 = vector.extract_strided_slice %15 {offsets = [1, 2, 0, 0], sizes = [1, 1, 8, 8], strides = [1, 1, 1, 1]} : vector<3x3x8x8xf32> to vector<1x1x8x8xf32>
    %930 = vector.shape_cast %929 : vector<1x1x8x8xf32> to vector<8x8xf32>
    %931 = vector.extract_strided_slice %802 {offsets = [0, 1], sizes = [8, 127], strides = [1, 1]} : vector<8x128xf32> to vector<8x127xf32>
    %932 = vector.extract_strided_slice %802 {offsets = [0, 0], sizes = [8, 1], strides = [1, 1]} : vector<8x128xf32> to vector<8x1xf32>
    %933 = tpu.concatenate %931, %932 in 1 : vector<8x127xf32>, vector<8x1xf32> -> vector<8x128xf32>
    %c0_i32_343 = arith.constant 0 : i32
    %934 = vector.broadcast %c0_i32_343 : i32 to vector<1x128xi32>
    %935 = arith.addi %28, %934 : vector<1x128xi32>
    %c1_i32_344 = arith.constant 1 : i32
    %936 = vector.broadcast %c1_i32_344 : i32 to vector<1x128xi32>
    %937 = arith.addi %29, %936 : vector<1x128xi32>
    %c0_i32_345 = arith.constant 0 : i32
    %938 = vector.broadcast %c0_i32_345 : i32 to vector<1x128xi32>
    %939 = arith.cmpi sge, %935, %938 : vector<1x128xi32>
    %c8_i32_346 = arith.constant 8 : i32
    %940 = vector.broadcast %c8_i32_346 : i32 to vector<1x128xi32>
    %941 = arith.cmpi slt, %935, %940 : vector<1x128xi32>
    %942 = arith.andi %939, %941 : vector<1x128xi1>
    %c0_i32_347 = arith.constant 0 : i32
    %943 = vector.broadcast %c0_i32_347 : i32 to vector<1x128xi32>
    %944 = arith.cmpi sge, %937, %943 : vector<1x128xi32>
    %945 = arith.andi %942, %944 : vector<1x128xi1>
    %c8_i32_348 = arith.constant 8 : i32
    %946 = vector.broadcast %c8_i32_348 : i32 to vector<1x128xi32>
    %947 = arith.cmpi slt, %937, %946 : vector<1x128xi32>
    %948 = arith.andi %945, %947 : vector<1x128xi1>
    %cst_349 = arith.constant 0.000000e+00 : f32
    %949 = vector.shape_cast %948 : vector<1x128xi1> to vector<1x128xi1>
    %950 = vector.broadcast %949 : vector<1x128xi1> to vector<8x128xi1>
    %951 = vector.broadcast %cst_349 : f32 to vector<8x128xf32>
    %952 = arith.select %950, %933, %951 : vector<8x128xi1>, vector<8x128xf32>
    %cst_350 = arith.constant dense<0.000000e+00> : vector<8x128xf32>
    %953 = tpu.matmul %930, %952, %cst_350 {dimension_numbers = #tpu.dot_dimension_numbers<[1], [0], [0], [1], [0, 0, 1, 1], [], []>} : vector<8x8xf32>, vector<8x128xf32>, vector<8x128xf32> -> vector<8x128xf32>
    %954 = arith.addf %928, %953 : vector<8x128xf32>
    %955 = vector.extract_strided_slice %15 {offsets = [2, 0, 0, 0], sizes = [1, 1, 8, 8], strides = [1, 1, 1, 1]} : vector<3x3x8x8xf32> to vector<1x1x8x8xf32>
    %956 = vector.shape_cast %955 : vector<1x1x8x8xf32> to vector<8x8xf32>
    %957 = vector.extract_strided_slice %802 {offsets = [0, 7], sizes = [8, 121], strides = [1, 1]} : vector<8x128xf32> to vector<8x121xf32>
    %958 = vector.extract_strided_slice %802 {offsets = [0, 0], sizes = [8, 7], strides = [1, 1]} : vector<8x128xf32> to vector<8x7xf32>
    %959 = tpu.concatenate %957, %958 in 1 : vector<8x121xf32>, vector<8x7xf32> -> vector<8x128xf32>
    %c1_i32_351 = arith.constant 1 : i32
    %960 = vector.broadcast %c1_i32_351 : i32 to vector<1x128xi32>
    %961 = arith.addi %28, %960 : vector<1x128xi32>
    %c-1_i32_352 = arith.constant -1 : i32
    %962 = vector.broadcast %c-1_i32_352 : i32 to vector<1x128xi32>
    %963 = arith.addi %29, %962 : vector<1x128xi32>
    %c0_i32_353 = arith.constant 0 : i32
    %964 = vector.broadcast %c0_i32_353 : i32 to vector<1x128xi32>
    %965 = arith.cmpi sge, %961, %964 : vector<1x128xi32>
    %c8_i32_354 = arith.constant 8 : i32
    %966 = vector.broadcast %c8_i32_354 : i32 to vector<1x128xi32>
    %967 = arith.cmpi slt, %961, %966 : vector<1x128xi32>
    %968 = arith.andi %965, %967 : vector<1x128xi1>
    %c0_i32_355 = arith.constant 0 : i32
    %969 = vector.broadcast %c0_i32_355 : i32 to vector<1x128xi32>
    %970 = arith.cmpi sge, %963, %969 : vector<1x128xi32>
    %971 = arith.andi %968, %970 : vector<1x128xi1>
    %c8_i32_356 = arith.constant 8 : i32
    %972 = vector.broadcast %c8_i32_356 : i32 to vector<1x128xi32>
    %973 = arith.cmpi slt, %963, %972 : vector<1x128xi32>
    %974 = arith.andi %971, %973 : vector<1x128xi1>
    %cst_357 = arith.constant 0.000000e+00 : f32
    %975 = vector.shape_cast %974 : vector<1x128xi1> to vector<1x128xi1>
    %976 = vector.broadcast %975 : vector<1x128xi1> to vector<8x128xi1>
    %977 = vector.broadcast %cst_357 : f32 to vector<8x128xf32>
    %978 = arith.select %976, %959, %977 : vector<8x128xi1>, vector<8x128xf32>
    %cst_358 = arith.constant dense<0.000000e+00> : vector<8x128xf32>
    %979 = tpu.matmul %956, %978, %cst_358 {dimension_numbers = #tpu.dot_dimension_numbers<[1], [0], [0], [1], [0, 0, 1, 1], [], []>} : vector<8x8xf32>, vector<8x128xf32>, vector<8x128xf32> -> vector<8x128xf32>
    %980 = arith.addf %954, %979 : vector<8x128xf32>
    %981 = vector.extract_strided_slice %15 {offsets = [2, 1, 0, 0], sizes = [1, 1, 8, 8], strides = [1, 1, 1, 1]} : vector<3x3x8x8xf32> to vector<1x1x8x8xf32>
    %982 = vector.shape_cast %981 : vector<1x1x8x8xf32> to vector<8x8xf32>
    %983 = vector.extract_strided_slice %802 {offsets = [0, 8], sizes = [8, 120], strides = [1, 1]} : vector<8x128xf32> to vector<8x120xf32>
    %984 = vector.extract_strided_slice %802 {offsets = [0, 0], sizes = [8, 8], strides = [1, 1]} : vector<8x128xf32> to vector<8x8xf32>
    %985 = tpu.concatenate %983, %984 in 1 : vector<8x120xf32>, vector<8x8xf32> -> vector<8x128xf32>
    %c1_i32_359 = arith.constant 1 : i32
    %986 = vector.broadcast %c1_i32_359 : i32 to vector<1x128xi32>
    %987 = arith.addi %28, %986 : vector<1x128xi32>
    %c0_i32_360 = arith.constant 0 : i32
    %988 = vector.broadcast %c0_i32_360 : i32 to vector<1x128xi32>
    %989 = arith.addi %29, %988 : vector<1x128xi32>
    %c0_i32_361 = arith.constant 0 : i32
    %990 = vector.broadcast %c0_i32_361 : i32 to vector<1x128xi32>
    %991 = arith.cmpi sge, %987, %990 : vector<1x128xi32>
    %c8_i32_362 = arith.constant 8 : i32
    %992 = vector.broadcast %c8_i32_362 : i32 to vector<1x128xi32>
    %993 = arith.cmpi slt, %987, %992 : vector<1x128xi32>
    %994 = arith.andi %991, %993 : vector<1x128xi1>
    %c0_i32_363 = arith.constant 0 : i32
    %995 = vector.broadcast %c0_i32_363 : i32 to vector<1x128xi32>
    %996 = arith.cmpi sge, %989, %995 : vector<1x128xi32>
    %997 = arith.andi %994, %996 : vector<1x128xi1>
    %c8_i32_364 = arith.constant 8 : i32
    %998 = vector.broadcast %c8_i32_364 : i32 to vector<1x128xi32>
    %999 = arith.cmpi slt, %989, %998 : vector<1x128xi32>
    %1000 = arith.andi %997, %999 : vector<1x128xi1>
    %cst_365 = arith.constant 0.000000e+00 : f32
    %1001 = vector.shape_cast %1000 : vector<1x128xi1> to vector<1x128xi1>
    %1002 = vector.broadcast %1001 : vector<1x128xi1> to vector<8x128xi1>
    %1003 = vector.broadcast %cst_365 : f32 to vector<8x128xf32>
    %1004 = arith.select %1002, %985, %1003 : vector<8x128xi1>, vector<8x128xf32>
    %cst_366 = arith.constant dense<0.000000e+00> : vector<8x128xf32>
    %1005 = tpu.matmul %982, %1004, %cst_366 {dimension_numbers = #tpu.dot_dimension_numbers<[1], [0], [0], [1], [0, 0, 1, 1], [], []>} : vector<8x8xf32>, vector<8x128xf32>, vector<8x128xf32> -> vector<8x128xf32>
    %1006 = arith.addf %980, %1005 : vector<8x128xf32>
    %1007 = vector.extract_strided_slice %15 {offsets = [2, 2, 0, 0], sizes = [1, 1, 8, 8], strides = [1, 1, 1, 1]} : vector<3x3x8x8xf32> to vector<1x1x8x8xf32>
    %1008 = vector.shape_cast %1007 : vector<1x1x8x8xf32> to vector<8x8xf32>
    %1009 = vector.extract_strided_slice %802 {offsets = [0, 9], sizes = [8, 119], strides = [1, 1]} : vector<8x128xf32> to vector<8x119xf32>
    %1010 = vector.extract_strided_slice %802 {offsets = [0, 0], sizes = [8, 9], strides = [1, 1]} : vector<8x128xf32> to vector<8x9xf32>
    %1011 = tpu.concatenate %1009, %1010 in 1 : vector<8x119xf32>, vector<8x9xf32> -> vector<8x128xf32>
    %c1_i32_367 = arith.constant 1 : i32
    %1012 = vector.broadcast %c1_i32_367 : i32 to vector<1x128xi32>
    %1013 = arith.addi %28, %1012 : vector<1x128xi32>
    %c1_i32_368 = arith.constant 1 : i32
    %1014 = vector.broadcast %c1_i32_368 : i32 to vector<1x128xi32>
    %1015 = arith.addi %29, %1014 : vector<1x128xi32>
    %c0_i32_369 = arith.constant 0 : i32
    %1016 = vector.broadcast %c0_i32_369 : i32 to vector<1x128xi32>
    %1017 = arith.cmpi sge, %1013, %1016 : vector<1x128xi32>
    %c8_i32_370 = arith.constant 8 : i32
    %1018 = vector.broadcast %c8_i32_370 : i32 to vector<1x128xi32>
    %1019 = arith.cmpi slt, %1013, %1018 : vector<1x128xi32>
    %1020 = arith.andi %1017, %1019 : vector<1x128xi1>
    %c0_i32_371 = arith.constant 0 : i32
    %1021 = vector.broadcast %c0_i32_371 : i32 to vector<1x128xi32>
    %1022 = arith.cmpi sge, %1015, %1021 : vector<1x128xi32>
    %1023 = arith.andi %1020, %1022 : vector<1x128xi1>
    %c8_i32_372 = arith.constant 8 : i32
    %1024 = vector.broadcast %c8_i32_372 : i32 to vector<1x128xi32>
    %1025 = arith.cmpi slt, %1015, %1024 : vector<1x128xi32>
    %1026 = arith.andi %1023, %1025 : vector<1x128xi1>
    %cst_373 = arith.constant 0.000000e+00 : f32
    %1027 = vector.shape_cast %1026 : vector<1x128xi1> to vector<1x128xi1>
    %1028 = vector.broadcast %1027 : vector<1x128xi1> to vector<8x128xi1>
    %1029 = vector.broadcast %cst_373 : f32 to vector<8x128xf32>
    %1030 = arith.select %1028, %1011, %1029 : vector<8x128xi1>, vector<8x128xf32>
    %cst_374 = arith.constant dense<0.000000e+00> : vector<8x128xf32>
    %1031 = tpu.matmul %1008, %1030, %cst_374 {dimension_numbers = #tpu.dot_dimension_numbers<[1], [0], [0], [1], [0, 0, 1, 1], [], []>} : vector<8x8xf32>, vector<8x128xf32>, vector<8x128xf32> -> vector<8x128xf32>
    %1032 = arith.addf %1006, %1031 : vector<8x128xf32>
    %1033 = vector.broadcast %13 : vector<8x1xf32> to vector<8x128xf32>
    %1034 = arith.addf %1032, %1033 : vector<8x128xf32>
    %cst_375 = arith.constant 0.000000e+00 : f32
    %1035 = vector.broadcast %cst_375 : f32 to vector<8x128xf32>
    %1036 = arith.maximumf %1034, %1035 : vector<8x128xf32>
    %cst_376 = arith.constant dense<0.000000e+00> : vector<32x128xf32>
    %1037 = tpu.matmul %16, %1036, %cst_376 {dimension_numbers = #tpu.dot_dimension_numbers<[1], [0], [0], [1], [0, 0, 1, 1], [], []>} : vector<32x8xf32>, vector<8x128xf32>, vector<32x128xf32> -> vector<32x128xf32>
    %1038 = arith.addf %797, %1037 : vector<32x128xf32>
    %cst_377 = arith.constant 0.000000e+00 : f32
    %1039 = vector.broadcast %cst_377 : f32 to vector<32x128xf32>
    %1040 = arith.cmpf oge, %1038, %1039 : vector<32x128xf32>
    %cst_378 = arith.constant 2.500000e-01 : f32
    %1041 = vector.broadcast %cst_378 : f32 to vector<32x128xf32>
    %1042 = arith.mulf %1041, %1038 : vector<32x128xf32>
    %1043 = arith.select %1040, %1038, %1042 : vector<32x128xi1>, vector<32x128xf32>
    %cst_379 = arith.constant dense<0.000000e+00> : vector<8x128xf32>
    %1044 = tpu.matmul %19, %1043, %cst_379 {dimension_numbers = #tpu.dot_dimension_numbers<[1], [0], [0], [1], [0, 0, 1, 1], [], []>} : vector<8x32xf32>, vector<32x128xf32>, vector<8x128xf32> -> vector<8x128xf32>
    %1045 = vector.broadcast %17 : vector<8x1xf32> to vector<8x128xf32>
    %1046 = arith.addf %1044, %1045 : vector<8x128xf32>
    %cst_380 = arith.constant 0.000000e+00 : f32
    %1047 = vector.broadcast %cst_380 : f32 to vector<8x128xf32>
    %1048 = arith.maximumf %1046, %1047 : vector<8x128xf32>
    %1049 = vector.extract_strided_slice %20 {offsets = [0, 0, 0, 0], sizes = [1, 1, 8, 8], strides = [1, 1, 1, 1]} : vector<3x3x8x8xf32> to vector<1x1x8x8xf32>
    %1050 = vector.shape_cast %1049 : vector<1x1x8x8xf32> to vector<8x8xf32>
    %1051 = vector.extract_strided_slice %1048 {offsets = [0, 119], sizes = [8, 9], strides = [1, 1]} : vector<8x128xf32> to vector<8x9xf32>
    %1052 = vector.extract_strided_slice %1048 {offsets = [0, 0], sizes = [8, 119], strides = [1, 1]} : vector<8x128xf32> to vector<8x119xf32>
    %1053 = tpu.concatenate %1051, %1052 in 1 : vector<8x9xf32>, vector<8x119xf32> -> vector<8x128xf32>
    %c-1_i32_381 = arith.constant -1 : i32
    %1054 = vector.broadcast %c-1_i32_381 : i32 to vector<1x128xi32>
    %1055 = arith.addi %28, %1054 : vector<1x128xi32>
    %c-1_i32_382 = arith.constant -1 : i32
    %1056 = vector.broadcast %c-1_i32_382 : i32 to vector<1x128xi32>
    %1057 = arith.addi %29, %1056 : vector<1x128xi32>
    %c0_i32_383 = arith.constant 0 : i32
    %1058 = vector.broadcast %c0_i32_383 : i32 to vector<1x128xi32>
    %1059 = arith.cmpi sge, %1055, %1058 : vector<1x128xi32>
    %c8_i32_384 = arith.constant 8 : i32
    %1060 = vector.broadcast %c8_i32_384 : i32 to vector<1x128xi32>
    %1061 = arith.cmpi slt, %1055, %1060 : vector<1x128xi32>
    %1062 = arith.andi %1059, %1061 : vector<1x128xi1>
    %c0_i32_385 = arith.constant 0 : i32
    %1063 = vector.broadcast %c0_i32_385 : i32 to vector<1x128xi32>
    %1064 = arith.cmpi sge, %1057, %1063 : vector<1x128xi32>
    %1065 = arith.andi %1062, %1064 : vector<1x128xi1>
    %c8_i32_386 = arith.constant 8 : i32
    %1066 = vector.broadcast %c8_i32_386 : i32 to vector<1x128xi32>
    %1067 = arith.cmpi slt, %1057, %1066 : vector<1x128xi32>
    %1068 = arith.andi %1065, %1067 : vector<1x128xi1>
    %cst_387 = arith.constant 0.000000e+00 : f32
    %1069 = vector.shape_cast %1068 : vector<1x128xi1> to vector<1x128xi1>
    %1070 = vector.broadcast %1069 : vector<1x128xi1> to vector<8x128xi1>
    %1071 = vector.broadcast %cst_387 : f32 to vector<8x128xf32>
    %1072 = arith.select %1070, %1053, %1071 : vector<8x128xi1>, vector<8x128xf32>
    %cst_388 = arith.constant dense<0.000000e+00> : vector<8x128xf32>
    %1073 = tpu.matmul %1050, %1072, %cst_388 {dimension_numbers = #tpu.dot_dimension_numbers<[1], [0], [0], [1], [0, 0, 1, 1], [], []>} : vector<8x8xf32>, vector<8x128xf32>, vector<8x128xf32> -> vector<8x128xf32>
    %1074 = vector.extract_strided_slice %20 {offsets = [0, 1, 0, 0], sizes = [1, 1, 8, 8], strides = [1, 1, 1, 1]} : vector<3x3x8x8xf32> to vector<1x1x8x8xf32>
    %1075 = vector.shape_cast %1074 : vector<1x1x8x8xf32> to vector<8x8xf32>
    %1076 = vector.extract_strided_slice %1048 {offsets = [0, 120], sizes = [8, 8], strides = [1, 1]} : vector<8x128xf32> to vector<8x8xf32>
    %1077 = vector.extract_strided_slice %1048 {offsets = [0, 0], sizes = [8, 120], strides = [1, 1]} : vector<8x128xf32> to vector<8x120xf32>
    %1078 = tpu.concatenate %1076, %1077 in 1 : vector<8x8xf32>, vector<8x120xf32> -> vector<8x128xf32>
    %c-1_i32_389 = arith.constant -1 : i32
    %1079 = vector.broadcast %c-1_i32_389 : i32 to vector<1x128xi32>
    %1080 = arith.addi %28, %1079 : vector<1x128xi32>
    %c0_i32_390 = arith.constant 0 : i32
    %1081 = vector.broadcast %c0_i32_390 : i32 to vector<1x128xi32>
    %1082 = arith.addi %29, %1081 : vector<1x128xi32>
    %c0_i32_391 = arith.constant 0 : i32
    %1083 = vector.broadcast %c0_i32_391 : i32 to vector<1x128xi32>
    %1084 = arith.cmpi sge, %1080, %1083 : vector<1x128xi32>
    %c8_i32_392 = arith.constant 8 : i32
    %1085 = vector.broadcast %c8_i32_392 : i32 to vector<1x128xi32>
    %1086 = arith.cmpi slt, %1080, %1085 : vector<1x128xi32>
    %1087 = arith.andi %1084, %1086 : vector<1x128xi1>
    %c0_i32_393 = arith.constant 0 : i32
    %1088 = vector.broadcast %c0_i32_393 : i32 to vector<1x128xi32>
    %1089 = arith.cmpi sge, %1082, %1088 : vector<1x128xi32>
    %1090 = arith.andi %1087, %1089 : vector<1x128xi1>
    %c8_i32_394 = arith.constant 8 : i32
    %1091 = vector.broadcast %c8_i32_394 : i32 to vector<1x128xi32>
    %1092 = arith.cmpi slt, %1082, %1091 : vector<1x128xi32>
    %1093 = arith.andi %1090, %1092 : vector<1x128xi1>
    %cst_395 = arith.constant 0.000000e+00 : f32
    %1094 = vector.shape_cast %1093 : vector<1x128xi1> to vector<1x128xi1>
    %1095 = vector.broadcast %1094 : vector<1x128xi1> to vector<8x128xi1>
    %1096 = vector.broadcast %cst_395 : f32 to vector<8x128xf32>
    %1097 = arith.select %1095, %1078, %1096 : vector<8x128xi1>, vector<8x128xf32>
    %cst_396 = arith.constant dense<0.000000e+00> : vector<8x128xf32>
    %1098 = tpu.matmul %1075, %1097, %cst_396 {dimension_numbers = #tpu.dot_dimension_numbers<[1], [0], [0], [1], [0, 0, 1, 1], [], []>} : vector<8x8xf32>, vector<8x128xf32>, vector<8x128xf32> -> vector<8x128xf32>
    %1099 = arith.addf %1073, %1098 : vector<8x128xf32>
    %1100 = vector.extract_strided_slice %20 {offsets = [0, 2, 0, 0], sizes = [1, 1, 8, 8], strides = [1, 1, 1, 1]} : vector<3x3x8x8xf32> to vector<1x1x8x8xf32>
    %1101 = vector.shape_cast %1100 : vector<1x1x8x8xf32> to vector<8x8xf32>
    %1102 = vector.extract_strided_slice %1048 {offsets = [0, 121], sizes = [8, 7], strides = [1, 1]} : vector<8x128xf32> to vector<8x7xf32>
    %1103 = vector.extract_strided_slice %1048 {offsets = [0, 0], sizes = [8, 121], strides = [1, 1]} : vector<8x128xf32> to vector<8x121xf32>
    %1104 = tpu.concatenate %1102, %1103 in 1 : vector<8x7xf32>, vector<8x121xf32> -> vector<8x128xf32>
    %c-1_i32_397 = arith.constant -1 : i32
    %1105 = vector.broadcast %c-1_i32_397 : i32 to vector<1x128xi32>
    %1106 = arith.addi %28, %1105 : vector<1x128xi32>
    %c1_i32_398 = arith.constant 1 : i32
    %1107 = vector.broadcast %c1_i32_398 : i32 to vector<1x128xi32>
    %1108 = arith.addi %29, %1107 : vector<1x128xi32>
    %c0_i32_399 = arith.constant 0 : i32
    %1109 = vector.broadcast %c0_i32_399 : i32 to vector<1x128xi32>
    %1110 = arith.cmpi sge, %1106, %1109 : vector<1x128xi32>
    %c8_i32_400 = arith.constant 8 : i32
    %1111 = vector.broadcast %c8_i32_400 : i32 to vector<1x128xi32>
    %1112 = arith.cmpi slt, %1106, %1111 : vector<1x128xi32>
    %1113 = arith.andi %1110, %1112 : vector<1x128xi1>
    %c0_i32_401 = arith.constant 0 : i32
    %1114 = vector.broadcast %c0_i32_401 : i32 to vector<1x128xi32>
    %1115 = arith.cmpi sge, %1108, %1114 : vector<1x128xi32>
    %1116 = arith.andi %1113, %1115 : vector<1x128xi1>
    %c8_i32_402 = arith.constant 8 : i32
    %1117 = vector.broadcast %c8_i32_402 : i32 to vector<1x128xi32>
    %1118 = arith.cmpi slt, %1108, %1117 : vector<1x128xi32>
    %1119 = arith.andi %1116, %1118 : vector<1x128xi1>
    %cst_403 = arith.constant 0.000000e+00 : f32
    %1120 = vector.shape_cast %1119 : vector<1x128xi1> to vector<1x128xi1>
    %1121 = vector.broadcast %1120 : vector<1x128xi1> to vector<8x128xi1>
    %1122 = vector.broadcast %cst_403 : f32 to vector<8x128xf32>
    %1123 = arith.select %1121, %1104, %1122 : vector<8x128xi1>, vector<8x128xf32>
    %cst_404 = arith.constant dense<0.000000e+00> : vector<8x128xf32>
    %1124 = tpu.matmul %1101, %1123, %cst_404 {dimension_numbers = #tpu.dot_dimension_numbers<[1], [0], [0], [1], [0, 0, 1, 1], [], []>} : vector<8x8xf32>, vector<8x128xf32>, vector<8x128xf32> -> vector<8x128xf32>
    %1125 = arith.addf %1099, %1124 : vector<8x128xf32>
    %1126 = vector.extract_strided_slice %20 {offsets = [1, 0, 0, 0], sizes = [1, 1, 8, 8], strides = [1, 1, 1, 1]} : vector<3x3x8x8xf32> to vector<1x1x8x8xf32>
    %1127 = vector.shape_cast %1126 : vector<1x1x8x8xf32> to vector<8x8xf32>
    %1128 = vector.extract_strided_slice %1048 {offsets = [0, 127], sizes = [8, 1], strides = [1, 1]} : vector<8x128xf32> to vector<8x1xf32>
    %1129 = vector.extract_strided_slice %1048 {offsets = [0, 0], sizes = [8, 127], strides = [1, 1]} : vector<8x128xf32> to vector<8x127xf32>
    %1130 = tpu.concatenate %1128, %1129 in 1 : vector<8x1xf32>, vector<8x127xf32> -> vector<8x128xf32>
    %c0_i32_405 = arith.constant 0 : i32
    %1131 = vector.broadcast %c0_i32_405 : i32 to vector<1x128xi32>
    %1132 = arith.addi %28, %1131 : vector<1x128xi32>
    %c-1_i32_406 = arith.constant -1 : i32
    %1133 = vector.broadcast %c-1_i32_406 : i32 to vector<1x128xi32>
    %1134 = arith.addi %29, %1133 : vector<1x128xi32>
    %c0_i32_407 = arith.constant 0 : i32
    %1135 = vector.broadcast %c0_i32_407 : i32 to vector<1x128xi32>
    %1136 = arith.cmpi sge, %1132, %1135 : vector<1x128xi32>
    %c8_i32_408 = arith.constant 8 : i32
    %1137 = vector.broadcast %c8_i32_408 : i32 to vector<1x128xi32>
    %1138 = arith.cmpi slt, %1132, %1137 : vector<1x128xi32>
    %1139 = arith.andi %1136, %1138 : vector<1x128xi1>
    %c0_i32_409 = arith.constant 0 : i32
    %1140 = vector.broadcast %c0_i32_409 : i32 to vector<1x128xi32>
    %1141 = arith.cmpi sge, %1134, %1140 : vector<1x128xi32>
    %1142 = arith.andi %1139, %1141 : vector<1x128xi1>
    %c8_i32_410 = arith.constant 8 : i32
    %1143 = vector.broadcast %c8_i32_410 : i32 to vector<1x128xi32>
    %1144 = arith.cmpi slt, %1134, %1143 : vector<1x128xi32>
    %1145 = arith.andi %1142, %1144 : vector<1x128xi1>
    %cst_411 = arith.constant 0.000000e+00 : f32
    %1146 = vector.shape_cast %1145 : vector<1x128xi1> to vector<1x128xi1>
    %1147 = vector.broadcast %1146 : vector<1x128xi1> to vector<8x128xi1>
    %1148 = vector.broadcast %cst_411 : f32 to vector<8x128xf32>
    %1149 = arith.select %1147, %1130, %1148 : vector<8x128xi1>, vector<8x128xf32>
    %cst_412 = arith.constant dense<0.000000e+00> : vector<8x128xf32>
    %1150 = tpu.matmul %1127, %1149, %cst_412 {dimension_numbers = #tpu.dot_dimension_numbers<[1], [0], [0], [1], [0, 0, 1, 1], [], []>} : vector<8x8xf32>, vector<8x128xf32>, vector<8x128xf32> -> vector<8x128xf32>
    %1151 = arith.addf %1125, %1150 : vector<8x128xf32>
    %1152 = vector.extract_strided_slice %20 {offsets = [1, 1, 0, 0], sizes = [1, 1, 8, 8], strides = [1, 1, 1, 1]} : vector<3x3x8x8xf32> to vector<1x1x8x8xf32>
    %1153 = vector.shape_cast %1152 : vector<1x1x8x8xf32> to vector<8x8xf32>
    %c0_i32_413 = arith.constant 0 : i32
    %1154 = vector.broadcast %c0_i32_413 : i32 to vector<1x128xi32>
    %1155 = arith.addi %28, %1154 : vector<1x128xi32>
    %c0_i32_414 = arith.constant 0 : i32
    %1156 = vector.broadcast %c0_i32_414 : i32 to vector<1x128xi32>
    %1157 = arith.addi %29, %1156 : vector<1x128xi32>
    %c0_i32_415 = arith.constant 0 : i32
    %1158 = vector.broadcast %c0_i32_415 : i32 to vector<1x128xi32>
    %1159 = arith.cmpi sge, %1155, %1158 : vector<1x128xi32>
    %c8_i32_416 = arith.constant 8 : i32
    %1160 = vector.broadcast %c8_i32_416 : i32 to vector<1x128xi32>
    %1161 = arith.cmpi slt, %1155, %1160 : vector<1x128xi32>
    %1162 = arith.andi %1159, %1161 : vector<1x128xi1>
    %c0_i32_417 = arith.constant 0 : i32
    %1163 = vector.broadcast %c0_i32_417 : i32 to vector<1x128xi32>
    %1164 = arith.cmpi sge, %1157, %1163 : vector<1x128xi32>
    %1165 = arith.andi %1162, %1164 : vector<1x128xi1>
    %c8_i32_418 = arith.constant 8 : i32
    %1166 = vector.broadcast %c8_i32_418 : i32 to vector<1x128xi32>
    %1167 = arith.cmpi slt, %1157, %1166 : vector<1x128xi32>
    %1168 = arith.andi %1165, %1167 : vector<1x128xi1>
    %cst_419 = arith.constant 0.000000e+00 : f32
    %1169 = vector.shape_cast %1168 : vector<1x128xi1> to vector<1x128xi1>
    %1170 = vector.broadcast %1169 : vector<1x128xi1> to vector<8x128xi1>
    %1171 = vector.broadcast %cst_419 : f32 to vector<8x128xf32>
    %1172 = arith.select %1170, %1048, %1171 : vector<8x128xi1>, vector<8x128xf32>
    %cst_420 = arith.constant dense<0.000000e+00> : vector<8x128xf32>
    %1173 = tpu.matmul %1153, %1172, %cst_420 {dimension_numbers = #tpu.dot_dimension_numbers<[1], [0], [0], [1], [0, 0, 1, 1], [], []>} : vector<8x8xf32>, vector<8x128xf32>, vector<8x128xf32> -> vector<8x128xf32>
    %1174 = arith.addf %1151, %1173 : vector<8x128xf32>
    %1175 = vector.extract_strided_slice %20 {offsets = [1, 2, 0, 0], sizes = [1, 1, 8, 8], strides = [1, 1, 1, 1]} : vector<3x3x8x8xf32> to vector<1x1x8x8xf32>
    %1176 = vector.shape_cast %1175 : vector<1x1x8x8xf32> to vector<8x8xf32>
    %1177 = vector.extract_strided_slice %1048 {offsets = [0, 1], sizes = [8, 127], strides = [1, 1]} : vector<8x128xf32> to vector<8x127xf32>
    %1178 = vector.extract_strided_slice %1048 {offsets = [0, 0], sizes = [8, 1], strides = [1, 1]} : vector<8x128xf32> to vector<8x1xf32>
    %1179 = tpu.concatenate %1177, %1178 in 1 : vector<8x127xf32>, vector<8x1xf32> -> vector<8x128xf32>
    %c0_i32_421 = arith.constant 0 : i32
    %1180 = vector.broadcast %c0_i32_421 : i32 to vector<1x128xi32>
    %1181 = arith.addi %28, %1180 : vector<1x128xi32>
    %c1_i32_422 = arith.constant 1 : i32
    %1182 = vector.broadcast %c1_i32_422 : i32 to vector<1x128xi32>
    %1183 = arith.addi %29, %1182 : vector<1x128xi32>
    %c0_i32_423 = arith.constant 0 : i32
    %1184 = vector.broadcast %c0_i32_423 : i32 to vector<1x128xi32>
    %1185 = arith.cmpi sge, %1181, %1184 : vector<1x128xi32>
    %c8_i32_424 = arith.constant 8 : i32
    %1186 = vector.broadcast %c8_i32_424 : i32 to vector<1x128xi32>
    %1187 = arith.cmpi slt, %1181, %1186 : vector<1x128xi32>
    %1188 = arith.andi %1185, %1187 : vector<1x128xi1>
    %c0_i32_425 = arith.constant 0 : i32
    %1189 = vector.broadcast %c0_i32_425 : i32 to vector<1x128xi32>
    %1190 = arith.cmpi sge, %1183, %1189 : vector<1x128xi32>
    %1191 = arith.andi %1188, %1190 : vector<1x128xi1>
    %c8_i32_426 = arith.constant 8 : i32
    %1192 = vector.broadcast %c8_i32_426 : i32 to vector<1x128xi32>
    %1193 = arith.cmpi slt, %1183, %1192 : vector<1x128xi32>
    %1194 = arith.andi %1191, %1193 : vector<1x128xi1>
    %cst_427 = arith.constant 0.000000e+00 : f32
    %1195 = vector.shape_cast %1194 : vector<1x128xi1> to vector<1x128xi1>
    %1196 = vector.broadcast %1195 : vector<1x128xi1> to vector<8x128xi1>
    %1197 = vector.broadcast %cst_427 : f32 to vector<8x128xf32>
    %1198 = arith.select %1196, %1179, %1197 : vector<8x128xi1>, vector<8x128xf32>
    %cst_428 = arith.constant dense<0.000000e+00> : vector<8x128xf32>
    %1199 = tpu.matmul %1176, %1198, %cst_428 {dimension_numbers = #tpu.dot_dimension_numbers<[1], [0], [0], [1], [0, 0, 1, 1], [], []>} : vector<8x8xf32>, vector<8x128xf32>, vector<8x128xf32> -> vector<8x128xf32>
    %1200 = arith.addf %1174, %1199 : vector<8x128xf32>
    %1201 = vector.extract_strided_slice %20 {offsets = [2, 0, 0, 0], sizes = [1, 1, 8, 8], strides = [1, 1, 1, 1]} : vector<3x3x8x8xf32> to vector<1x1x8x8xf32>
    %1202 = vector.shape_cast %1201 : vector<1x1x8x8xf32> to vector<8x8xf32>
    %1203 = vector.extract_strided_slice %1048 {offsets = [0, 7], sizes = [8, 121], strides = [1, 1]} : vector<8x128xf32> to vector<8x121xf32>
    %1204 = vector.extract_strided_slice %1048 {offsets = [0, 0], sizes = [8, 7], strides = [1, 1]} : vector<8x128xf32> to vector<8x7xf32>
    %1205 = tpu.concatenate %1203, %1204 in 1 : vector<8x121xf32>, vector<8x7xf32> -> vector<8x128xf32>
    %c1_i32_429 = arith.constant 1 : i32
    %1206 = vector.broadcast %c1_i32_429 : i32 to vector<1x128xi32>
    %1207 = arith.addi %28, %1206 : vector<1x128xi32>
    %c-1_i32_430 = arith.constant -1 : i32
    %1208 = vector.broadcast %c-1_i32_430 : i32 to vector<1x128xi32>
    %1209 = arith.addi %29, %1208 : vector<1x128xi32>
    %c0_i32_431 = arith.constant 0 : i32
    %1210 = vector.broadcast %c0_i32_431 : i32 to vector<1x128xi32>
    %1211 = arith.cmpi sge, %1207, %1210 : vector<1x128xi32>
    %c8_i32_432 = arith.constant 8 : i32
    %1212 = vector.broadcast %c8_i32_432 : i32 to vector<1x128xi32>
    %1213 = arith.cmpi slt, %1207, %1212 : vector<1x128xi32>
    %1214 = arith.andi %1211, %1213 : vector<1x128xi1>
    %c0_i32_433 = arith.constant 0 : i32
    %1215 = vector.broadcast %c0_i32_433 : i32 to vector<1x128xi32>
    %1216 = arith.cmpi sge, %1209, %1215 : vector<1x128xi32>
    %1217 = arith.andi %1214, %1216 : vector<1x128xi1>
    %c8_i32_434 = arith.constant 8 : i32
    %1218 = vector.broadcast %c8_i32_434 : i32 to vector<1x128xi32>
    %1219 = arith.cmpi slt, %1209, %1218 : vector<1x128xi32>
    %1220 = arith.andi %1217, %1219 : vector<1x128xi1>
    %cst_435 = arith.constant 0.000000e+00 : f32
    %1221 = vector.shape_cast %1220 : vector<1x128xi1> to vector<1x128xi1>
    %1222 = vector.broadcast %1221 : vector<1x128xi1> to vector<8x128xi1>
    %1223 = vector.broadcast %cst_435 : f32 to vector<8x128xf32>
    %1224 = arith.select %1222, %1205, %1223 : vector<8x128xi1>, vector<8x128xf32>
    %cst_436 = arith.constant dense<0.000000e+00> : vector<8x128xf32>
    %1225 = tpu.matmul %1202, %1224, %cst_436 {dimension_numbers = #tpu.dot_dimension_numbers<[1], [0], [0], [1], [0, 0, 1, 1], [], []>} : vector<8x8xf32>, vector<8x128xf32>, vector<8x128xf32> -> vector<8x128xf32>
    %1226 = arith.addf %1200, %1225 : vector<8x128xf32>
    %1227 = vector.extract_strided_slice %20 {offsets = [2, 1, 0, 0], sizes = [1, 1, 8, 8], strides = [1, 1, 1, 1]} : vector<3x3x8x8xf32> to vector<1x1x8x8xf32>
    %1228 = vector.shape_cast %1227 : vector<1x1x8x8xf32> to vector<8x8xf32>
    %1229 = vector.extract_strided_slice %1048 {offsets = [0, 8], sizes = [8, 120], strides = [1, 1]} : vector<8x128xf32> to vector<8x120xf32>
    %1230 = vector.extract_strided_slice %1048 {offsets = [0, 0], sizes = [8, 8], strides = [1, 1]} : vector<8x128xf32> to vector<8x8xf32>
    %1231 = tpu.concatenate %1229, %1230 in 1 : vector<8x120xf32>, vector<8x8xf32> -> vector<8x128xf32>
    %c1_i32_437 = arith.constant 1 : i32
    %1232 = vector.broadcast %c1_i32_437 : i32 to vector<1x128xi32>
    %1233 = arith.addi %28, %1232 : vector<1x128xi32>
    %c0_i32_438 = arith.constant 0 : i32
    %1234 = vector.broadcast %c0_i32_438 : i32 to vector<1x128xi32>
    %1235 = arith.addi %29, %1234 : vector<1x128xi32>
    %c0_i32_439 = arith.constant 0 : i32
    %1236 = vector.broadcast %c0_i32_439 : i32 to vector<1x128xi32>
    %1237 = arith.cmpi sge, %1233, %1236 : vector<1x128xi32>
    %c8_i32_440 = arith.constant 8 : i32
    %1238 = vector.broadcast %c8_i32_440 : i32 to vector<1x128xi32>
    %1239 = arith.cmpi slt, %1233, %1238 : vector<1x128xi32>
    %1240 = arith.andi %1237, %1239 : vector<1x128xi1>
    %c0_i32_441 = arith.constant 0 : i32
    %1241 = vector.broadcast %c0_i32_441 : i32 to vector<1x128xi32>
    %1242 = arith.cmpi sge, %1235, %1241 : vector<1x128xi32>
    %1243 = arith.andi %1240, %1242 : vector<1x128xi1>
    %c8_i32_442 = arith.constant 8 : i32
    %1244 = vector.broadcast %c8_i32_442 : i32 to vector<1x128xi32>
    %1245 = arith.cmpi slt, %1235, %1244 : vector<1x128xi32>
    %1246 = arith.andi %1243, %1245 : vector<1x128xi1>
    %cst_443 = arith.constant 0.000000e+00 : f32
    %1247 = vector.shape_cast %1246 : vector<1x128xi1> to vector<1x128xi1>
    %1248 = vector.broadcast %1247 : vector<1x128xi1> to vector<8x128xi1>
    %1249 = vector.broadcast %cst_443 : f32 to vector<8x128xf32>
    %1250 = arith.select %1248, %1231, %1249 : vector<8x128xi1>, vector<8x128xf32>
    %cst_444 = arith.constant dense<0.000000e+00> : vector<8x128xf32>
    %1251 = tpu.matmul %1228, %1250, %cst_444 {dimension_numbers = #tpu.dot_dimension_numbers<[1], [0], [0], [1], [0, 0, 1, 1], [], []>} : vector<8x8xf32>, vector<8x128xf32>, vector<8x128xf32> -> vector<8x128xf32>
    %1252 = arith.addf %1226, %1251 : vector<8x128xf32>
    %1253 = vector.extract_strided_slice %20 {offsets = [2, 2, 0, 0], sizes = [1, 1, 8, 8], strides = [1, 1, 1, 1]} : vector<3x3x8x8xf32> to vector<1x1x8x8xf32>
    %1254 = vector.shape_cast %1253 : vector<1x1x8x8xf32> to vector<8x8xf32>
    %1255 = vector.extract_strided_slice %1048 {offsets = [0, 9], sizes = [8, 119], strides = [1, 1]} : vector<8x128xf32> to vector<8x119xf32>
    %1256 = vector.extract_strided_slice %1048 {offsets = [0, 0], sizes = [8, 9], strides = [1, 1]} : vector<8x128xf32> to vector<8x9xf32>
    %1257 = tpu.concatenate %1255, %1256 in 1 : vector<8x119xf32>, vector<8x9xf32> -> vector<8x128xf32>
    %c1_i32_445 = arith.constant 1 : i32
    %1258 = vector.broadcast %c1_i32_445 : i32 to vector<1x128xi32>
    %1259 = arith.addi %28, %1258 : vector<1x128xi32>
    %c1_i32_446 = arith.constant 1 : i32
    %1260 = vector.broadcast %c1_i32_446 : i32 to vector<1x128xi32>
    %1261 = arith.addi %29, %1260 : vector<1x128xi32>
    %c0_i32_447 = arith.constant 0 : i32
    %1262 = vector.broadcast %c0_i32_447 : i32 to vector<1x128xi32>
    %1263 = arith.cmpi sge, %1259, %1262 : vector<1x128xi32>
    %c8_i32_448 = arith.constant 8 : i32
    %1264 = vector.broadcast %c8_i32_448 : i32 to vector<1x128xi32>
    %1265 = arith.cmpi slt, %1259, %1264 : vector<1x128xi32>
    %1266 = arith.andi %1263, %1265 : vector<1x128xi1>
    %c0_i32_449 = arith.constant 0 : i32
    %1267 = vector.broadcast %c0_i32_449 : i32 to vector<1x128xi32>
    %1268 = arith.cmpi sge, %1261, %1267 : vector<1x128xi32>
    %1269 = arith.andi %1266, %1268 : vector<1x128xi1>
    %c8_i32_450 = arith.constant 8 : i32
    %1270 = vector.broadcast %c8_i32_450 : i32 to vector<1x128xi32>
    %1271 = arith.cmpi slt, %1261, %1270 : vector<1x128xi32>
    %1272 = arith.andi %1269, %1271 : vector<1x128xi1>
    %cst_451 = arith.constant 0.000000e+00 : f32
    %1273 = vector.shape_cast %1272 : vector<1x128xi1> to vector<1x128xi1>
    %1274 = vector.broadcast %1273 : vector<1x128xi1> to vector<8x128xi1>
    %1275 = vector.broadcast %cst_451 : f32 to vector<8x128xf32>
    %1276 = arith.select %1274, %1257, %1275 : vector<8x128xi1>, vector<8x128xf32>
    %cst_452 = arith.constant dense<0.000000e+00> : vector<8x128xf32>
    %1277 = tpu.matmul %1254, %1276, %cst_452 {dimension_numbers = #tpu.dot_dimension_numbers<[1], [0], [0], [1], [0, 0, 1, 1], [], []>} : vector<8x8xf32>, vector<8x128xf32>, vector<8x128xf32> -> vector<8x128xf32>
    %1278 = arith.addf %1252, %1277 : vector<8x128xf32>
    %1279 = vector.broadcast %18 : vector<8x1xf32> to vector<8x128xf32>
    %1280 = arith.addf %1278, %1279 : vector<8x128xf32>
    %cst_453 = arith.constant 0.000000e+00 : f32
    %1281 = vector.broadcast %cst_453 : f32 to vector<8x128xf32>
    %1282 = arith.maximumf %1280, %1281 : vector<8x128xf32>
    %cst_454 = arith.constant dense<0.000000e+00> : vector<32x128xf32>
    %1283 = tpu.matmul %21, %1282, %cst_454 {dimension_numbers = #tpu.dot_dimension_numbers<[1], [0], [0], [1], [0, 0, 1, 1], [], []>} : vector<32x8xf32>, vector<8x128xf32>, vector<32x128xf32> -> vector<32x128xf32>
    %1284 = arith.addf %1043, %1283 : vector<32x128xf32>
    %cst_455 = arith.constant 0.000000e+00 : f32
    %1285 = vector.broadcast %cst_455 : f32 to vector<32x128xf32>
    %1286 = arith.cmpf oge, %1284, %1285 : vector<32x128xf32>
    %cst_456 = arith.constant 2.500000e-01 : f32
    %1287 = vector.broadcast %cst_456 : f32 to vector<32x128xf32>
    %1288 = arith.mulf %1287, %1284 : vector<32x128xf32>
    %1289 = arith.select %1286, %1284, %1288 : vector<32x128xi1>, vector<32x128xf32>
    %cst_457 = arith.constant dense<0.000000e+00> : vector<8x128xf32>
    %1290 = tpu.matmul %24, %1289, %cst_457 {dimension_numbers = #tpu.dot_dimension_numbers<[1], [0], [0], [1], [0, 0, 1, 1], [], []>} : vector<8x32xf32>, vector<32x128xf32>, vector<8x128xf32> -> vector<8x128xf32>
    %1291 = vector.broadcast %22 : vector<8x1xf32> to vector<8x128xf32>
    %1292 = arith.addf %1290, %1291 : vector<8x128xf32>
    %cst_458 = arith.constant 0.000000e+00 : f32
    %1293 = vector.broadcast %cst_458 : f32 to vector<8x128xf32>
    %1294 = arith.maximumf %1292, %1293 : vector<8x128xf32>
    %1295 = vector.extract_strided_slice %25 {offsets = [0, 0, 0, 0], sizes = [1, 1, 8, 8], strides = [1, 1, 1, 1]} : vector<3x3x8x8xf32> to vector<1x1x8x8xf32>
    %1296 = vector.shape_cast %1295 : vector<1x1x8x8xf32> to vector<8x8xf32>
    %1297 = vector.extract_strided_slice %1294 {offsets = [0, 119], sizes = [8, 9], strides = [1, 1]} : vector<8x128xf32> to vector<8x9xf32>
    %1298 = vector.extract_strided_slice %1294 {offsets = [0, 0], sizes = [8, 119], strides = [1, 1]} : vector<8x128xf32> to vector<8x119xf32>
    %1299 = tpu.concatenate %1297, %1298 in 1 : vector<8x9xf32>, vector<8x119xf32> -> vector<8x128xf32>
    %c-1_i32_459 = arith.constant -1 : i32
    %1300 = vector.broadcast %c-1_i32_459 : i32 to vector<1x128xi32>
    %1301 = arith.addi %28, %1300 : vector<1x128xi32>
    %c-1_i32_460 = arith.constant -1 : i32
    %1302 = vector.broadcast %c-1_i32_460 : i32 to vector<1x128xi32>
    %1303 = arith.addi %29, %1302 : vector<1x128xi32>
    %c0_i32_461 = arith.constant 0 : i32
    %1304 = vector.broadcast %c0_i32_461 : i32 to vector<1x128xi32>
    %1305 = arith.cmpi sge, %1301, %1304 : vector<1x128xi32>
    %c8_i32_462 = arith.constant 8 : i32
    %1306 = vector.broadcast %c8_i32_462 : i32 to vector<1x128xi32>
    %1307 = arith.cmpi slt, %1301, %1306 : vector<1x128xi32>
    %1308 = arith.andi %1305, %1307 : vector<1x128xi1>
    %c0_i32_463 = arith.constant 0 : i32
    %1309 = vector.broadcast %c0_i32_463 : i32 to vector<1x128xi32>
    %1310 = arith.cmpi sge, %1303, %1309 : vector<1x128xi32>
    %1311 = arith.andi %1308, %1310 : vector<1x128xi1>
    %c8_i32_464 = arith.constant 8 : i32
    %1312 = vector.broadcast %c8_i32_464 : i32 to vector<1x128xi32>
    %1313 = arith.cmpi slt, %1303, %1312 : vector<1x128xi32>
    %1314 = arith.andi %1311, %1313 : vector<1x128xi1>
    %cst_465 = arith.constant 0.000000e+00 : f32
    %1315 = vector.shape_cast %1314 : vector<1x128xi1> to vector<1x128xi1>
    %1316 = vector.broadcast %1315 : vector<1x128xi1> to vector<8x128xi1>
    %1317 = vector.broadcast %cst_465 : f32 to vector<8x128xf32>
    %1318 = arith.select %1316, %1299, %1317 : vector<8x128xi1>, vector<8x128xf32>
    %cst_466 = arith.constant dense<0.000000e+00> : vector<8x128xf32>
    %1319 = tpu.matmul %1296, %1318, %cst_466 {dimension_numbers = #tpu.dot_dimension_numbers<[1], [0], [0], [1], [0, 0, 1, 1], [], []>} : vector<8x8xf32>, vector<8x128xf32>, vector<8x128xf32> -> vector<8x128xf32>
    %1320 = vector.extract_strided_slice %25 {offsets = [0, 1, 0, 0], sizes = [1, 1, 8, 8], strides = [1, 1, 1, 1]} : vector<3x3x8x8xf32> to vector<1x1x8x8xf32>
    %1321 = vector.shape_cast %1320 : vector<1x1x8x8xf32> to vector<8x8xf32>
    %1322 = vector.extract_strided_slice %1294 {offsets = [0, 120], sizes = [8, 8], strides = [1, 1]} : vector<8x128xf32> to vector<8x8xf32>
    %1323 = vector.extract_strided_slice %1294 {offsets = [0, 0], sizes = [8, 120], strides = [1, 1]} : vector<8x128xf32> to vector<8x120xf32>
    %1324 = tpu.concatenate %1322, %1323 in 1 : vector<8x8xf32>, vector<8x120xf32> -> vector<8x128xf32>
    %c-1_i32_467 = arith.constant -1 : i32
    %1325 = vector.broadcast %c-1_i32_467 : i32 to vector<1x128xi32>
    %1326 = arith.addi %28, %1325 : vector<1x128xi32>
    %c0_i32_468 = arith.constant 0 : i32
    %1327 = vector.broadcast %c0_i32_468 : i32 to vector<1x128xi32>
    %1328 = arith.addi %29, %1327 : vector<1x128xi32>
    %c0_i32_469 = arith.constant 0 : i32
    %1329 = vector.broadcast %c0_i32_469 : i32 to vector<1x128xi32>
    %1330 = arith.cmpi sge, %1326, %1329 : vector<1x128xi32>
    %c8_i32_470 = arith.constant 8 : i32
    %1331 = vector.broadcast %c8_i32_470 : i32 to vector<1x128xi32>
    %1332 = arith.cmpi slt, %1326, %1331 : vector<1x128xi32>
    %1333 = arith.andi %1330, %1332 : vector<1x128xi1>
    %c0_i32_471 = arith.constant 0 : i32
    %1334 = vector.broadcast %c0_i32_471 : i32 to vector<1x128xi32>
    %1335 = arith.cmpi sge, %1328, %1334 : vector<1x128xi32>
    %1336 = arith.andi %1333, %1335 : vector<1x128xi1>
    %c8_i32_472 = arith.constant 8 : i32
    %1337 = vector.broadcast %c8_i32_472 : i32 to vector<1x128xi32>
    %1338 = arith.cmpi slt, %1328, %1337 : vector<1x128xi32>
    %1339 = arith.andi %1336, %1338 : vector<1x128xi1>
    %cst_473 = arith.constant 0.000000e+00 : f32
    %1340 = vector.shape_cast %1339 : vector<1x128xi1> to vector<1x128xi1>
    %1341 = vector.broadcast %1340 : vector<1x128xi1> to vector<8x128xi1>
    %1342 = vector.broadcast %cst_473 : f32 to vector<8x128xf32>
    %1343 = arith.select %1341, %1324, %1342 : vector<8x128xi1>, vector<8x128xf32>
    %cst_474 = arith.constant dense<0.000000e+00> : vector<8x128xf32>
    %1344 = tpu.matmul %1321, %1343, %cst_474 {dimension_numbers = #tpu.dot_dimension_numbers<[1], [0], [0], [1], [0, 0, 1, 1], [], []>} : vector<8x8xf32>, vector<8x128xf32>, vector<8x128xf32> -> vector<8x128xf32>
    %1345 = arith.addf %1319, %1344 : vector<8x128xf32>
    %1346 = vector.extract_strided_slice %25 {offsets = [0, 2, 0, 0], sizes = [1, 1, 8, 8], strides = [1, 1, 1, 1]} : vector<3x3x8x8xf32> to vector<1x1x8x8xf32>
    %1347 = vector.shape_cast %1346 : vector<1x1x8x8xf32> to vector<8x8xf32>
    %1348 = vector.extract_strided_slice %1294 {offsets = [0, 121], sizes = [8, 7], strides = [1, 1]} : vector<8x128xf32> to vector<8x7xf32>
    %1349 = vector.extract_strided_slice %1294 {offsets = [0, 0], sizes = [8, 121], strides = [1, 1]} : vector<8x128xf32> to vector<8x121xf32>
    %1350 = tpu.concatenate %1348, %1349 in 1 : vector<8x7xf32>, vector<8x121xf32> -> vector<8x128xf32>
    %c-1_i32_475 = arith.constant -1 : i32
    %1351 = vector.broadcast %c-1_i32_475 : i32 to vector<1x128xi32>
    %1352 = arith.addi %28, %1351 : vector<1x128xi32>
    %c1_i32_476 = arith.constant 1 : i32
    %1353 = vector.broadcast %c1_i32_476 : i32 to vector<1x128xi32>
    %1354 = arith.addi %29, %1353 : vector<1x128xi32>
    %c0_i32_477 = arith.constant 0 : i32
    %1355 = vector.broadcast %c0_i32_477 : i32 to vector<1x128xi32>
    %1356 = arith.cmpi sge, %1352, %1355 : vector<1x128xi32>
    %c8_i32_478 = arith.constant 8 : i32
    %1357 = vector.broadcast %c8_i32_478 : i32 to vector<1x128xi32>
    %1358 = arith.cmpi slt, %1352, %1357 : vector<1x128xi32>
    %1359 = arith.andi %1356, %1358 : vector<1x128xi1>
    %c0_i32_479 = arith.constant 0 : i32
    %1360 = vector.broadcast %c0_i32_479 : i32 to vector<1x128xi32>
    %1361 = arith.cmpi sge, %1354, %1360 : vector<1x128xi32>
    %1362 = arith.andi %1359, %1361 : vector<1x128xi1>
    %c8_i32_480 = arith.constant 8 : i32
    %1363 = vector.broadcast %c8_i32_480 : i32 to vector<1x128xi32>
    %1364 = arith.cmpi slt, %1354, %1363 : vector<1x128xi32>
    %1365 = arith.andi %1362, %1364 : vector<1x128xi1>
    %cst_481 = arith.constant 0.000000e+00 : f32
    %1366 = vector.shape_cast %1365 : vector<1x128xi1> to vector<1x128xi1>
    %1367 = vector.broadcast %1366 : vector<1x128xi1> to vector<8x128xi1>
    %1368 = vector.broadcast %cst_481 : f32 to vector<8x128xf32>
    %1369 = arith.select %1367, %1350, %1368 : vector<8x128xi1>, vector<8x128xf32>
    %cst_482 = arith.constant dense<0.000000e+00> : vector<8x128xf32>
    %1370 = tpu.matmul %1347, %1369, %cst_482 {dimension_numbers = #tpu.dot_dimension_numbers<[1], [0], [0], [1], [0, 0, 1, 1], [], []>} : vector<8x8xf32>, vector<8x128xf32>, vector<8x128xf32> -> vector<8x128xf32>
    %1371 = arith.addf %1345, %1370 : vector<8x128xf32>
    %1372 = vector.extract_strided_slice %25 {offsets = [1, 0, 0, 0], sizes = [1, 1, 8, 8], strides = [1, 1, 1, 1]} : vector<3x3x8x8xf32> to vector<1x1x8x8xf32>
    %1373 = vector.shape_cast %1372 : vector<1x1x8x8xf32> to vector<8x8xf32>
    %1374 = vector.extract_strided_slice %1294 {offsets = [0, 127], sizes = [8, 1], strides = [1, 1]} : vector<8x128xf32> to vector<8x1xf32>
    %1375 = vector.extract_strided_slice %1294 {offsets = [0, 0], sizes = [8, 127], strides = [1, 1]} : vector<8x128xf32> to vector<8x127xf32>
    %1376 = tpu.concatenate %1374, %1375 in 1 : vector<8x1xf32>, vector<8x127xf32> -> vector<8x128xf32>
    %c0_i32_483 = arith.constant 0 : i32
    %1377 = vector.broadcast %c0_i32_483 : i32 to vector<1x128xi32>
    %1378 = arith.addi %28, %1377 : vector<1x128xi32>
    %c-1_i32_484 = arith.constant -1 : i32
    %1379 = vector.broadcast %c-1_i32_484 : i32 to vector<1x128xi32>
    %1380 = arith.addi %29, %1379 : vector<1x128xi32>
    %c0_i32_485 = arith.constant 0 : i32
    %1381 = vector.broadcast %c0_i32_485 : i32 to vector<1x128xi32>
    %1382 = arith.cmpi sge, %1378, %1381 : vector<1x128xi32>
    %c8_i32_486 = arith.constant 8 : i32
    %1383 = vector.broadcast %c8_i32_486 : i32 to vector<1x128xi32>
    %1384 = arith.cmpi slt, %1378, %1383 : vector<1x128xi32>
    %1385 = arith.andi %1382, %1384 : vector<1x128xi1>
    %c0_i32_487 = arith.constant 0 : i32
    %1386 = vector.broadcast %c0_i32_487 : i32 to vector<1x128xi32>
    %1387 = arith.cmpi sge, %1380, %1386 : vector<1x128xi32>
    %1388 = arith.andi %1385, %1387 : vector<1x128xi1>
    %c8_i32_488 = arith.constant 8 : i32
    %1389 = vector.broadcast %c8_i32_488 : i32 to vector<1x128xi32>
    %1390 = arith.cmpi slt, %1380, %1389 : vector<1x128xi32>
    %1391 = arith.andi %1388, %1390 : vector<1x128xi1>
    %cst_489 = arith.constant 0.000000e+00 : f32
    %1392 = vector.shape_cast %1391 : vector<1x128xi1> to vector<1x128xi1>
    %1393 = vector.broadcast %1392 : vector<1x128xi1> to vector<8x128xi1>
    %1394 = vector.broadcast %cst_489 : f32 to vector<8x128xf32>
    %1395 = arith.select %1393, %1376, %1394 : vector<8x128xi1>, vector<8x128xf32>
    %cst_490 = arith.constant dense<0.000000e+00> : vector<8x128xf32>
    %1396 = tpu.matmul %1373, %1395, %cst_490 {dimension_numbers = #tpu.dot_dimension_numbers<[1], [0], [0], [1], [0, 0, 1, 1], [], []>} : vector<8x8xf32>, vector<8x128xf32>, vector<8x128xf32> -> vector<8x128xf32>
    %1397 = arith.addf %1371, %1396 : vector<8x128xf32>
    %1398 = vector.extract_strided_slice %25 {offsets = [1, 1, 0, 0], sizes = [1, 1, 8, 8], strides = [1, 1, 1, 1]} : vector<3x3x8x8xf32> to vector<1x1x8x8xf32>
    %1399 = vector.shape_cast %1398 : vector<1x1x8x8xf32> to vector<8x8xf32>
    %c0_i32_491 = arith.constant 0 : i32
    %1400 = vector.broadcast %c0_i32_491 : i32 to vector<1x128xi32>
    %1401 = arith.addi %28, %1400 : vector<1x128xi32>
    %c0_i32_492 = arith.constant 0 : i32
    %1402 = vector.broadcast %c0_i32_492 : i32 to vector<1x128xi32>
    %1403 = arith.addi %29, %1402 : vector<1x128xi32>
    %c0_i32_493 = arith.constant 0 : i32
    %1404 = vector.broadcast %c0_i32_493 : i32 to vector<1x128xi32>
    %1405 = arith.cmpi sge, %1401, %1404 : vector<1x128xi32>
    %c8_i32_494 = arith.constant 8 : i32
    %1406 = vector.broadcast %c8_i32_494 : i32 to vector<1x128xi32>
    %1407 = arith.cmpi slt, %1401, %1406 : vector<1x128xi32>
    %1408 = arith.andi %1405, %1407 : vector<1x128xi1>
    %c0_i32_495 = arith.constant 0 : i32
    %1409 = vector.broadcast %c0_i32_495 : i32 to vector<1x128xi32>
    %1410 = arith.cmpi sge, %1403, %1409 : vector<1x128xi32>
    %1411 = arith.andi %1408, %1410 : vector<1x128xi1>
    %c8_i32_496 = arith.constant 8 : i32
    %1412 = vector.broadcast %c8_i32_496 : i32 to vector<1x128xi32>
    %1413 = arith.cmpi slt, %1403, %1412 : vector<1x128xi32>
    %1414 = arith.andi %1411, %1413 : vector<1x128xi1>
    %cst_497 = arith.constant 0.000000e+00 : f32
    %1415 = vector.shape_cast %1414 : vector<1x128xi1> to vector<1x128xi1>
    %1416 = vector.broadcast %1415 : vector<1x128xi1> to vector<8x128xi1>
    %1417 = vector.broadcast %cst_497 : f32 to vector<8x128xf32>
    %1418 = arith.select %1416, %1294, %1417 : vector<8x128xi1>, vector<8x128xf32>
    %cst_498 = arith.constant dense<0.000000e+00> : vector<8x128xf32>
    %1419 = tpu.matmul %1399, %1418, %cst_498 {dimension_numbers = #tpu.dot_dimension_numbers<[1], [0], [0], [1], [0, 0, 1, 1], [], []>} : vector<8x8xf32>, vector<8x128xf32>, vector<8x128xf32> -> vector<8x128xf32>
    %1420 = arith.addf %1397, %1419 : vector<8x128xf32>
    %1421 = vector.extract_strided_slice %25 {offsets = [1, 2, 0, 0], sizes = [1, 1, 8, 8], strides = [1, 1, 1, 1]} : vector<3x3x8x8xf32> to vector<1x1x8x8xf32>
    %1422 = vector.shape_cast %1421 : vector<1x1x8x8xf32> to vector<8x8xf32>
    %1423 = vector.extract_strided_slice %1294 {offsets = [0, 1], sizes = [8, 127], strides = [1, 1]} : vector<8x128xf32> to vector<8x127xf32>
    %1424 = vector.extract_strided_slice %1294 {offsets = [0, 0], sizes = [8, 1], strides = [1, 1]} : vector<8x128xf32> to vector<8x1xf32>
    %1425 = tpu.concatenate %1423, %1424 in 1 : vector<8x127xf32>, vector<8x1xf32> -> vector<8x128xf32>
    %c0_i32_499 = arith.constant 0 : i32
    %1426 = vector.broadcast %c0_i32_499 : i32 to vector<1x128xi32>
    %1427 = arith.addi %28, %1426 : vector<1x128xi32>
    %c1_i32_500 = arith.constant 1 : i32
    %1428 = vector.broadcast %c1_i32_500 : i32 to vector<1x128xi32>
    %1429 = arith.addi %29, %1428 : vector<1x128xi32>
    %c0_i32_501 = arith.constant 0 : i32
    %1430 = vector.broadcast %c0_i32_501 : i32 to vector<1x128xi32>
    %1431 = arith.cmpi sge, %1427, %1430 : vector<1x128xi32>
    %c8_i32_502 = arith.constant 8 : i32
    %1432 = vector.broadcast %c8_i32_502 : i32 to vector<1x128xi32>
    %1433 = arith.cmpi slt, %1427, %1432 : vector<1x128xi32>
    %1434 = arith.andi %1431, %1433 : vector<1x128xi1>
    %c0_i32_503 = arith.constant 0 : i32
    %1435 = vector.broadcast %c0_i32_503 : i32 to vector<1x128xi32>
    %1436 = arith.cmpi sge, %1429, %1435 : vector<1x128xi32>
    %1437 = arith.andi %1434, %1436 : vector<1x128xi1>
    %c8_i32_504 = arith.constant 8 : i32
    %1438 = vector.broadcast %c8_i32_504 : i32 to vector<1x128xi32>
    %1439 = arith.cmpi slt, %1429, %1438 : vector<1x128xi32>
    %1440 = arith.andi %1437, %1439 : vector<1x128xi1>
    %cst_505 = arith.constant 0.000000e+00 : f32
    %1441 = vector.shape_cast %1440 : vector<1x128xi1> to vector<1x128xi1>
    %1442 = vector.broadcast %1441 : vector<1x128xi1> to vector<8x128xi1>
    %1443 = vector.broadcast %cst_505 : f32 to vector<8x128xf32>
    %1444 = arith.select %1442, %1425, %1443 : vector<8x128xi1>, vector<8x128xf32>
    %cst_506 = arith.constant dense<0.000000e+00> : vector<8x128xf32>
    %1445 = tpu.matmul %1422, %1444, %cst_506 {dimension_numbers = #tpu.dot_dimension_numbers<[1], [0], [0], [1], [0, 0, 1, 1], [], []>} : vector<8x8xf32>, vector<8x128xf32>, vector<8x128xf32> -> vector<8x128xf32>
    %1446 = arith.addf %1420, %1445 : vector<8x128xf32>
    %1447 = vector.extract_strided_slice %25 {offsets = [2, 0, 0, 0], sizes = [1, 1, 8, 8], strides = [1, 1, 1, 1]} : vector<3x3x8x8xf32> to vector<1x1x8x8xf32>
    %1448 = vector.shape_cast %1447 : vector<1x1x8x8xf32> to vector<8x8xf32>
    %1449 = vector.extract_strided_slice %1294 {offsets = [0, 7], sizes = [8, 121], strides = [1, 1]} : vector<8x128xf32> to vector<8x121xf32>
    %1450 = vector.extract_strided_slice %1294 {offsets = [0, 0], sizes = [8, 7], strides = [1, 1]} : vector<8x128xf32> to vector<8x7xf32>
    %1451 = tpu.concatenate %1449, %1450 in 1 : vector<8x121xf32>, vector<8x7xf32> -> vector<8x128xf32>
    %c1_i32_507 = arith.constant 1 : i32
    %1452 = vector.broadcast %c1_i32_507 : i32 to vector<1x128xi32>
    %1453 = arith.addi %28, %1452 : vector<1x128xi32>
    %c-1_i32_508 = arith.constant -1 : i32
    %1454 = vector.broadcast %c-1_i32_508 : i32 to vector<1x128xi32>
    %1455 = arith.addi %29, %1454 : vector<1x128xi32>
    %c0_i32_509 = arith.constant 0 : i32
    %1456 = vector.broadcast %c0_i32_509 : i32 to vector<1x128xi32>
    %1457 = arith.cmpi sge, %1453, %1456 : vector<1x128xi32>
    %c8_i32_510 = arith.constant 8 : i32
    %1458 = vector.broadcast %c8_i32_510 : i32 to vector<1x128xi32>
    %1459 = arith.cmpi slt, %1453, %1458 : vector<1x128xi32>
    %1460 = arith.andi %1457, %1459 : vector<1x128xi1>
    %c0_i32_511 = arith.constant 0 : i32
    %1461 = vector.broadcast %c0_i32_511 : i32 to vector<1x128xi32>
    %1462 = arith.cmpi sge, %1455, %1461 : vector<1x128xi32>
    %1463 = arith.andi %1460, %1462 : vector<1x128xi1>
    %c8_i32_512 = arith.constant 8 : i32
    %1464 = vector.broadcast %c8_i32_512 : i32 to vector<1x128xi32>
    %1465 = arith.cmpi slt, %1455, %1464 : vector<1x128xi32>
    %1466 = arith.andi %1463, %1465 : vector<1x128xi1>
    %cst_513 = arith.constant 0.000000e+00 : f32
    %1467 = vector.shape_cast %1466 : vector<1x128xi1> to vector<1x128xi1>
    %1468 = vector.broadcast %1467 : vector<1x128xi1> to vector<8x128xi1>
    %1469 = vector.broadcast %cst_513 : f32 to vector<8x128xf32>
    %1470 = arith.select %1468, %1451, %1469 : vector<8x128xi1>, vector<8x128xf32>
    %cst_514 = arith.constant dense<0.000000e+00> : vector<8x128xf32>
    %1471 = tpu.matmul %1448, %1470, %cst_514 {dimension_numbers = #tpu.dot_dimension_numbers<[1], [0], [0], [1], [0, 0, 1, 1], [], []>} : vector<8x8xf32>, vector<8x128xf32>, vector<8x128xf32> -> vector<8x128xf32>
    %1472 = arith.addf %1446, %1471 : vector<8x128xf32>
    %1473 = vector.extract_strided_slice %25 {offsets = [2, 1, 0, 0], sizes = [1, 1, 8, 8], strides = [1, 1, 1, 1]} : vector<3x3x8x8xf32> to vector<1x1x8x8xf32>
    %1474 = vector.shape_cast %1473 : vector<1x1x8x8xf32> to vector<8x8xf32>
    %1475 = vector.extract_strided_slice %1294 {offsets = [0, 8], sizes = [8, 120], strides = [1, 1]} : vector<8x128xf32> to vector<8x120xf32>
    %1476 = vector.extract_strided_slice %1294 {offsets = [0, 0], sizes = [8, 8], strides = [1, 1]} : vector<8x128xf32> to vector<8x8xf32>
    %1477 = tpu.concatenate %1475, %1476 in 1 : vector<8x120xf32>, vector<8x8xf32> -> vector<8x128xf32>
    %c1_i32_515 = arith.constant 1 : i32
    %1478 = vector.broadcast %c1_i32_515 : i32 to vector<1x128xi32>
    %1479 = arith.addi %28, %1478 : vector<1x128xi32>
    %c0_i32_516 = arith.constant 0 : i32
    %1480 = vector.broadcast %c0_i32_516 : i32 to vector<1x128xi32>
    %1481 = arith.addi %29, %1480 : vector<1x128xi32>
    %c0_i32_517 = arith.constant 0 : i32
    %1482 = vector.broadcast %c0_i32_517 : i32 to vector<1x128xi32>
    %1483 = arith.cmpi sge, %1479, %1482 : vector<1x128xi32>
    %c8_i32_518 = arith.constant 8 : i32
    %1484 = vector.broadcast %c8_i32_518 : i32 to vector<1x128xi32>
    %1485 = arith.cmpi slt, %1479, %1484 : vector<1x128xi32>
    %1486 = arith.andi %1483, %1485 : vector<1x128xi1>
    %c0_i32_519 = arith.constant 0 : i32
    %1487 = vector.broadcast %c0_i32_519 : i32 to vector<1x128xi32>
    %1488 = arith.cmpi sge, %1481, %1487 : vector<1x128xi32>
    %1489 = arith.andi %1486, %1488 : vector<1x128xi1>
    %c8_i32_520 = arith.constant 8 : i32
    %1490 = vector.broadcast %c8_i32_520 : i32 to vector<1x128xi32>
    %1491 = arith.cmpi slt, %1481, %1490 : vector<1x128xi32>
    %1492 = arith.andi %1489, %1491 : vector<1x128xi1>
    %cst_521 = arith.constant 0.000000e+00 : f32
    %1493 = vector.shape_cast %1492 : vector<1x128xi1> to vector<1x128xi1>
    %1494 = vector.broadcast %1493 : vector<1x128xi1> to vector<8x128xi1>
    %1495 = vector.broadcast %cst_521 : f32 to vector<8x128xf32>
    %1496 = arith.select %1494, %1477, %1495 : vector<8x128xi1>, vector<8x128xf32>
    %cst_522 = arith.constant dense<0.000000e+00> : vector<8x128xf32>
    %1497 = tpu.matmul %1474, %1496, %cst_522 {dimension_numbers = #tpu.dot_dimension_numbers<[1], [0], [0], [1], [0, 0, 1, 1], [], []>} : vector<8x8xf32>, vector<8x128xf32>, vector<8x128xf32> -> vector<8x128xf32>
    %1498 = arith.addf %1472, %1497 : vector<8x128xf32>
    %1499 = vector.extract_strided_slice %25 {offsets = [2, 2, 0, 0], sizes = [1, 1, 8, 8], strides = [1, 1, 1, 1]} : vector<3x3x8x8xf32> to vector<1x1x8x8xf32>
    %1500 = vector.shape_cast %1499 : vector<1x1x8x8xf32> to vector<8x8xf32>
    %1501 = vector.extract_strided_slice %1294 {offsets = [0, 9], sizes = [8, 119], strides = [1, 1]} : vector<8x128xf32> to vector<8x119xf32>
    %1502 = vector.extract_strided_slice %1294 {offsets = [0, 0], sizes = [8, 9], strides = [1, 1]} : vector<8x128xf32> to vector<8x9xf32>
    %1503 = tpu.concatenate %1501, %1502 in 1 : vector<8x119xf32>, vector<8x9xf32> -> vector<8x128xf32>
    %c1_i32_523 = arith.constant 1 : i32
    %1504 = vector.broadcast %c1_i32_523 : i32 to vector<1x128xi32>
    %1505 = arith.addi %28, %1504 : vector<1x128xi32>
    %c1_i32_524 = arith.constant 1 : i32
    %1506 = vector.broadcast %c1_i32_524 : i32 to vector<1x128xi32>
    %1507 = arith.addi %29, %1506 : vector<1x128xi32>
    %c0_i32_525 = arith.constant 0 : i32
    %1508 = vector.broadcast %c0_i32_525 : i32 to vector<1x128xi32>
    %1509 = arith.cmpi sge, %1505, %1508 : vector<1x128xi32>
    %c8_i32_526 = arith.constant 8 : i32
    %1510 = vector.broadcast %c8_i32_526 : i32 to vector<1x128xi32>
    %1511 = arith.cmpi slt, %1505, %1510 : vector<1x128xi32>
    %1512 = arith.andi %1509, %1511 : vector<1x128xi1>
    %c0_i32_527 = arith.constant 0 : i32
    %1513 = vector.broadcast %c0_i32_527 : i32 to vector<1x128xi32>
    %1514 = arith.cmpi sge, %1507, %1513 : vector<1x128xi32>
    %1515 = arith.andi %1512, %1514 : vector<1x128xi1>
    %c8_i32_528 = arith.constant 8 : i32
    %1516 = vector.broadcast %c8_i32_528 : i32 to vector<1x128xi32>
    %1517 = arith.cmpi slt, %1507, %1516 : vector<1x128xi32>
    %1518 = arith.andi %1515, %1517 : vector<1x128xi1>
    %cst_529 = arith.constant 0.000000e+00 : f32
    %1519 = vector.shape_cast %1518 : vector<1x128xi1> to vector<1x128xi1>
    %1520 = vector.broadcast %1519 : vector<1x128xi1> to vector<8x128xi1>
    %1521 = vector.broadcast %cst_529 : f32 to vector<8x128xf32>
    %1522 = arith.select %1520, %1503, %1521 : vector<8x128xi1>, vector<8x128xf32>
    %cst_530 = arith.constant dense<0.000000e+00> : vector<8x128xf32>
    %1523 = tpu.matmul %1500, %1522, %cst_530 {dimension_numbers = #tpu.dot_dimension_numbers<[1], [0], [0], [1], [0, 0, 1, 1], [], []>} : vector<8x8xf32>, vector<8x128xf32>, vector<8x128xf32> -> vector<8x128xf32>
    %1524 = arith.addf %1498, %1523 : vector<8x128xf32>
    %1525 = vector.broadcast %23 : vector<8x1xf32> to vector<8x128xf32>
    %1526 = arith.addf %1524, %1525 : vector<8x128xf32>
    %cst_531 = arith.constant 0.000000e+00 : f32
    %1527 = vector.broadcast %cst_531 : f32 to vector<8x128xf32>
    %1528 = arith.maximumf %1526, %1527 : vector<8x128xf32>
    %cst_532 = arith.constant dense<0.000000e+00> : vector<32x128xf32>
    %1529 = tpu.matmul %26, %1528, %cst_532 {dimension_numbers = #tpu.dot_dimension_numbers<[1], [0], [0], [1], [0, 0, 1, 1], [], []>} : vector<32x8xf32>, vector<8x128xf32>, vector<32x128xf32> -> vector<32x128xf32>
    %1530 = arith.addf %1289, %1529 : vector<32x128xf32>
    %cst_533 = arith.constant 0.000000e+00 : f32
    %1531 = vector.broadcast %cst_533 : f32 to vector<32x128xf32>
    %1532 = arith.cmpf oge, %1530, %1531 : vector<32x128xf32>
    %cst_534 = arith.constant 2.500000e-01 : f32
    %1533 = vector.broadcast %cst_534 : f32 to vector<32x128xf32>
    %1534 = arith.mulf %1533, %1530 : vector<32x128xf32>
    %1535 = arith.select %1532, %1530, %1534 : vector<32x128xi1>, vector<32x128xf32>
    %c0_535 = arith.constant 0 : index
    %c0_536 = arith.constant 0 : index
    %1536 = vector.load %arg31[%c0_535, %c0_536] : memref<32x128xf32, #tpu.memory_space<vmem>>, vector<32x128xf32>
    tpu.vector_store %arg31[%c0_535, %c0_536], %1535 {strides = array<i32>} : memref<32x128xf32, #tpu.memory_space<vmem>>, vector<32x128xf32>,
    return
  }
}

</mosaic_0001>

<bundles_post_ra>
// kernel: bottleneck1_forward.1
= control target key start
LH: loop header
LB: loop body
LE: loop exit
PB: predicated region body
PF: predicated region fallthrough
CT: control target
= control target key end

     0   :  { %v6528_v0 = vmov 0.0|0.0   ;;  %v6529_v1 = vmov 0   ;;  %vm7530_vm0 = vmmov 0   ;;  %v6531_v2 = vmov 0.0   ;;  %s6532_s6 = smov 8   ;;  %s6533_s7 = smov 9   ;;  %s7528_s0 = inlined_call_operand.smem [shape: u32[33], index: -1, kind: input, shape index: {}] }
   0x1   :  { %s6576_s5 = sld [smem:[%s7528_s0]]   ;;  %6397 = vmatprep.subr.bf16.mxu0 %v6528_v0  ;;  %6401 = vmatprep.subr.bf16.mxu1 %v6528_v0  ;;  %s6534_s8 = smov 1   ;;  %v258_v18 = vlaneseq  ;;  %v7547_v47 = vmov 0  ;;  %v7549_v51 = vmov 0 }
   0x2   :  { %6526 = vset.pattern.permute.xlu1 %v6529_v1  ;;  %6527 = vset.pattern.permute.xlu0 %v6529_v1  ;;  %s6535_s9 = smov 4   ;;  %s5669_s15 = sld [smem:[%s7528_s0 + %s6534_s8]]  }
   0x3   :  { %6019 = vmatprep.mubr.msk.f32.mxu0 %vm7530_vm0, %v6531_v2  ;;  %6026 = vmatprep.mubr.msk.f32.mxu1 %vm7530_vm0, %v6531_v2  ;;  %s5672_s12 = sld [smem:[%s7528_s0 + %s6535_s9]]   ;;  %s6536_s16 = smov 2   ;;  %v259_v19 = vshrl.u32 %v258_v18, 7 }
   0x4   :  { %s5670_s19 = sld [smem:[%s7528_s0 + %s6536_s16]]   ;;  %s6537_s20 = smov 7  }
   0x5   :  { %v6657_v21 = vsub.s32 0, %v259_v19  ;;  %s6678_s23 = sld [smem:[%s7528_s0 + %s6537_s20]]   ;;  %s6538_s24 = smov 6  }
   0x6   :  { %s6851_s27 = sld [smem:[%s7528_s0 + %s6538_s24]]   ;;  %s6539_s28 = smov 3  }
   0x7   :  { %v6587_v3 = vld [vmem:[%s6576_s5 + $0x20] sm:$0xff]  ;;  %v6590_v4 = vld [vmem:[%s6576_s5 + $0x28] sm:$0xff]  ;;  %v6593_v5 = vld [vmem:[%s6576_s5 + $0x30] sm:$0xff]  ;;  %s5671_s1 = sld [smem:[%s7528_s0 + %s6539_s28]]   ;;  %s6540_s2 = smov 121  }
   0x8   :  { %v6501_v6 = vpack.i.bf16 %v6590_v4, %v6587_v3  ;;  %v6598_v7 = vld [vmem:[%s6576_s5 + $0x38] sm:$0xff]  ;;  %v6601_v8 = vld [vmem:[%s6576_s5 + $0x10] sm:$0xff]  ;;  %v6625_v13 = vld [vmem:[%s5669_s15] sm:$0x1]  ;;  %s6541_s3 = smov 127   ;;  %s6542_s4 = smov 119  }
   0x9   :  { %v6604_v9 = vld [vmem:[%s6576_s5 + $0x18] sm:$0xff]  ;;  %v6511_v10 = vpack.i.bf16 %v6598_v7, %v6593_v5  ;;  %v133_v12 = vld [vmem:[%s5672_s12] sm:$0xf]  ;;  %v248_v14 = vadd.s32 4294967295, %v6625_v13  ;;  %vm523_vm8 = vcmp.ge.s32.totalorder %v6625_v13, 0  ;;  %vm524_vm9 = vcmp.lt.s32.totalorder %v6625_v13, 8  ;;  %s6906_s24 = sld [smem:[%s7528_s0 + %s6532_s6]]  }
   0xa   :  { %6502 = vrot.lane.b32.xlu0 %v6501_v6, %s6532_s6  ;;  %v6516_v11 = vpack.i.bf16 %v6604_v9, %v6601_v8  ;;  %v6628_v15 = vld [vmem:[%s5670_s19] sm:$0x1]  ;;  %vm6653_vm13 = vmand %vm523_vm8, %vm524_vm9  ;;  %v6716_v49 = vld [vmem:[%s6576_s5 + $0x8] sm:$0xff]  ;;  %v6418_v63 = vpack.c.bf16 %v6604_v9, %v6601_v8  ;;  %v6426_v6 = vpack.c.bf16 %v6590_v4, %v6587_v3  ;;  %s6544_s9 = smov 32   ;;  %s6545_s13 = smov 5  }
   0xb   :  { %6512 = vrot.lane.b32.xlu1 %v6511_v10, %s6532_s6  ;;  %vm250_vm1 = vcmp.ge.s32.totalorder %v248_v14, 0  ;;  %vm251_vm2 = vcmp.lt.s32.totalorder %v248_v14, 8  ;;  %vm7533_vm4 = vcmp.ge.s32.totalorder %v6628_v15, 0  ;;  %v6636_v17 = vadd.s32 4294967295, %v6628_v15  ;;  %v140_v44 = vld [vmem:[%s6678_s23 + $0x4] sm:$0xf]  ;;  %s5700_s12 = sld [smem:[%s7528_s0 + %s6544_s9]]  }
   0xc   :  { %vm6630_vm3 = vmand %vm250_vm1, %vm251_vm2  ;;  %vm7532_vm6 = vcmp.lt.s32.totalorder %v6628_v15, 8  ;;  %v6713_v48 = vld [vmem:[%s6576_s5] sm:$0xff]  ;;  %v141_v57 = vld [vmem:[%s6678_s23 + $0x8] sm:$0xf]  ;;  %s6543_s5 = smov 120   ;;  %s5673_s16 = sld [smem:[%s7528_s0 + %s6545_s13]]  }
   0xd   :  { %vm275_vm5 = vmand %vm6630_vm3, %vm7533_vm4  ;;  %vm253_vm7 = vcmp.ge.s32.totalorder %v6636_v17, 0  ;;  %vm7534_vm12 = vcmp.lt.s32.totalorder %v6636_v17, 8  ;;  %v139_v54 = vld [vmem:[%s6678_s23] sm:$0xf]  ;;  %v6414_v58 = vpack.c.bf16 %v6716_v49, %v6713_v48  ;;  %v142_v61 = vld [vmem:[%s6678_s23 + $0xc] sm:$0xf] }
   0xe   :  { %6507 = vrot.lane.b32.xlu0 %v6511_v10, %s6533_s7  ;;  %vm277_vm10 = vmand %vm275_vm5, %vm7532_vm6  ;;  %v143_v62 = vld [vmem:[%s6678_s23 + $0x10] sm:$0xf]  ;;  %v146_v14 = vld [vmem:[%s6678_s23 + $0x1c] sm:$0xf]  ;;  %s6546_s17 = smov 11   ;;  %s6547_s25 = smov 10  }
   0xf   :  { %6517 = vrot.lane.b32.xlu1 %v6516_v11, %s6534_s8  ;;  %vm254_vm11 = vmand %vm6630_vm3, %vm253_vm7  ;;  %v278_v22 = vsel %vm277_vm10, 1, %v6529_v1  ;;  %v145_v11 = vld [vmem:[%s6678_s23 + $0x18] sm:$0xf]  ;;  %v147_v18 = vld [vmem:[%s6678_s23 + $0x20] sm:$0xf]  ;;  %s5679_s21 = sld [smem:[%s7528_s0 + %s6546_s17]]   ;;  %s6548_s9 = smov 13  }
  0x10   :  { %vm256_vm14 = vmand %vm254_vm11, %vm7534_vm12  ;;  %v282_v23 = vrot.slane %v278_v22, %v6657_v21  ;;  %vm7529_vm11 = vcmask 130048   ;;  %s6989_s28 = sld [smem:[%s7528_s0 + %s6547_s25]]   ;;  %s6549_s13 = smov 16  }
  0x11   :  { %vm526_vm15 = vmand %vm6653_vm13, %vm253_vm7  ;;  %v257_v24 = vsel %vm256_vm14, 1, %v6529_v1  ;;  %s6550_s17 = smov 12   ;;  %s6551_s22 = smov 14  }
  0x12   :  { %6522 = vrot.lane.b32.xlu0 %v6511_v10, %s6534_s8  ;;  %vm610_vm1 = vmand %vm6653_vm13, %vm7533_vm4  ;;  %vm6682_vm8 = vcmp.eq.s32.totalorder %v282_v23, 1  ;;  %v261_v26 = vrot.slane %v257_v24, %v6657_v21  ;;  %v144_v10 = vld [vmem:[%s6678_s23 + $0x14] sm:$0xf]  ;;  %s7095_s25 = sld [smem:[%s7528_s0 + %s6551_s22]]   ;;  %s6552_s26 = smov 15  }
  0x13   :  { %1006 = vperm.xlu1 %6526, %v133_v12   ;;  %vm527_vm2 = vmand %vm526_vm15, %vm7534_vm12  ;;  %v6430_v12 = vpack.c.bf16 %v6598_v7, %v6593_v5  ;;  %s7160_s29 = sld [smem:[%s7528_s0 + %s6552_s26]]   ;;  %s6553_s30 = smov 18  }
  0x14   :  { %vm611_vm5 = vmand %vm610_vm1, %vm7532_vm6  ;;  %v528_v27 = vsel %vm527_vm2, 1, %v6529_v1  ;;  %vm6693_vm10 = vcmp.eq.s32.totalorder %v261_v26, 1  ;;  %s5686_s10 = sld [smem:[%s7528_s0 + %s6553_s30]]   ;;  %s6554_s11 = smov 21  }
  0x15   :  { %v612_v29 = vsel %vm611_vm5, 1, %v6529_v1  ;;  %vm6399_vm9 = vmpackc.low %vm6682_vm8, %vm6682_vm8  ;;  %v532_v35 = vrot.slane %v528_v27, %v6657_v21  ;;  %s5689_s14 = sld [smem:[%s7528_s0 + %s6554_s11]]   ;;  %s6555_s15 = smov 17  }
  0x16   :  { %v616_v38 = vrot.slane %v612_v29, %v6657_v21  ;;  %vm6403_vm14 = vmpackc.low %vm6693_vm10, %vm6693_vm10  ;;  %s5685_s18 = sld [smem:[%s7528_s0 + %s6555_s15]]   ;;  %s6556_s19 = smov 19  }
  0x17   :  { %vm6708_vm15 = vcmp.eq.s32.totalorder %v532_v35, 1  ;;  %s7214_s23 = sld [smem:[%s7528_s0 + %s6556_s19]]   ;;  %s6562_s22 = smov 25  }
  0x18   :  { %v7548_v47 = vsel %vm6708_vm15, 4294967295, %v7547_v47  ;;  %vm6718_vm1 = vcmp.eq.s32.totalorder %v616_v38, 1  ;;  %vm6411_vm2 = vmpackc.low %vm6708_vm15, %vm6708_vm15  ;;  %vm1024_vm15 = vcmask 1043456   ;;  %s6563_s26 = smov 28   ;;  %s6564_s30 = smov 27  }
  0x19   :  { %v7550_v51 = vsel %vm6718_vm1, 4294967295, %v7549_v51  ;;  %vm6741_vm5 = vmpackc.low %vm6718_vm1, %vm6718_vm1  ;;  %s6567_s11 = smov 31  }
  0x7c   :  { %v6503_v28 = vpop.permute.xlu0 %6502 }
  0x7d   :  { %v6505_v30 = vunpack.i.h.bf16 %v6503_v28  ;;  %v6504_v31 = vunpack.i.l.bf16 %v6503_v28  ;;  %v6513_v32 = vpop.permute.xlu1 %6512 }
  0x7e   :  { %v6515_v33 = vunpack.i.h.bf16 %v6513_v32  ;;  %v6514_v34 = vunpack.i.l.bf16 %v6513_v32 }
  0x7f   :  { %v6398_v36 = vpack.c.bf16 %v6505_v30, %v6504_v31 }
  0x80   :  { %v6508_v39 = vpop.permute.xlu0 %6507  ;;  %v6406_v40 = vpack.c.bf16 %v6515_v33, %v6514_v34 }
  0x81   :  { %v6510_v41 = vunpack.i.h.bf16 %v6508_v39  ;;  %v6509_v42 = vunpack.i.l.bf16 %v6508_v39  ;;  %6400 = vmatpush3.bf16.msk.msra.mxu0 %vm6399_vm9, %v6398_v36  ;;  %v6518_v43 = vpop.permute.xlu1 %6517 }
  0x82   :  { %6405 = vmatprep.subr.bf16.mxu0 %v6528_v0  ;;  %v6520_v45 = vunpack.i.h.bf16 %v6518_v43  ;;  %v6519_v46 = vunpack.i.l.bf16 %v6518_v43 }
  0x83   :  { %v6402_v50 = vpack.c.bf16 %v6510_v41, %v6509_v42 }
  0x84   :  { %6020 = vmatmul.mubr.msk.f32.vlgmr.msra.gmra.mrb[0].mxu0 %vm7529_vm11, %v140_v44  ;;  %v6523_v52 = vpop.permute.xlu0 %6522  ;;  %v6410_v53 = vpack.c.bf16 %v6520_v45, %v6519_v46 }
  0x85   :  { %6404 = vmatpush3.bf16.msk.msra.mxu1 %vm6403_vm14, %v6402_v50  ;;  %6408 = vmatpush3.bf16.msk.msra.mxu0 %vm6399_vm9, %v6406_v40  ;;  %v6525_v55 = vunpack.i.h.bf16 %v6523_v52  ;;  %v6524_v56 = vunpack.i.l.bf16 %v6523_v52  ;;  %vm1896_vm9 = vcmp.gt.f32.partialorder %v6601_v8, %v6713_v48  ;;  %vm1897_vm14 = vcmp.gt.f32.partialorder %v6604_v9, %v6716_v49 }
  0x86   :  { %6033 = vmatprep.mubr.msk.f32.mxu0 %vm7530_vm0, %v6531_v2  ;;  %6409 = vmatprep.subr.bf16.mxu1 %v6528_v0 }
  0x87   :  { %6413 = vmatprep.subr.bf16.mxu0 %v6528_v0  ;;  %v6422_v60 = vpack.c.bf16 %v6525_v55, %v6524_v56  ;;  %v1898_v56 = vsel %vm1896_vm9, %v6601_v8, %v6713_v48  ;;  %v138_v8 = vld [vmem:[%s6851_s27 + $0x18] sm:$0xff] }
  0x88   :  { %6027 = vmatmul.mubr.msk.f32.vlgmr.msra.gmra.mrb[0].mxu1 %vm7529_vm11, %v139_v54  ;;  %6034 = vmatmul.mubr.msk.f32.vlgmr.msra.gmra.mrb[2].mxu0 %vm7529_vm11, %v141_v57  ;;  %v1899_v57 = vsel %vm1897_vm14, %v6604_v9, %v6716_v49  ;;  %v1517_v9 = vadd.s32 1, %v6625_v13 }
  0x89   :  { %6412 = vmatpush3.bf16.msk.msra.mxu1 %vm6411_vm2, %v6410_v53  ;;  %6416 = vmatpush3.bf16.msk.msra.mxu0 %vm6741_vm5, %v6414_v58 }
  0x8a   :  { %6040 = vmatprep.mubr.msk.f32.mxu1 %vm7530_vm0, %v6531_v2  ;;  %6047 = vmatprep.mubr.msk.f32.mxu0 %vm7530_vm0, %v6531_v2 }
  0x8b   :  { %6417 = vmatprep.subr.bf16.mxu1 %v6528_v0  ;;  %6421 = vmatprep.subr.bf16.mxu0 %v6528_v0 }
  0x8c   :  { %6041 = vmatmul.mubr.msk.f32.vlgmr.msra.gmra.mrb[2].mxu1 %vm7529_vm11, %v142_v61  ;;  %6048 = vmatmul.mubr.msk.f32.vlgmr.msra.gmra.mrb[4].mxu0 %vm7529_vm11, %v143_v62 }
  0x8d   :  { %6420 = vmatpush3.bf16.msk.msra.mxu1 %vm6741_vm5, %v6418_v63  ;;  %6424 = vmatpush3.bf16.msk.msra.mxu0 %vm6411_vm2, %v6422_v60  ;;  %vm1907_vm2 = vcmp.gt.f32.partialorder %v6587_v3, %v1898_v56  ;;  %v239_v63 = vld [vmem:[%s5671_s1] sm:$0x1]  ;;  %s7043_s1 = sld [smem:[%s7528_s0 + %s6533_s7]]  }
  0x8e   :  { %6054 = vmatprep.mubr.msk.f32.mxu1 %vm7530_vm0, %v6531_v2  ;;  %6061 = vmatprep.mubr.msk.f32.mxu0 %vm7530_vm0, %v6531_v2  ;;  %v1909_v58 = vsel %vm1907_vm2, %v6587_v3, %v1898_v56  ;;  %v134_v3 = vld [vmem:[%s5673_s16] sm:$0xf]  ;;  %s5684_s16 = sld [smem:[%s7528_s0 + %s6549_s13]]   ;;  %s6560_s13 = smov 22  }
  0x8f   :  { %6425 = vmatprep.subr.bf16.mxu1 %v6528_v0  ;;  %6429 = vmatprep.subr.bf16.mxu0 %v6528_v0 }
  0x90   :  { %6055 = vmatmul.mubr.msk.f32.vlgmr.msra.gmra.mrb[4].mxu1 %vm7529_vm11, %v144_v10  ;;  %6062 = vmatmul.mubr.msk.f32.vlgmr.msra.gmra.mrb[6].mxu0 %vm7529_vm11, %v145_v11  ;;  %v1895_v10 = vrot.slane %v239_v63, %v6657_v21  ;;  %v1900_v11 = vadd.s32 1, %v239_v63 }
  0x91   :  { %6428 = vmatpush3.bf16.msk.msra.mxu1 %vm6741_vm5, %v6426_v6  ;;  %6432 = vmatpush3.bf16.msk.msra.mxu0 %vm6741_vm5, %v6430_v12  ;;  %vm1908_vm5 = vcmp.gt.f32.partialorder %v6590_v4, %v1899_v57  ;;  %v135_v6 = vld [vmem:[%s6851_s27] sm:$0xff]  ;;  %v1911_v12 = vadd.s32 16, %v239_v63 }
  0x92   :  { %6068 = vmatprep.mubr.msk.f32.mxu1 %vm7530_vm0, %v6531_v2  ;;  %6075 = vmatprep.mubr.msk.f32.mxu0 %vm7530_vm0, %v6531_v2  ;;  %v1007_v52 = vpop.permute.xlu1 %1006  ;;  %v1910_v59 = vsel %vm1908_vm5, %v6590_v4, %v1899_v57  ;;  %v137_v4 = vld [vmem:[%s6851_s27 + $0x10] sm:$0xff] }
  0x93   :  { %6078 = vmatprep.subr.mxu1 %v6531_v2  ;;  %6083 = vmatprep.subr.mxu0 %v6531_v2 }
  0x94   :  { %6069 = vmatmul.mubr.msk.f32.vlgmr.msra.gmra.mrb[6].mxu1 %vm7529_vm11, %v146_v14  ;;  %6076 = vmatmul.mubr.msk.f32.vlgmr.msra.gmra.mrb[8].mxu0 %vm7529_vm11, %v147_v18  ;;  %vm1918_vm11 = vcmp.gt.f32.partialorder %v6593_v5, %v1909_v58  ;;  %v1922_v14 = vadd.s32 17, %v239_v63  ;;  %v1904_v18 = vrot.slane %v1900_v11, %v6657_v21 }
  0x95   :  { %6080 = vmatprep.mubr.msk.f32.mxu1 %vm7530_vm0, %v6531_v2  ;;  %6085 = vmatprep.mubr.msk.f32.mxu0 %vm7530_vm0, %v6531_v2  ;;  %vm1919_vm0 = vcmp.gt.f32.partialorder %v6598_v7, %v1910_v59  ;;  %v1920_v60 = vsel %vm1918_vm11, %v6593_v5, %v1909_v58  ;;  %v165_v5 = vld [vmem:[%s5679_s21] sm:$0xff]  ;;  %v152_v58 = vld [vmem:[%s6906_s24 + $0x10] sm:$0xf]  ;;  %s5680_s21 = sld [smem:[%s7528_s0 + %s6550_s17]]   ;;  %s6561_s17 = smov 24  }
  0x96   :  { %v1921_v61 = vsel %vm1919_vm0, %v6598_v7, %v1910_v59  ;;  %v1177_v7 = vadd.s32 1, %v6628_v15 }
  0x97   :  { %v6846_v62 = vpack.c.bf16 %v1921_v61, %v1920_v60 }
 0x157   :  { %v356_v19 = vpop.f32.mrb[0].mxu0 }
 0x158   :  { %v6021_v22 = vpop.f32.mrb[1].mxu0 }
 0x159   :  { %v1926_v22 = vrot.slane %v1922_v14, %v6657_v21  ;;  %v155_v14 = vld [vmem:[%s6906_s24 + $0x1c] sm:$0xf] }
 0x15b   :  { %v429_v23 = vpop.f32.mrb[0].mxu1  ;;  %v510_v24 = vpop.f32.mrb[2].mxu0 }
 0x15c   :  { %v430_v26 = vadd.f32 %v429_v23, %v356_v19  ;;  %v6028_v27 = vpop.f32.mrb[1].mxu1  ;;  %v6035_v28 = vpop.f32.mrb[3].mxu0  ;;  %v1915_v19 = vrot.slane %v1911_v12, %v6657_v21  ;;  %v136_v23 = vld [vmem:[%s6851_s27 + $0x8] sm:$0xff] }
 0x15e   :  { %v514_v29 = vadd.f32 %v510_v24, %v430_v26  ;;  %v1905_v24 = vsel %vm1896_vm9, %v1904_v18, %v1895_v10  ;;  %v1906_v26 = vsel %vm1897_vm14, %v1904_v18, %v1895_v10  ;;  %vm1519_vm9 = vcmp.lt.s32.totalorder %v1517_v9, 8  ;;  %v154_v10 = vld [vmem:[%s6906_s24 + $0x18] sm:$0xf]  ;;  %v156_v18 = vld [vmem:[%s6906_s24 + $0x20] sm:$0xf] }
 0x15f   :  { %v605_v30 = vpop.f32.mrb[2].mxu1  ;;  %v689_v31 = vpop.f32.mrb[4].mxu0  ;;  %v1916_v27 = vsel %vm1907_vm2, %v1915_v19, %v1905_v24  ;;  %v1917_v28 = vsel %vm1908_vm5, %v1915_v19, %v1906_v26  ;;  %vm1180_vm2 = vcmp.lt.s32.totalorder %v1177_v7, 8  ;;  %v161_v19 = vld [vmem:[%s6989_s28] sm:$0xff]  ;;  %v164_v24 = vld [vmem:[%s6989_s28 + $0x18] sm:$0xff] }
 0x160   :  { %v609_v32 = vadd.f32 %v605_v30, %v514_v29  ;;  %v6042_v33 = vpop.f32.mrb[3].mxu1  ;;  %v6049_v34 = vpop.f32.mrb[5].mxu0  ;;  %v1927_v29 = vsel %vm1918_vm11, %v1926_v22, %v1916_v27  ;;  %v1928_v30 = vsel %vm1919_vm0, %v1926_v22, %v1917_v28  ;;  %vm1178_vm0 = vcmp.ge.s32.totalorder %v1177_v7, 0  ;;  %v162_v22 = vld [vmem:[%s6989_s28 + $0x8] sm:$0xff] }
 0x161   :  { %1929 = vst [vmem:[%s5700_s12] sm:$0xff] %v1927_v29  ;;  %1930 = vst [vmem:[%s5700_s12 + $0x8] sm:$0xff] %v1928_v30  ;;  %vm1518_vm11 = vcmp.ge.s32.totalorder %v1517_v9, 0  ;;  %v148_v33 = vld [vmem:[%s6906_s24] sm:$0xf]  ;;  %s5681_s12 = sld [smem:[%s7528_s0 + %s6548_s9]]   ;;  %s6559_s9 = smov 26  }
 0x162   :  { %v693_v35 = vadd.f32 %v689_v31, %v609_v32  ;;  %vm1179_vm14 = vmand %vm6630_vm3, %vm1178_vm0  ;;  %vm7553_vm3 = vcmp.lt.s32.totalorder %v6636_v17, 8  ;;  %v149_v32 = vld [vmem:[%s6906_s24 + $0x4] sm:$0xf] }
 0x163   :  { %v765_v36 = vpop.f32.mrb[4].mxu1  ;;  %v847_v38 = vpop.f32.mrb[6].mxu0  ;;  %vm1520_vm5 = vmand %vm1518_vm11, %vm1519_vm9 }
 0x164   :  { %v769_v39 = vadd.f32 %v765_v36, %v693_v35  ;;  %v6056_v40 = vpop.f32.mrb[5].mxu1  ;;  %v6063_v41 = vpop.f32.mrb[7].mxu0  ;;  %vm1181_vm6 = vmand %vm1179_vm14, %vm1180_vm2 }
 0x165   :  { %vm1521_vm4 = vmand %vm1520_vm5, %vm253_vm7  ;;  %v1182_v13 = vsel %vm1181_vm6, 1, %v6529_v1  ;;  %vm7554_vm7 = vcmp.ge.s32.totalorder %v6628_v15, 0  ;;  %vm7557_vm6 = vcmp.lt.s32.totalorder %v6628_v15, 8 }
 0x166   :  { %v851_v42 = vadd.f32 %v847_v38, %v769_v39  ;;  %vm1428_vm12 = vmand %vm6653_vm13, %vm1178_vm0  ;;  %v1186_v16 = vrot.slane %v1182_v13, %v6657_v21 }
 0x167   :  { %v923_v43 = vpop.f32.mrb[6].mxu1  ;;  %v999_v44 = vpop.f32.mrb[8].mxu0  ;;  %vm1522_vm1 = vmand %vm1521_vm4, %vm7553_vm3  ;;  %vm1020_vm4 = vcmask 31744  }
 0x168   :  { %v927_v45 = vadd.f32 %v923_v43, %v851_v42  ;;  %v6070_v46 = vpop.f32.mrb[7].mxu1  ;;  %v6077_v50 = vpop.f32.mrb[9].mxu0  ;;  %vm1429_vm11 = vmand %vm1428_vm12, %vm1180_vm2  ;;  %v1523_v48 = vsel %vm1522_vm1, 1, %v6529_v1  ;;  %vm6934_vm1 = vcmp.eq.s32.totalorder %v1186_v16, 1  ;;  %v150_v43 = vld [vmem:[%s6906_s24 + $0x8] sm:$0xf] }
 0x169   :  { %vm1699_vm9 = vmand %vm1520_vm5, %vm1178_vm0  ;;  %v1430_v20 = vsel %vm1429_vm11, 1, %v6529_v1  ;;  %v1527_v38 = vrot.slane %v1523_v48, %v6657_v21  ;;  %vm7560_vm0 = vnez %v7548_v47  ;;  %vm7566_vm11 = vnez %v7550_v51 }
 0x16a   :  { %v1003_v53 = vadd.f32 %v999_v44, %v927_v45  ;;  %vm1610_vm14 = vmand %vm1520_vm5, %vm7554_vm7  ;;  %v1434_v15 = vrot.slane %v1430_v20, %v6657_v21 }
 0x16b   :  { %vm6920_vm13 = vmand %vm1699_vm9, %vm1180_vm2  ;;  %vm7561_vm2 = vmmov 0   ;;  %vm6960_vm5 = vcmp.eq.s32.totalorder %v1527_v38, 1 }
 0x16c   :  { %v1009_v54 = vadd.f32 %v1007_v52, %v1003_v53  ;;  %vm1611_vm12 = vmand %vm1610_vm14, %vm7557_vm6  ;;  %v1701_v39 = vsel %vm6920_vm13, 1, %v6529_v1  ;;  %vm6964_vm3 = vcmp.eq.s32.totalorder %v1434_v15, 1  ;;  %vm7571_vm14 = vcmask 130048  }
 0x16d   :  { %v1612_v40 = vsel %vm1611_vm12, 1, %v6529_v1  ;;  %v151_v1 = vld [vmem:[%s6906_s24 + $0xc] sm:$0xf]  ;;  %v1705_v52 = vrot.slane %v1701_v39, %v6657_v21  ;;  %vm7572_vm13 = vmmov %vm7571_vm14 }
 0x16e   :  { %v6806_v55 = vmax.f32 %v1009_v54, 0.0  ;;  %v1616_v53 = vrot.slane %v1612_v40, %v6657_v21  ;;  %vm7573_vm6 = vmmov %vm7572_vm13 }
 0x16f   :  { %vm6993_vm9 = vcmp.eq.s32.totalorder %v1705_v52, 1  ;;  %vm7574_vm12 = vmmov %vm7573_vm6  ;;  %v159_v52 = vld [vmem:[%s7043_s1 + $0x10] sm:$0xff] }
 0x170   :  { %1012 = vrot.lane.b32.xlu1 %v6806_v55, %s6533_s7  ;;  %1016 = vrot.lane.b32.xlu0 %v6806_v55, %s6532_s6  ;;  %v1347_v54 = vsel %vm7566_vm11, %v6806_v55, 0.0  ;;  %vm6997_vm7 = vcmp.eq.s32.totalorder %v1616_v53, 1 }
 0x174   :  { %1266 = vrot.lane.b32.xlu1 %v6806_v55, %s6534_s8  ;;  %1174 = vrot.lane.b32.xlu0 %v6806_v55, %s6537_s20 }
 0x178   :  { %1514 = vrot.lane.b32.xlu1 %v6806_v55, %s6540_s2  ;;  %1425 = vrot.lane.b32.xlu0 %v6806_v55, %s6541_s3 }
 0x17c   :  { %1696 = vrot.lane.b32.xlu1 %v6806_v55, %s6542_s4  ;;  %1607 = vrot.lane.b32.xlu0 %v6806_v55, %s6543_s5  ;;  %v153_v55 = vld [vmem:[%s6906_s24 + $0x14] sm:$0xf]  ;;  %s6557_s24 = smov 20  }
 0x17d   :  { %s7279_s27 = sld [smem:[%s7528_s0 + %s6557_s24]]  }
 0x180   :  { %1933 = vperm.xlu1 %6526, %v135_v6   ;;  %1787 = vperm.xlu0 %6527, %v134_v3  }
 0x184   :  { %1938 = vperm.xlu1 %6526, %v136_v23   ;;  %1943 = vperm.xlu0 %6527, %v137_v4   ;;  %v163_v23 = vld [vmem:[%s6989_s28 + $0x10] sm:$0xff]  ;;  %s6558_s28 = smov 23  }
 0x188   :  { %1948 = vperm.xlu1 %6526, %v138_v8   ;;  %2070 = vperm.xlu0 %6527, %v165_v5  }
 0x1e2   :  { %v1013_v17 = vpop.permute.xlu1 %1012  ;;  %v1017_v31 = vpop.permute.xlu0 %1016 }
 0x1e3   :  { %v1015_v34 = vsel %vm6693_vm10, %v1013_v17, 0.0  ;;  %v1019_v35 = vsel %vm6682_vm8, %v1017_v31, 0.0 }
 0x1e4   :  { %6079 = vmatpush3.msk.msra.mxu1 %vm1024_vm15, %v1019_v35  ;;  %6084 = vmatpush3.msk.msra.mxu0 %vm1024_vm15, %v1015_v34 }
 0x1e5   :  { %6081 = vmatmul.mubr.msk.f32.vlgmr.msra.gmra.mrb[8].mxu1 %vm1020_vm4, %v149_v32  ;;  %6086 = vmatmul.mubr.msk.f32.vlgmr.msra.gmra.mrb[10].mxu0 %vm1020_vm4, %v148_v33 }
 0x1e6   :  { %v1267_v41 = vpop.permute.xlu1 %1266  ;;  %v1175_v42 = vpop.permute.xlu0 %1174  ;;  %6088 = vmatprep.subr.mxu1 %v6531_v2  ;;  %6093 = vmatprep.subr.mxu0 %v6531_v2 }
 0x1e7   :  { %v1269_v44 = vsel %vm7560_vm0, %v1267_v41, 0.0  ;;  %v1188_v45 = vsel %vm6934_vm1, %v1175_v42, 0.0  ;;  %6090 = vmatprep.mubr.msk.f32.mxu1 %vm7561_vm2, %v6531_v2  ;;  %6095 = vmatprep.mubr.msk.f32.mxu0 %vm7561_vm2, %v6531_v2 }
 0x1e8   :  { %6089 = vmatpush3.msk.msra.mxu1 %vm1024_vm15, %v1188_v45  ;;  %6094 = vmatpush3.msk.msra.mxu0 %vm1024_vm15, %v1269_v44 }
 0x1e9   :  { %6091 = vmatmul.mubr.msk.f32.vlgmr.msra.gmra.mrb[10].mxu1 %vm1020_vm4, %v150_v43  ;;  %6098 = vmatprep.subr.mxu1 %v6531_v2 }
 0x1ea   :  { %6096 = vmatmul.mubr.msk.f32.vlgmr.msra.gmra.mrb[12].mxu0 %vm1020_vm4, %v151_v1  ;;  %v1515_v56 = vpop.permute.xlu1 %1514  ;;  %v1426_v57 = vpop.permute.xlu0 %1425  ;;  %6099 = vmatpush3.msk.msra.mxu1 %vm1024_vm15, %v1347_v54  ;;  %v158_v1 = vld [vmem:[%s7043_s1 + $0x8] sm:$0xff] }
 0x1eb   :  { %v1529_v59 = vsel %vm6960_vm5, %v1515_v56, 0.0  ;;  %v1436_v21 = vsel %vm6964_vm3, %v1426_v57, 0.0  ;;  %6103 = vmatprep.subr.mxu0 %v6531_v2  ;;  %6100 = vmatprep.mubr.msk.f32.mxu1 %vm7561_vm2, %v6531_v2  ;;  %v160_v56 = vld [vmem:[%s7043_s1 + $0x18] sm:$0xff] }
 0x1ec   :  { %6104 = vmatpush3.msk.msra.mxu0 %vm1024_vm15, %v1436_v21  ;;  %6108 = vmatprep.subr.mxu1 %v6531_v2 }
 0x1ed   :  { %6101 = vmatmul.mubr.msk.f32.vlgmr.msra.gmra.mrb[12].mxu1 %vm1020_vm4, %v152_v58  ;;  %6105 = vmatprep.mubr.msk.f32.mxu0 %vm7561_vm2, %v6531_v2 }
 0x1ee   :  { %6109 = vmatpush3.msk.msra.mxu1 %vm1024_vm15, %v1529_v59  ;;  %v1697_v63 = vpop.permute.xlu1 %1696  ;;  %6106 = vmatmul.mubr.msk.f32.vlgmr.msra.gmra.mrb[14].mxu0 %vm1020_vm4, %v153_v55  ;;  %v1608_v6 = vpop.permute.xlu0 %1607 }
 0x1ef   :  { %v1707_v11 = vsel %vm6993_vm9, %v1697_v63, 0.0  ;;  %v1618_v12 = vsel %vm6997_vm7, %v1608_v6, 0.0  ;;  %6113 = vmatprep.subr.mxu0 %v6531_v2  ;;  %6110 = vmatprep.mubr.msk.f32.mxu1 %vm7561_vm2, %v6531_v2 }
 0x1f0   :  { %6114 = vmatpush3.msk.msra.mxu0 %vm1024_vm15, %v1618_v12  ;;  %6118 = vmatprep.subr.mxu1 %v6531_v2 }
 0x1f1   :  { %6111 = vmatmul.mubr.msk.f32.vlgmr.msra.gmra.mrb[14].mxu1 %vm1020_vm4, %v154_v10  ;;  %6115 = vmatprep.mubr.msk.f32.mxu0 %vm7561_vm2, %v6531_v2 }
 0x1f2   :  { %6119 = vmatpush3.msk.msra.mxu1 %vm1024_vm15, %v1707_v11  ;;  %6116 = vmatmul.mubr.msk.f32.vlgmr.msra.gmra.mrb[16].mxu0 %vm1020_vm4, %v155_v14 }
 0x1f3   :  { %6120 = vmatprep.mubr.msk.f32.mxu1 %vm7561_vm2, %v6531_v2  ;;  %6434 = vmatprep.subr.bf16.mxu1 %v6846_v62 }
 0x1f5   :  { %6121 = vmatmul.mubr.msk.f32.vlgmr.msra.gmra.mrb[16].mxu1 %vm1020_vm4, %v156_v18 }
 0x1f6   :  { %6436 = vmatpush3.bf16.msra.mxu1 %v6846_v62  ;;  %6135 = vmatprep.mubr.msk.f32.mxu1 %vm7571_vm14, %v161_v19  ;;  %v157_v62 = vld [vmem:[%s7043_s1] sm:$0xff]  ;;  %s5691_s1 = sld [smem:[%s7528_s0 + %s6558_s28]]  }
 0x1f7   :  { %6152 = vmatprep.subr.mxu1 %v6531_v2  ;;  %6125 = vmatprep.mubr.msk.f32.mxu0 %vm1020_vm4, %v157_v62 }
 0x1f9   :  { %6136 = vmatmul.mubr.msk.f32.vlgmr.msra.gmra.mrb[18].mxu1 %vm7572_vm13, %v162_v22 }
 0x1fa   :  { %6138 = vmatprep.mubr.msk.f32.mxu1 %vm7573_vm6, %v163_v23  ;;  %vm2073_vm6 = vcmask 261120  }
 0x1fd   :  { %6139 = vmatmul.mubr.msk.f32.gmra.mrb[20].mxu1 %vm7574_vm12, %v164_v24  ;;  %vm273_vm12 = vcmask 64512  }
 0x1fe   :  { %6154 = vmatprep.mubr.msk.f32.mxu1 %vm7561_vm2, %v6531_v2 }
 0x1ff   :  { %v1788_v41 = vpop.permute.xlu0 %1787  ;;  %v1934_v57 = vpop.permute.xlu1 %1933 }
 0x203   :  { %v1939_v58 = vpop.permute.xlu1 %1938  ;;  %v1944_v63 = vpop.permute.xlu0 %1943 }
 0x207   :  { %v1949_v55 = vpop.permute.xlu1 %1948 }
 0x2b8   :  { %v1094_v26 = vpop.f32.mrb[8].mxu1  ;;  %v1170_v27 = vpop.f32.mrb[10].mxu0 }
 0x2b9   :  { %v1171_v28 = vadd.f32 %v1170_v27, %v1094_v26  ;;  %v6082_v29 = vpop.f32.mrb[9].mxu1  ;;  %v6087_v30 = vpop.f32.mrb[11].mxu0 }
 0x2bc   :  { %v1261_v8 = vpop.f32.mrb[10].mxu1 }
 0x2bd   :  { %v1265_v3 = vadd.f32 %v1261_v8, %v1171_v28  ;;  %v6092_v4 = vpop.f32.mrb[11].mxu1  ;;  %v1342_v5 = vpop.f32.mrb[12].mxu0 }
 0x2be   :  { %v6097_v7 = vpop.f32.mrb[13].mxu0 }
 0x2bf   :  { %v1346_v9 = vadd.f32 %v1342_v5, %v1265_v3 }
 0x2c0   :  { %v1420_v13 = vpop.f32.mrb[12].mxu1 }
 0x2c1   :  { %v1424_v16 = vadd.f32 %v1420_v13, %v1346_v9  ;;  %v6102_v48 = vpop.f32.mrb[13].mxu1  ;;  %v1509_v20 = vpop.f32.mrb[14].mxu0 }
 0x2c2   :  { %v6107_v49 = vpop.f32.mrb[15].mxu0  ;;  %v167_v48 = vld [vmem:[%s5681_s12] sm:$0xff]  ;;  %s5694_s12 = sld [smem:[%s7528_s0 + %s6559_s9]]  }
 0x2c3   :  { %v1513_v17 = vadd.f32 %v1509_v20, %v1424_v16  ;;  %v2071_v20 = vpop.permute.xlu0 %2070 }
 0x2c4   :  { %v1602_v31 = vpop.f32.mrb[14].mxu1 }
 0x2c5   :  { %v1606_v32 = vadd.f32 %v1602_v31, %v1513_v17  ;;  %v6112_v33 = vpop.f32.mrb[15].mxu1  ;;  %v1691_v34 = vpop.f32.mrb[16].mxu0 }
 0x2c6   :  { %v6117_v35 = vpop.f32.mrb[17].mxu0  ;;  %v181_v33 = vld [vmem:[%s5684_s16] sm:$0xff]  ;;  %s5690_s16 = sld [smem:[%s7528_s0 + %s6560_s13]]  }
 0x2c7   :  { %v1695_v38 = vadd.f32 %v1691_v34, %v1606_v32  ;;  %v166_v34 = vld [vmem:[%s5680_s21] sm:$0xff]  ;;  %v169_v35 = vld [vmem:[%s7095_s25 + $0x8] sm:$0xff]  ;;  %s7333_s21 = sld [smem:[%s7528_s0 + %s6561_s17]]  }
 0x2c8   :  { %v1780_v15 = vpop.f32.mrb[16].mxu1 }
 0x2c9   :  { %v1784_v39 = vadd.f32 %v1780_v15, %v1695_v38  ;;  %v6122_v40 = vpop.f32.mrb[17].mxu1  ;;  %v168_v38 = vld [vmem:[%s7095_s25] sm:$0xff] }
 0x2ca   :  { %v170_v40 = vld [vmem:[%s7095_s25 + $0x10] sm:$0xff] }
 0x2cb   :  { %v1790_v42 = vadd.f32 %v1788_v41, %v1784_v39 }
 0x2cc   :  { %v6137_v43 = vpop.f32.mrb[18].mxu1 }
 0x2cd   :  { %v1791_v44 = vmax.f32 %v1790_v42, 0.0  ;;  %v2029_v45 = vpop.f32.mrb[19].mxu1  ;;  %v2035_v59 = vadd.f32 %v6137_v43, %v1939_v58  ;;  %v171_v43 = vld [vmem:[%s7095_s25 + $0x18] sm:$0xff]  ;;  %v176_v58 = vld [vmem:[%s7095_s25 + $0x40] sm:$0xff] }
 0x2ce   :  { %v2030_v21 = vadd.f32 %v2029_v45, %v1934_v57  ;;  %v175_v57 = vld [vmem:[%s7095_s25 + $0x38] sm:$0xff] }
 0x2cf   :  { %6123 = vmatprep.subr.msk.mxu0 %vm1024_vm15, %v1791_v44  ;;  %v2049_v6 = vmax.f32 %v2035_v59, 0.0  ;;  %v177_v59 = vld [vmem:[%s7160_s29] sm:$0xff] }
 0x2d0   :  { %6124 = vmatpush3.msk.msra.mxu0 %vm1024_vm15, %v1791_v44  ;;  %v6140_v53 = vpop.f32.mrb[20].mxu1  ;;  %v2048_v11 = vmax.f32 %v2030_v21, 0.0  ;;  %v172_v44 = vld [vmem:[%s7095_s25 + $0x20] sm:$0xff] }
 0x2d1   :  { %6126 = vmatmul.mubr.msk.f32.vlgmr.msra.gmra.mrb[18].mxu0 %vm1020_vm4, %v158_v1  ;;  %v2039_v54 = vpop.f32.mrb[21].mxu1  ;;  %6437 = vmatprep.subr.bf16.mxu0 %v6528_v0  ;;  %v2045_v10 = vadd.f32 %v6140_v53, %v1949_v55  ;;  %v174_v53 = vld [vmem:[%s7095_s25 + $0x30] sm:$0xff] }
 0x2d2   :  { %6128 = vmatprep.mubr.msk.f32.mxu0 %vm1020_vm4, %v159_v52  ;;  %v2040_v12 = vadd.f32 %v2039_v54, %v1944_v63  ;;  %v173_v52 = vld [vmem:[%s7095_s25 + $0x28] sm:$0xff]  ;;  %s7398_s25 = sld [smem:[%s7528_s0 + %s6562_s22]]  }
 0x2d3   :  { %v2051_v23 = vmax.f32 %v2045_v10, 0.0 }
 0x2d4   :  { %v2050_v62 = vmax.f32 %v2040_v12, 0.0 }
 0x2d5   :  { %6129 = vmatmul.mubr.msk.f32.gmra.mrb[20].mxu0 %vm1020_vm4, %v160_v56 }
 0x2d6   :  { %6149 = vmatprep.mubr.msk.f32.mxu0 %vm7561_vm2, %v6531_v2 }
 0x3a4   :  { %v6127_v14 = vpop.f32.mrb[18].mxu0 }
 0x3a5   :  { %v2053_v18 = vadd.f32 %v6127_v14, %v2049_v6  ;;  %v1873_v19 = vpop.f32.mrb[19].mxu0 }
 0x3a6   :  { %v2052_v22 = vadd.f32 %v2048_v11, %v1873_v19 }
 0x3a7   :  { %vm2057_vm15 = vcmp.ge.f32.partialorder %v2053_v18, 0.0  ;;  %v2061_v24 = vmul.f32 0.25, %v2053_v18 }
 0x3a8   :  { %vm2056_vm4 = vcmp.ge.f32.partialorder %v2052_v22, 0.0  ;;  %v2060_v26 = vmul.f32 0.25, %v2052_v22  ;;  %v6130_v27 = vpop.f32.mrb[20].mxu0 }
 0x3a9   :  { %v7058_v28 = vsel %vm2057_vm15, %v2053_v18, %v2061_v24  ;;  %v2055_v29 = vadd.f32 %v6130_v27, %v2051_v23  ;;  %v1883_v30 = vpop.f32.mrb[21].mxu0 }
 0x3aa   :  { %v7063_v8 = vsel %vm2056_vm4, %v2052_v22, %v2060_v26  ;;  %v2054_v3 = vadd.f32 %v2050_v62, %v1883_v30 }
 0x3ab   :  { %v6438_v4 = vpack.c.bf16 %v7058_v28, %v7063_v8  ;;  %vm2059_vm14 = vcmp.ge.f32.partialorder %v2055_v29, 0.0  ;;  %v2063_v5 = vmul.f32 0.25, %v2055_v29 }
 0x3ac   :  { %vm2058_vm13 = vcmp.ge.f32.partialorder %v2054_v3, 0.0  ;;  %v2062_v7 = vmul.f32 0.25, %v2054_v3 }
 0x3ad   :  { %v7067_v9 = vsel %vm2059_vm14, %v2055_v29, %v2063_v5  ;;  %6439 = vmatpush3.bf16.msra.mxu0 %v6438_v4 }
 0x3ae   :  { %v7069_v13 = vsel %vm2058_vm13, %v2054_v3, %v2062_v7  ;;  %6440 = vmatprep.subr.bf16.mxu0 %v6528_v0 }
 0x3af   :  { %v6441_v16 = vpack.c.bf16 %v7067_v9, %v7069_v13 }
 0x3b1   :  { %6442 = vmatpush3.bf16.msra.mxu0 %v6441_v16 }
 0x3b2   :  { %6157 = vmatprep.subr.mxu0 %v6531_v2 }
 0x3b4   :  { %6150 = vmatmul.mubr.msk.f32.vlgmr.msra.gmra.mrb[22].mxu0 %vm2073_vm6, %v167_v48 }
 0x3b5   :  { %6159 = vmatprep.mubr.msk.f32.mxu0 %vm7561_vm2, %v6531_v2 }
 0x487   :  { %v2143_v49 = vpop.f32.mrb[22].mxu0 }
 0x488   :  { %v2144_v17 = vadd.f32 %v2143_v49, %v2071_v20  ;;  %v6151_v31 = vpop.f32.mrb[23].mxu0 }
 0x48a   :  { %v2147_v32 = vmax.f32 %v2144_v17, 0.0 }
 0x48c   :  { %2149 = vrot.lane.b32.xlu0 %v2147_v32, %s6533_s7  ;;  %2153 = vrot.lane.b32.xlu1 %v2147_v32, %s6532_s6 }
 0x490   :  { %2381 = vrot.lane.b32.xlu0 %v2147_v32, %s6534_s8  ;;  %2303 = vrot.lane.b32.xlu1 %v2147_v32, %s6537_s20 }
 0x494   :  { %2612 = vrot.lane.b32.xlu0 %v2147_v32, %s6540_s2  ;;  %2534 = vrot.lane.b32.xlu1 %v2147_v32, %s6541_s3 }
 0x498   :  { %2768 = vrot.lane.b32.xlu0 %v2147_v32, %s6542_s4  ;;  %2690 = vrot.lane.b32.xlu1 %v2147_v32, %s6543_s5 }
 0x49c   :  { %2968 = vperm.xlu0 %6527, %v181_v33   ;;  %2848 = vperm.xlu1 %6526, %v166_v34   ;;  %v178_v33 = vld [vmem:[%s7160_s29 + $0x8] sm:$0xff]  ;;  %v179_v34 = vld [vmem:[%s7160_s29 + $0x10] sm:$0xff] }
 0x4fe   :  { %v2150_v15 = vpop.permute.xlu0 %2149  ;;  %v2154_v39 = vpop.permute.xlu1 %2153 }
 0x4ff   :  { %6153 = vmatpush3.msk.msra.mxu1 %vm6682_vm8, %v2154_v39  ;;  %6158 = vmatpush3.msk.msra.mxu0 %vm6693_vm10, %v2150_v15 }
 0x500   :  { %6155 = vmatmul.mubr.msk.f32.vlgmr.msra.gmra.mrb[22].mxu1 %vm273_vm12, %v169_v35  ;;  %6160 = vmatmul.mubr.msk.f32.vlgmr.msra.gmra.mrb[24].mxu0 %vm273_vm12, %v168_v38  ;;  %v180_v35 = vld [vmem:[%s7160_s29 + $0x18] sm:$0xff]  ;;  %s5696_s29 = sld [smem:[%s7528_s0 + %s6563_s26]]  }
 0x501   :  { %6167 = vmatprep.subr.mxu0 %v6531_v2  ;;  %6162 = vmatprep.subr.mxu1 %v6531_v2 }
 0x502   :  { %v2382_v41 = vpop.permute.xlu0 %2381  ;;  %v2304_v42 = vpop.permute.xlu1 %2303  ;;  %6164 = vmatprep.mubr.msk.f32.mxu1 %vm7561_vm2, %v6531_v2  ;;  %6169 = vmatprep.mubr.msk.f32.mxu0 %vm7561_vm2, %v6531_v2 }
 0x503   :  { %6163 = vmatpush3.msk.msra.mxu1 %vm6934_vm1, %v2304_v42  ;;  %6168 = vmatpush3.msk.msra.mxu0 %vm7560_vm0, %v2382_v41 }
 0x504   :  { %6165 = vmatmul.mubr.msk.f32.vlgmr.msra.gmra.mrb[24].mxu1 %vm273_vm12, %v170_v40  ;;  %6172 = vmatprep.subr.mxu1 %v6531_v2 }
 0x505   :  { %6170 = vmatmul.mubr.msk.f32.vlgmr.msra.gmra.mrb[26].mxu0 %vm273_vm12, %v171_v43  ;;  %6173 = vmatpush3.msk.msra.mxu1 %vm7566_vm11, %v2147_v32 }
 0x506   :  { %6177 = vmatprep.subr.mxu0 %v6531_v2  ;;  %v2613_v45 = vpop.permute.xlu0 %2612  ;;  %v2535_v1 = vpop.permute.xlu1 %2534  ;;  %6174 = vmatprep.mubr.msk.f32.mxu1 %vm7561_vm2, %v6531_v2 }
 0x507   :  { %6178 = vmatpush3.msk.msra.mxu0 %vm6964_vm3, %v2535_v1  ;;  %6182 = vmatprep.subr.mxu1 %v6531_v2 }
 0x508   :  { %6175 = vmatmul.mubr.msk.f32.vlgmr.msra.gmra.mrb[26].mxu1 %vm273_vm12, %v172_v44  ;;  %6179 = vmatprep.mubr.msk.f32.mxu0 %vm7561_vm2, %v6531_v2 }
 0x509   :  { %6183 = vmatpush3.msk.msra.mxu1 %vm6960_vm5, %v2613_v45  ;;  %6180 = vmatmul.mubr.msk.f32.vlgmr.msra.gmra.mrb[28].mxu0 %vm273_vm12, %v173_v52 }
 0x50a   :  { %v2769_v54 = vpop.permute.xlu0 %2768  ;;  %6187 = vmatprep.subr.mxu0 %v6531_v2  ;;  %v2691_v56 = vpop.permute.xlu1 %2690  ;;  %6184 = vmatprep.mubr.msk.f32.mxu1 %vm7561_vm2, %v6531_v2 }
 0x50b   :  { %6188 = vmatpush3.msk.msra.mxu0 %vm6997_vm7, %v2691_v56  ;;  %6192 = vmatprep.subr.mxu1 %v6531_v2 }
 0x50c   :  { %6185 = vmatmul.mubr.msk.f32.vlgmr.msra.gmra.mrb[28].mxu1 %vm273_vm12, %v174_v53  ;;  %6189 = vmatprep.mubr.msk.f32.mxu0 %vm7561_vm2, %v6531_v2 }
 0x50d   :  { %6193 = vmatpush3.msk.msra.mxu1 %vm6993_vm9, %v2769_v54  ;;  %6190 = vmatmul.mubr.msk.f32.vlgmr.msra.gmra.mrb[30].mxu0 %vm273_vm12, %v175_v57 }
 0x50e   :  { %6194 = vmatprep.mubr.msk.f32.mxu1 %vm7561_vm2, %v6531_v2  ;;  %6443 = vmatprep.subr.bf16.mxu1 %v6528_v0 }
 0x50f   :  { %6199 = vmatprep.mubr.msk.f32.mxu0 %vm273_vm12, %v177_v59 }
 0x510   :  { %6195 = vmatmul.mubr.msk.f32.vlgmr.msra.gmra.mrb[30].mxu1 %vm273_vm12, %v176_v58  ;;  %v183_v58 = vld [vmem:[%s5686_s10] sm:$0xff]  ;;  %s5695_s10 = sld [smem:[%s7528_s0 + %s6564_s30]]  }
 0x511   :  { %6213 = vmatprep.mubr.msk.f32.mxu1 %vm7561_vm2, %v6531_v2 }
 0x51b   :  { %v2849_v17 = vpop.permute.xlu1 %2848 }
 0x5d3   :  { %v2226_v21 = vpop.f32.mrb[22].mxu1  ;;  %v2299_v55 = vpop.f32.mrb[24].mxu0 }
 0x5d4   :  { %v2300_v63 = vadd.f32 %v2299_v55, %v2226_v21  ;;  %v6156_v6 = vpop.f32.mrb[23].mxu1  ;;  %v6161_v10 = vpop.f32.mrb[25].mxu0 }
 0x5d5   :  { %v197_v6 = vld [vmem:[%s5689_s14] sm:$0xff]  ;;  %s5699_s14 = sld [smem:[%s7528_s0 + %s6567_s11]]  }
 0x5d6   :  { %v182_v10 = vld [vmem:[%s5685_s18] sm:$0xff] }
 0x5d7   :  { %v2376_v11 = vpop.f32.mrb[24].mxu1 }
 0x5d8   :  { %v2380_v12 = vadd.f32 %v2376_v11, %v2300_v63  ;;  %v6166_v14 = vpop.f32.mrb[25].mxu1  ;;  %v2454_v18 = vpop.f32.mrb[26].mxu0  ;;  %v185_v11 = vld [vmem:[%s7214_s23 + $0x8] sm:$0xff] }
 0x5d9   :  { %v6171_v19 = vpop.f32.mrb[27].mxu0 }
 0x5da   :  { %v2458_v22 = vadd.f32 %v2454_v18, %v2380_v12  ;;  %v184_v12 = vld [vmem:[%s7214_s23] sm:$0xff]  ;;  %v186_v19 = vld [vmem:[%s7214_s23 + $0x10] sm:$0xff] }
 0x5db   :  { %v2529_v23 = vpop.f32.mrb[26].mxu1 }
 0x5dc   :  { %v2533_v24 = vadd.f32 %v2529_v23, %v2458_v22  ;;  %v6176_v62 = vpop.f32.mrb[27].mxu1  ;;  %v2607_v26 = vpop.f32.mrb[28].mxu0 }
 0x5dd   :  { %v6181_v27 = vpop.f32.mrb[29].mxu0  ;;  %v188_v62 = vld [vmem:[%s7214_s23 + $0x20] sm:$0xff] }
 0x5de   :  { %v2611_v29 = vadd.f32 %v2607_v26, %v2533_v24  ;;  %v187_v24 = vld [vmem:[%s7214_s23 + $0x18] sm:$0xff] }
 0x5df   :  { %v2685_v30 = vpop.f32.mrb[28].mxu1 }
 0x5e0   :  { %v2689_v3 = vadd.f32 %v2685_v30, %v2611_v29  ;;  %v6186_v4 = vpop.f32.mrb[29].mxu1  ;;  %v2763_v5 = vpop.f32.mrb[30].mxu0  ;;  %v189_v29 = vld [vmem:[%s7214_s23 + $0x28] sm:$0xff]  ;;  %v190_v30 = vld [vmem:[%s7214_s23 + $0x30] sm:$0xff] }
 0x5e1   :  { %v6191_v7 = vpop.f32.mrb[31].mxu0 }
 0x5e2   :  { %v2767_v16 = vadd.f32 %v2763_v5, %v2689_v3  ;;  %v191_v5 = vld [vmem:[%s7214_s23 + $0x38] sm:$0xff]  ;;  %v192_v7 = vld [vmem:[%s7214_s23 + $0x40] sm:$0xff] }
 0x5e3   :  { %v2841_v48 = vpop.f32.mrb[30].mxu1 }
 0x5e4   :  { %v2845_v20 = vadd.f32 %v2841_v48, %v2767_v16  ;;  %v6196_v49 = vpop.f32.mrb[31].mxu1  ;;  %v193_v16 = vld [vmem:[%s7279_s27] sm:$0xff] }
 0x5e6   :  { %v2851_v31 = vadd.f32 %v2849_v17, %v2845_v20 }
 0x5e8   :  { %v2852_v32 = vmax.f32 %v2851_v31, 0.0 }
 0x5ea   :  { %6197 = vmatprep.subr.mxu0 %v2852_v32 }
 0x5eb   :  { %6198 = vmatpush3.msra.mxu0 %v2852_v32 }
 0x5ec   :  { %6200 = vmatmul.mubr.msk.f32.vlgmr.msra.gmra.mrb[32].mxu0 %vm273_vm12, %v178_v33  ;;  %6216 = vmatprep.subr.mxu0 %v6531_v2 }
 0x5ed   :  { %6202 = vmatprep.mubr.msk.f32.mxu0 %vm273_vm12, %v179_v34 }
 0x5f0   :  { %6203 = vmatmul.mubr.msk.f32.gmra.mrb[34].mxu0 %vm273_vm12, %v180_v35 }
 0x5f1   :  { %6218 = vmatprep.mubr.msk.f32.mxu0 %vm7561_vm2, %v6531_v2 }
 0x6bf   :  { %v6201_v38 = vpop.f32.mrb[32].mxu0 }
 0x6c0   :  { %v2951_v15 = vadd.f32 %v6201_v38, %v7058_v28  ;;  %v2931_v39 = vpop.f32.mrb[33].mxu0 }
 0x6c1   :  { %v2950_v40 = vadd.f32 %v2931_v39, %v7063_v8 }
 0x6c2   :  { %vm2955_vm15 = vcmp.ge.f32.partialorder %v2951_v15, 0.0  ;;  %v2959_v41 = vmul.f32 0.25, %v2951_v15 }
 0x6c3   :  { %vm2954_vm4 = vcmp.ge.f32.partialorder %v2950_v40, 0.0  ;;  %v2958_v42 = vmul.f32 0.25, %v2950_v40  ;;  %v6204_v43 = vpop.f32.mrb[34].mxu0 }
 0x6c4   :  { %v7175_v44 = vsel %vm2955_vm15, %v2951_v15, %v2959_v41  ;;  %v2953_v45 = vadd.f32 %v6204_v43, %v7067_v9  ;;  %v2941_v1 = vpop.f32.mrb[35].mxu0 }
 0x6c5   :  { %v7181_v52 = vsel %vm2954_vm4, %v2950_v40, %v2958_v42  ;;  %v2952_v28 = vadd.f32 %v2941_v1, %v7069_v13  ;;  %v2969_v13 = vpop.permute.xlu0 %2968 }
 0x6c6   :  { %v6444_v8 = vpack.c.bf16 %v7175_v44, %v7181_v52  ;;  %vm2957_vm14 = vcmp.ge.f32.partialorder %v2953_v45, 0.0  ;;  %v2961_v53 = vmul.f32 0.25, %v2953_v45 }
 0x6c7   :  { %vm2956_vm13 = vcmp.ge.f32.partialorder %v2952_v28, 0.0  ;;  %v2960_v54 = vmul.f32 0.25, %v2952_v28 }
 0x6c8   :  { %v7186_v56 = vsel %vm2957_vm14, %v2953_v45, %v2961_v53  ;;  %6445 = vmatpush3.bf16.msra.mxu1 %v6444_v8 }
 0x6c9   :  { %v7188_v9 = vsel %vm2956_vm13, %v2952_v28, %v2960_v54  ;;  %6446 = vmatprep.subr.bf16.mxu1 %v6528_v0 }
 0x6ca   :  { %v6447_v57 = vpack.c.bf16 %v7186_v56, %v7188_v9 }
 0x6cc   :  { %6448 = vmatpush3.bf16.msra.mxu1 %v6447_v57 }
 0x6cd   :  { %6221 = vmatprep.subr.mxu1 %v6531_v2 }
 0x6cf   :  { %6214 = vmatmul.mubr.msk.f32.vlgmr.msra.gmra.mrb[32].mxu1 %vm2073_vm6, %v183_v58 }
 0x6d0   :  { %6223 = vmatprep.mubr.msk.f32.mxu1 %vm7561_vm2, %v6531_v2 }
 0x7a2   :  { %v3040_v59 = vpop.f32.mrb[32].mxu1 }
 0x7a3   :  { %v3041_v21 = vadd.f32 %v3040_v59, %v2969_v13  ;;  %v6215_v55 = vpop.f32.mrb[33].mxu1 }
 0x7a5   :  { %v3044_v63 = vmax.f32 %v3041_v21, 0.0 }
 0x7a7   :  { %3046 = vrot.lane.b32.xlu0 %v3044_v63, %s6533_s7  ;;  %3050 = vrot.lane.b32.xlu1 %v3044_v63, %s6532_s6 }
 0x7ab   :  { %3278 = vrot.lane.b32.xlu0 %v3044_v63, %s6534_s8  ;;  %3200 = vrot.lane.b32.xlu1 %v3044_v63, %s6537_s20 }
 0x7af   :  { %3509 = vrot.lane.b32.xlu0 %v3044_v63, %s6540_s2  ;;  %3431 = vrot.lane.b32.xlu1 %v3044_v63, %s6541_s3 }
 0x7b3   :  { %3665 = vrot.lane.b32.xlu0 %v3044_v63, %s6542_s4  ;;  %3587 = vrot.lane.b32.xlu1 %v3044_v63, %s6543_s5 }
 0x7b7   :  { %3865 = vperm.xlu0 %6527, %v197_v6   ;;  %3745 = vperm.xlu1 %6526, %v182_v10   ;;  %v194_v6 = vld [vmem:[%s7279_s27 + $0x8] sm:$0xff]  ;;  %v195_v10 = vld [vmem:[%s7279_s27 + $0x10] sm:$0xff] }
 0x819   :  { %v3047_v14 = vpop.permute.xlu0 %3046  ;;  %v3051_v18 = vpop.permute.xlu1 %3050 }
 0x81a   :  { %6217 = vmatpush3.msk.msra.mxu0 %vm6682_vm8, %v3051_v18  ;;  %6222 = vmatpush3.msk.msra.mxu1 %vm6693_vm10, %v3047_v14 }
 0x81b   :  { %6219 = vmatmul.mubr.msk.f32.vlgmr.msra.gmra.mrb[36].mxu0 %vm273_vm12, %v185_v11  ;;  %6224 = vmatmul.mubr.msk.f32.vlgmr.msra.gmra.mrb[34].mxu1 %vm273_vm12, %v184_v12  ;;  %v196_v11 = vld [vmem:[%s7279_s27 + $0x18] sm:$0xff] }
 0x81c   :  { %6231 = vmatprep.subr.mxu1 %v6531_v2  ;;  %6226 = vmatprep.subr.mxu0 %v6531_v2 }
 0x81d   :  { %v3279_v22 = vpop.permute.xlu0 %3278  ;;  %v3201_v23 = vpop.permute.xlu1 %3200  ;;  %6228 = vmatprep.mubr.msk.f32.mxu0 %vm7561_vm2, %v6531_v2  ;;  %6233 = vmatprep.mubr.msk.f32.mxu1 %vm7561_vm2, %v6531_v2 }
 0x81e   :  { %6227 = vmatpush3.msk.msra.mxu0 %vm6934_vm1, %v3201_v23  ;;  %6232 = vmatpush3.msk.msra.mxu1 %vm7560_vm0, %v3279_v22 }
 0x81f   :  { %6229 = vmatmul.mubr.msk.f32.vlgmr.msra.gmra.mrb[38].mxu0 %vm273_vm12, %v186_v19  ;;  %6236 = vmatprep.subr.mxu0 %v6531_v2 }
 0x820   :  { %6234 = vmatmul.mubr.msk.f32.vlgmr.msra.gmra.mrb[36].mxu1 %vm273_vm12, %v187_v24  ;;  %6237 = vmatpush3.msk.msra.mxu0 %vm7566_vm11, %v3044_v63 }
 0x821   :  { %6241 = vmatprep.subr.mxu1 %v6531_v2  ;;  %v3510_v26 = vpop.permute.xlu0 %3509  ;;  %v3432_v27 = vpop.permute.xlu1 %3431  ;;  %6238 = vmatprep.mubr.msk.f32.mxu0 %vm7561_vm2, %v6531_v2 }
 0x822   :  { %6242 = vmatpush3.msk.msra.mxu1 %vm6964_vm3, %v3432_v27  ;;  %6246 = vmatprep.subr.mxu0 %v6531_v2 }
 0x823   :  { %6239 = vmatmul.mubr.msk.f32.vlgmr.msra.gmra.mrb[40].mxu0 %vm273_vm12, %v188_v62  ;;  %6243 = vmatprep.mubr.msk.f32.mxu1 %vm7561_vm2, %v6531_v2 }
 0x824   :  { %6247 = vmatpush3.msk.msra.mxu0 %vm6960_vm5, %v3510_v26  ;;  %6244 = vmatmul.mubr.msk.f32.vlgmr.msra.gmra.mrb[38].mxu1 %vm273_vm12, %v189_v29 }
 0x825   :  { %v3666_v3 = vpop.permute.xlu0 %3665  ;;  %6251 = vmatprep.subr.mxu1 %v6531_v2  ;;  %v3588_v4 = vpop.permute.xlu1 %3587  ;;  %6248 = vmatprep.mubr.msk.f32.mxu0 %vm7561_vm2, %v6531_v2 }
 0x826   :  { %6252 = vmatpush3.msk.msra.mxu1 %vm6997_vm7, %v3588_v4  ;;  %6256 = vmatprep.subr.mxu0 %v6531_v2 }
 0x827   :  { %6249 = vmatmul.mubr.msk.f32.vlgmr.msra.gmra.mrb[42].mxu0 %vm273_vm12, %v190_v30  ;;  %6253 = vmatprep.mubr.msk.f32.mxu1 %vm7561_vm2, %v6531_v2 }
 0x828   :  { %6257 = vmatpush3.msk.msra.mxu0 %vm6993_vm9, %v3666_v3  ;;  %6254 = vmatmul.mubr.msk.f32.vlgmr.msra.gmra.mrb[40].mxu1 %vm273_vm12, %v191_v5 }
 0x829   :  { %6258 = vmatprep.mubr.msk.f32.mxu0 %vm7561_vm2, %v6531_v2  ;;  %6449 = vmatprep.subr.bf16.mxu0 %v6528_v0 }
 0x82a   :  { %6263 = vmatprep.mubr.msk.f32.mxu1 %vm273_vm12, %v193_v16 }
 0x82b   :  { %6259 = vmatmul.mubr.msk.f32.vlgmr.msra.gmra.mrb[44].mxu0 %vm273_vm12, %v192_v7  ;;  %v199_v7 = vld [vmem:[%s5691_s1] sm:$0xff] }
 0x82c   :  { %6277 = vmatprep.mubr.msk.f32.mxu0 %vm7561_vm2, %v6531_v2 }
 0x836   :  { %v3746_v21 = vpop.permute.xlu1 %3745 }
 0x8ee   :  { %v3123_v48 = vpop.f32.mrb[36].mxu0  ;;  %v3196_v20 = vpop.f32.mrb[34].mxu1 }
 0x8ef   :  { %v3197_v49 = vadd.f32 %v3196_v20, %v3123_v48  ;;  %v6220_v17 = vpop.f32.mrb[37].mxu0  ;;  %v6225_v31 = vpop.f32.mrb[35].mxu1 }
 0x8f0   :  { %v213_v17 = vld [vmem:[%s5694_s12] sm:$0xff] }
 0x8f1   :  { %v198_v31 = vld [vmem:[%s5690_s16] sm:$0xff] }
 0x8f2   :  { %v3273_v32 = vpop.f32.mrb[38].mxu0 }
 0x8f3   :  { %v3277_v33 = vadd.f32 %v3273_v32, %v3197_v49  ;;  %v6230_v34 = vpop.f32.mrb[39].mxu0  ;;  %v3351_v35 = vpop.f32.mrb[36].mxu1  ;;  %v201_v32 = vld [vmem:[%s7333_s21 + $0x8] sm:$0xff] }
 0x8f4   :  { %v6235_v38 = vpop.f32.mrb[37].mxu1 }
 0x8f5   :  { %v3355_v15 = vadd.f32 %v3351_v35, %v3277_v33  ;;  %v200_v33 = vld [vmem:[%s7333_s21] sm:$0xff]  ;;  %v202_v38 = vld [vmem:[%s7333_s21 + $0x10] sm:$0xff] }
 0x8f6   :  { %v3426_v39 = vpop.f32.mrb[40].mxu0 }
 0x8f7   :  { %v3430_v40 = vadd.f32 %v3426_v39, %v3355_v15  ;;  %v6240_v41 = vpop.f32.mrb[41].mxu0  ;;  %v3504_v42 = vpop.f32.mrb[38].mxu1 }
 0x8f8   :  { %v6245_v43 = vpop.f32.mrb[39].mxu1  ;;  %v204_v41 = vld [vmem:[%s7333_s21 + $0x20] sm:$0xff] }
 0x8f9   :  { %v3508_v45 = vadd.f32 %v3504_v42, %v3430_v40  ;;  %v203_v40 = vld [vmem:[%s7333_s21 + $0x18] sm:$0xff] }
 0x8fa   :  { %v3582_v1 = vpop.f32.mrb[42].mxu0 }
 0x8fb   :  { %v3586_v28 = vadd.f32 %v3582_v1, %v3508_v45  ;;  %v6250_v8 = vpop.f32.mrb[43].mxu0  ;;  %v3660_v53 = vpop.f32.mrb[40].mxu1  ;;  %v205_v45 = vld [vmem:[%s7333_s21 + $0x28] sm:$0xff]  ;;  %v206_v1 = vld [vmem:[%s7333_s21 + $0x30] sm:$0xff] }
 0x8fc   :  { %v6255_v54 = vpop.f32.mrb[41].mxu1 }
 0x8fd   :  { %v3664_v57 = vadd.f32 %v3660_v53, %v3586_v28  ;;  %v207_v53 = vld [vmem:[%s7333_s21 + $0x38] sm:$0xff]  ;;  %v208_v54 = vld [vmem:[%s7333_s21 + $0x40] sm:$0xff] }
 0x8fe   :  { %v3738_v58 = vpop.f32.mrb[44].mxu0 }
 0x8ff   :  { %v3742_v13 = vadd.f32 %v3738_v58, %v3664_v57  ;;  %v6260_v59 = vpop.f32.mrb[45].mxu0  ;;  %v209_v57 = vld [vmem:[%s7398_s25] sm:$0xff] }
 0x901   :  { %v3748_v55 = vadd.f32 %v3746_v21, %v3742_v13 }
 0x903   :  { %v3749_v63 = vmax.f32 %v3748_v55, 0.0 }
 0x905   :  { %6261 = vmatprep.subr.mxu1 %v3749_v63 }
 0x906   :  { %6262 = vmatpush3.msra.mxu1 %v3749_v63 }
 0x907   :  { %6264 = vmatmul.mubr.msk.f32.vlgmr.msra.gmra.mrb[42].mxu1 %vm273_vm12, %v194_v6  ;;  %6280 = vmatprep.subr.mxu1 %v6531_v2 }
 0x908   :  { %6266 = vmatprep.mubr.msk.f32.mxu1 %vm273_vm12, %v195_v10 }
 0x90b   :  { %6267 = vmatmul.mubr.msk.f32.gmra.mrb[44].mxu1 %vm273_vm12, %v196_v11 }
 0x90c   :  { %6282 = vmatprep.mubr.msk.f32.mxu1 %vm7561_vm2, %v6531_v2 }
 0x9da   :  { %v6265_v12 = vpop.f32.mrb[42].mxu1 }
 0x9db   :  { %v3848_v14 = vadd.f32 %v6265_v12, %v7175_v44  ;;  %v3828_v18 = vpop.f32.mrb[43].mxu1 }
 0x9dc   :  { %v3847_v19 = vadd.f32 %v3828_v18, %v7181_v52 }
 0x9dd   :  { %vm3852_vm15 = vcmp.ge.f32.partialorder %v3848_v14, 0.0  ;;  %v3856_v22 = vmul.f32 0.25, %v3848_v14 }
 0x9de   :  { %vm3851_vm4 = vcmp.ge.f32.partialorder %v3847_v19, 0.0  ;;  %v3855_v23 = vmul.f32 0.25, %v3847_v19  ;;  %v6268_v24 = vpop.f32.mrb[44].mxu1 }
 0x9df   :  { %v7294_v62 = vsel %vm3852_vm15, %v3848_v14, %v3856_v22  ;;  %v3850_v26 = vadd.f32 %v6268_v24, %v7186_v56  ;;  %v3838_v27 = vpop.f32.mrb[45].mxu1 }
 0x9e0   :  { %v7300_v29 = vsel %vm3851_vm4, %v3847_v19, %v3855_v23  ;;  %v3849_v44 = vadd.f32 %v3838_v27, %v7188_v9  ;;  %v3866_v9 = vpop.permute.xlu0 %3865 }
 0x9e1   :  { %v6450_v52 = vpack.c.bf16 %v7294_v62, %v7300_v29  ;;  %vm3854_vm14 = vcmp.ge.f32.partialorder %v3850_v26, 0.0  ;;  %v3858_v30 = vmul.f32 0.25, %v3850_v26 }
 0x9e2   :  { %vm3853_vm13 = vcmp.ge.f32.partialorder %v3849_v44, 0.0  ;;  %v3857_v3 = vmul.f32 0.25, %v3849_v44 }
 0x9e3   :  { %v7305_v4 = vsel %vm3854_vm14, %v3850_v26, %v3858_v30  ;;  %6451 = vmatpush3.bf16.msra.mxu0 %v6450_v52 }
 0x9e4   :  { %v7307_v56 = vsel %vm3853_vm13, %v3849_v44, %v3857_v3  ;;  %6452 = vmatprep.subr.bf16.mxu0 %v6528_v0 }
 0x9e5   :  { %v6453_v5 = vpack.c.bf16 %v7305_v4, %v7307_v56 }
 0x9e7   :  { %6454 = vmatpush3.bf16.msra.mxu0 %v6453_v5 }
 0x9e8   :  { %6285 = vmatprep.subr.mxu0 %v6531_v2 }
 0x9ea   :  { %6278 = vmatmul.mubr.msk.f32.vlgmr.msra.gmra.mrb[46].mxu0 %vm2073_vm6, %v199_v7 }
 0x9eb   :  { %6287 = vmatprep.mubr.msk.f32.mxu0 %vm7561_vm2, %v6531_v2 }
 0xabd   :  { %v3937_v16 = vpop.f32.mrb[46].mxu0 }
 0xabe   :  { %v3938_v48 = vadd.f32 %v3937_v16, %v3866_v9  ;;  %v6279_v20 = vpop.f32.mrb[47].mxu0 }
 0xac0   :  { %v3941_v49 = vmax.f32 %v3938_v48, 0.0 }
 0xac2   :  { %3943 = vrot.lane.b32.xlu0 %v3941_v49, %s6533_s7  ;;  %3947 = vrot.lane.b32.xlu1 %v3941_v49, %s6532_s6 }
 0xac6   :  { %4175 = vrot.lane.b32.xlu0 %v3941_v49, %s6534_s8  ;;  %4097 = vrot.lane.b32.xlu1 %v3941_v49, %s6537_s20 }
 0xaca   :  { %4406 = vrot.lane.b32.xlu0 %v3941_v49, %s6540_s2  ;;  %4328 = vrot.lane.b32.xlu1 %v3941_v49, %s6541_s3 }
 0xace   :  { %4562 = vrot.lane.b32.xlu0 %v3941_v49, %s6542_s4  ;;  %4484 = vrot.lane.b32.xlu1 %v3941_v49, %s6543_s5 }
 0xad2   :  { %4762 = vperm.xlu0 %6527, %v213_v17   ;;  %4642 = vperm.xlu1 %6526, %v198_v31   ;;  %v210_v17 = vld [vmem:[%s7398_s25 + $0x8] sm:$0xff]  ;;  %v211_v31 = vld [vmem:[%s7398_s25 + $0x10] sm:$0xff] }
 0xb34   :  { %v3944_v34 = vpop.permute.xlu0 %3943  ;;  %v3948_v35 = vpop.permute.xlu1 %3947 }
 0xb35   :  { %6281 = vmatpush3.msk.msra.mxu1 %vm6682_vm8, %v3948_v35  ;;  %6286 = vmatpush3.msk.msra.mxu0 %vm6693_vm10, %v3944_v34 }
 0xb36   :  { %6283 = vmatmul.mubr.msk.f32.vlgmr.msra.gmra.mrb[46].mxu1 %vm273_vm12, %v201_v32  ;;  %6288 = vmatmul.mubr.msk.f32.vlgmr.msra.gmra.mrb[48].mxu0 %vm273_vm12, %v200_v33  ;;  %v212_v32 = vld [vmem:[%s7398_s25 + $0x18] sm:$0xff] }
 0xb37   :  { %6295 = vmatprep.subr.mxu0 %v6531_v2  ;;  %6290 = vmatprep.subr.mxu1 %v6531_v2 }
 0xb38   :  { %v4176_v15 = vpop.permute.xlu0 %4175  ;;  %v4098_v39 = vpop.permute.xlu1 %4097  ;;  %6292 = vmatprep.mubr.msk.f32.mxu1 %vm7561_vm2, %v6531_v2  ;;  %6297 = vmatprep.mubr.msk.f32.mxu0 %vm7561_vm2, %v6531_v2 }
 0xb39   :  { %6291 = vmatpush3.msk.msra.mxu1 %vm6934_vm1, %v4098_v39  ;;  %6296 = vmatpush3.msk.msra.mxu0 %vm7560_vm0, %v4176_v15 }
 0xb3a   :  { %6293 = vmatmul.mubr.msk.f32.vlgmr.msra.gmra.mrb[48].mxu1 %vm273_vm12, %v202_v38  ;;  %6300 = vmatprep.subr.mxu1 %v6531_v2 }
 0xb3b   :  { %6298 = vmatmul.mubr.msk.f32.vlgmr.msra.gmra.mrb[50].mxu0 %vm273_vm12, %v203_v40  ;;  %6301 = vmatpush3.msk.msra.mxu1 %vm7566_vm11, %v3941_v49 }
 0xb3c   :  { %6305 = vmatprep.subr.mxu0 %v6531_v2  ;;  %v4407_v42 = vpop.permute.xlu0 %4406  ;;  %v4329_v43 = vpop.permute.xlu1 %4328  ;;  %6302 = vmatprep.mubr.msk.f32.mxu1 %vm7561_vm2, %v6531_v2 }
 0xb3d   :  { %6306 = vmatpush3.msk.msra.mxu0 %vm6964_vm3, %v4329_v43  ;;  %6310 = vmatprep.subr.mxu1 %v6531_v2 }
 0xb3e   :  { %6303 = vmatmul.mubr.msk.f32.vlgmr.msra.gmra.mrb[50].mxu1 %vm273_vm12, %v204_v41  ;;  %6307 = vmatprep.mubr.msk.f32.mxu0 %vm7561_vm2, %v6531_v2 }
 0xb3f   :  { %6311 = vmatpush3.msk.msra.mxu1 %vm6960_vm5, %v4407_v42  ;;  %6308 = vmatmul.mubr.msk.f32.vlgmr.msra.gmra.mrb[52].mxu0 %vm273_vm12, %v205_v45 }
 0xb40   :  { %v4563_v28 = vpop.permute.xlu0 %4562  ;;  %6315 = vmatprep.subr.mxu0 %v6531_v2  ;;  %v4485_v8 = vpop.permute.xlu1 %4484  ;;  %6312 = vmatprep.mubr.msk.f32.mxu1 %vm7561_vm2, %v6531_v2 }
 0xb41   :  { %6316 = vmatpush3.msk.msra.mxu0 %vm6997_vm7, %v4485_v8  ;;  %6320 = vmatprep.subr.mxu1 %v6531_v2 }
 0xb42   :  { %6313 = vmatmul.mubr.msk.f32.vlgmr.msra.gmra.mrb[52].mxu1 %vm273_vm12, %v206_v1  ;;  %6317 = vmatprep.mubr.msk.f32.mxu0 %vm7561_vm2, %v6531_v2 }
 0xb43   :  { %6321 = vmatpush3.msk.msra.mxu1 %vm6993_vm9, %v4563_v28  ;;  %6318 = vmatmul.mubr.msk.f32.vlgmr.msra.gmra.mrb[54].mxu0 %vm273_vm12, %v207_v53 }
 0xb44   :  { %6322 = vmatprep.mubr.msk.f32.mxu1 %vm7561_vm2, %v6531_v2  ;;  %6455 = vmatprep.subr.bf16.mxu1 %v6528_v0 }
 0xb45   :  { %6327 = vmatprep.mubr.msk.f32.mxu0 %vm273_vm12, %v209_v57 }
 0xb46   :  { %6323 = vmatmul.mubr.msk.f32.vlgmr.msra.gmra.mrb[54].mxu1 %vm273_vm12, %v208_v54  ;;  %v215_v54 = vld [vmem:[%s5696_s29] sm:$0xff] }
 0xb47   :  { %6341 = vmatprep.mubr.msk.f32.mxu1 %vm7561_vm2, %v6531_v2 }
 0xb51   :  { %v4643_v48 = vpop.permute.xlu1 %4642 }
 0xc09   :  { %v4020_v58 = vpop.f32.mrb[46].mxu1  ;;  %v4093_v13 = vpop.f32.mrb[48].mxu0 }
 0xc0a   :  { %v4094_v59 = vadd.f32 %v4093_v13, %v4020_v58  ;;  %v6284_v21 = vpop.f32.mrb[47].mxu1  ;;  %v6289_v55 = vpop.f32.mrb[49].mxu0 }
 0xc0d   :  { %v4170_v63 = vpop.f32.mrb[48].mxu1 }
 0xc0e   :  { %v4174_v6 = vadd.f32 %v4170_v63, %v4094_v59  ;;  %v6294_v10 = vpop.f32.mrb[49].mxu1  ;;  %v4248_v11 = vpop.f32.mrb[50].mxu0 }
 0xc0f   :  { %v6299_v12 = vpop.f32.mrb[51].mxu0 }
 0xc10   :  { %v4252_v14 = vadd.f32 %v4248_v11, %v4174_v6 }
 0xc11   :  { %v4323_v18 = vpop.f32.mrb[50].mxu1 }
 0xc12   :  { %v4327_v19 = vadd.f32 %v4323_v18, %v4252_v14  ;;  %v6304_v22 = vpop.f32.mrb[51].mxu1  ;;  %v4401_v23 = vpop.f32.mrb[52].mxu0 }
 0xc13   :  { %v6309_v24 = vpop.f32.mrb[53].mxu0 }
 0xc14   :  { %v4405_v26 = vadd.f32 %v4401_v23, %v4327_v19 }
 0xc15   :  { %v4479_v27 = vpop.f32.mrb[52].mxu1 }
 0xc16   :  { %v4483_v44 = vadd.f32 %v4479_v27, %v4405_v26  ;;  %v6314_v52 = vpop.f32.mrb[53].mxu1  ;;  %v4557_v30 = vpop.f32.mrb[54].mxu0 }
 0xc17   :  { %v6319_v3 = vpop.f32.mrb[55].mxu0 }
 0xc18   :  { %v4561_v5 = vadd.f32 %v4557_v30, %v4483_v44 }
 0xc19   :  { %v4635_v7 = vpop.f32.mrb[54].mxu1 }
 0xc1a   :  { %v4639_v9 = vadd.f32 %v4635_v7, %v4561_v5  ;;  %v6324_v16 = vpop.f32.mrb[55].mxu1 }
 0xc1c   :  { %v4645_v20 = vadd.f32 %v4643_v48, %v4639_v9 }
 0xc1e   :  { %v4646_v49 = vmax.f32 %v4645_v20, 0.0 }
 0xc20   :  { %6325 = vmatprep.subr.mxu0 %v4646_v49 }
 0xc21   :  { %6326 = vmatpush3.msra.mxu0 %v4646_v49 }
 0xc22   :  { %6328 = vmatmul.mubr.msk.f32.vlgmr.msra.gmra.mrb[56].mxu0 %vm273_vm12, %v210_v17  ;;  %6344 = vmatprep.subr.mxu0 %v6531_v2 }
 0xc23   :  { %6330 = vmatprep.mubr.msk.f32.mxu0 %vm273_vm12, %v211_v31 }
 0xc26   :  { %6331 = vmatmul.mubr.msk.f32.gmra.mrb[58].mxu0 %vm273_vm12, %v212_v32 }
 0xc27   :  { %6346 = vmatprep.mubr.msk.f32.mxu0 %vm7561_vm2, %v6531_v2 }
 0xcf5   :  { %v6329_v33 = vpop.f32.mrb[56].mxu0 }
 0xcf6   :  { %v4745_v34 = vadd.f32 %v6329_v33, %v7294_v62  ;;  %v4725_v35 = vpop.f32.mrb[57].mxu0 }
 0xcf7   :  { %v4744_v38 = vadd.f32 %v4725_v35, %v7300_v29 }
 0xcf8   :  { %vm4749_vm15 = vcmp.ge.f32.partialorder %v4745_v34, 0.0  ;;  %v4753_v15 = vmul.f32 0.25, %v4745_v34 }
 0xcf9   :  { %vm4748_vm4 = vcmp.ge.f32.partialorder %v4744_v38, 0.0  ;;  %v4752_v39 = vmul.f32 0.25, %v4744_v38  ;;  %v6332_v40 = vpop.f32.mrb[58].mxu0 }
 0xcfa   :  { %v7413_v41 = vsel %vm4749_vm15, %v4745_v34, %v4753_v15  ;;  %v4747_v42 = vadd.f32 %v6332_v40, %v7305_v4  ;;  %v4735_v43 = vpop.f32.mrb[59].mxu0 }
 0xcfb   :  { %v7419_v45 = vsel %vm4748_vm4, %v4744_v38, %v4752_v39  ;;  %v4746_v62 = vadd.f32 %v4735_v43, %v7307_v56  ;;  %v4763_v56 = vpop.permute.xlu0 %4762 }
 0xcfc   :  { %v6456_v29 = vpack.c.bf16 %v7413_v41, %v7419_v45  ;;  %vm4751_vm14 = vcmp.ge.f32.partialorder %v4747_v42, 0.0  ;;  %v4755_v1 = vmul.f32 0.25, %v4747_v42 }
 0xcfd   :  { %vm4750_vm13 = vcmp.ge.f32.partialorder %v4746_v62, 0.0  ;;  %v4754_v28 = vmul.f32 0.25, %v4746_v62 }
 0xcfe   :  { %v7424_v8 = vsel %vm4751_vm14, %v4747_v42, %v4755_v1  ;;  %6457 = vmatpush3.bf16.msra.mxu1 %v6456_v29 }
 0xcff   :  { %v7426_v4 = vsel %vm4750_vm13, %v4746_v62, %v4754_v28  ;;  %6458 = vmatprep.subr.bf16.mxu1 %v6528_v0  ;;  %v214_v0 = vld [vmem:[%s5695_s10] sm:$0xff] }
 0xd00   :  { %v6459_v53 = vpack.c.bf16 %v7424_v8, %v7426_v4 }
 0xd02   :  { %6460 = vmatpush3.bf16.msra.mxu1 %v6459_v53 }
 0xd03   :  { %6349 = vmatprep.subr.mxu1 %v6531_v2 }
 0xd05   :  { %6342 = vmatmul.mubr.msk.f32.vlgmr.msra.gmra.mrb[56].mxu1 %vm2073_vm6, %v215_v54 }
 0xd06   :  { %6351 = vmatprep.mubr.msk.f32.mxu1 %vm7561_vm2, %v6531_v2 }
 0xdd8   :  { %v4834_v57 = vpop.f32.mrb[56].mxu1 }
 0xdd9   :  { %v4835_v58 = vadd.f32 %v4834_v57, %v4763_v56  ;;  %v6343_v13 = vpop.f32.mrb[57].mxu1 }
 0xddb   :  { %v4838_v59 = vmax.f32 %v4835_v58, 0.0 }
 0xddd   :  { %4840 = vrot.lane.b32.xlu0 %v4838_v59, %s6533_s7  ;;  %4844 = vrot.lane.b32.xlu1 %v4838_v59, %s6532_s6  ;;  %s6565_s6 = smov 29  }
 0xde1   :  { %5072 = vrot.lane.b32.xlu0 %v4838_v59, %s6534_s8  ;;  %4994 = vrot.lane.b32.xlu1 %v4838_v59, %s6537_s20  ;;  %s7449_s20 = sld [smem:[%s7528_s0 + %s6565_s6]]  }
 0xde5   :  { %5303 = vrot.lane.b32.xlu0 %v4838_v59, %s6540_s2  ;;  %5225 = vrot.lane.b32.xlu1 %v4838_v59, %s6541_s3  ;;  %s6566_s2 = smov 30  }
 0xde7   :  { %v217_v21 = vld [vmem:[%s7449_s20 + $0x8] sm:$0xff]  ;;  %v216_v55 = vld [vmem:[%s7449_s20] sm:$0xff]  ;;  %v218_v10 = vld [vmem:[%s7449_s20 + $0x10] sm:$0xff] }
 0xde8   :  { %v219_v25 = vld [vmem:[%s7449_s20 + $0x18] sm:$0xff]  ;;  %v220_v37 = vld [vmem:[%s7449_s20 + $0x20] sm:$0xff]  ;;  %v221_v47 = vld [vmem:[%s7449_s20 + $0x28] sm:$0xff] }
 0xde9   :  { %5459 = vrot.lane.b32.xlu0 %v4838_v59, %s6542_s4  ;;  %5381 = vrot.lane.b32.xlu1 %v4838_v59, %s6543_s5  ;;  %v222_v51 = vld [vmem:[%s7449_s20 + $0x30] sm:$0xff]  ;;  %v223_v50 = vld [vmem:[%s7449_s20 + $0x38] sm:$0xff]  ;;  %s7511_s5 = sld [smem:[%s7528_s0 + %s6566_s2]]  }
 0xdea   :  { %v224_v46 = vld [vmem:[%s7449_s20 + $0x40] sm:$0xff] }
 0xded   :  { %5539 = vperm.xlu1 %6526, %v214_v0  }
 0xdef   :  { %v225_v61 = vld [vmem:[%s7511_s5] sm:$0xff]  ;;  %v226_v43 = vld [vmem:[%s7511_s5 + $0x8] sm:$0xff]  ;;  %v227_v62 = vld [vmem:[%s7511_s5 + $0x10] sm:$0xff] }
 0xdf0   :  { %v228_v29 = vld [vmem:[%s7511_s5 + $0x18] sm:$0xff] }
 0xe4f   :  { %v4841_v63 = vpop.permute.xlu0 %4840  ;;  %v4845_v6 = vpop.permute.xlu1 %4844 }
 0xe50   :  { %6345 = vmatpush3.msk.msra.mxu0 %vm6682_vm8, %v4845_v6  ;;  %6350 = vmatpush3.msk.msra.mxu1 %vm6693_vm10, %v4841_v63 }
 0xe51   :  { %6347 = vmatmul.mubr.msk.f32.vlgmr.msra.gmra.mrb[60].mxu0 %vm273_vm12, %v217_v21  ;;  %6352 = vmatmul.mubr.msk.f32.vlgmr.msra.gmra.mrb[58].mxu1 %vm273_vm12, %v216_v55 }
 0xe52   :  { %6359 = vmatprep.subr.mxu1 %v6531_v2  ;;  %6354 = vmatprep.subr.mxu0 %v6531_v2 }
 0xe53   :  { %v5073_v11 = vpop.permute.xlu0 %5072  ;;  %v4995_v12 = vpop.permute.xlu1 %4994  ;;  %6356 = vmatprep.mubr.msk.f32.mxu0 %vm7561_vm2, %v6531_v2  ;;  %6361 = vmatprep.mubr.msk.f32.mxu1 %vm7561_vm2, %v6531_v2 }
 0xe54   :  { %6355 = vmatpush3.msk.msra.mxu0 %vm6934_vm1, %v4995_v12  ;;  %6360 = vmatpush3.msk.msra.mxu1 %vm7560_vm0, %v5073_v11 }
 0xe55   :  { %6357 = vmatmul.mubr.msk.f32.vlgmr.msra.gmra.mrb[62].mxu0 %vm273_vm12, %v218_v10  ;;  %6364 = vmatprep.subr.mxu0 %v6531_v2 }
 0xe56   :  { %6365 = vmatpush3.msk.msra.mxu0 %vm7566_vm11, %v4838_v59  ;;  %6362 = vmatmul.mubr.msk.f32.vlgmr.msra.gmra.mrb[60].mxu1 %vm273_vm12, %v219_v25 }
 0xe57   :  { %6369 = vmatprep.subr.mxu1 %v6531_v2  ;;  %v5304_v14 = vpop.permute.xlu0 %5303  ;;  %v5226_v36 = vpop.permute.xlu1 %5225  ;;  %6366 = vmatprep.mubr.msk.f32.mxu0 %vm7561_vm2, %v6531_v2 }
 0xe58   :  { %6370 = vmatpush3.msk.msra.mxu1 %vm6964_vm3, %v5226_v36  ;;  %6374 = vmatprep.subr.mxu0 %v6531_v2 }
 0xe59   :  { %6367 = vmatmul.mubr.msk.f32.vlgmr.msra.gmra.mrb[64].mxu0 %vm273_vm12, %v220_v37  ;;  %6371 = vmatprep.mubr.msk.f32.mxu1 %vm7561_vm2, %v6531_v2 }
 0xe5a   :  { %6375 = vmatpush3.msk.msra.mxu0 %vm6960_vm5, %v5304_v14  ;;  %6372 = vmatmul.mubr.msk.f32.vlgmr.msra.gmra.mrb[62].mxu1 %vm273_vm12, %v221_v47 }
 0xe5b   :  { %v5460_v18 = vpop.permute.xlu0 %5459  ;;  %6379 = vmatprep.subr.mxu1 %v6531_v2  ;;  %v5382_v19 = vpop.permute.xlu1 %5381  ;;  %6376 = vmatprep.mubr.msk.f32.mxu0 %vm7561_vm2, %v6531_v2 }
 0xe5c   :  { %6380 = vmatpush3.msk.msra.mxu1 %vm6997_vm7, %v5382_v19  ;;  %6384 = vmatprep.subr.mxu0 %v6531_v2 }
 0xe5d   :  { %6377 = vmatmul.mubr.msk.f32.vlgmr.msra.gmra.mrb[66].mxu0 %vm273_vm12, %v222_v51  ;;  %6381 = vmatprep.mubr.msk.f32.mxu1 %vm7561_vm2, %v6531_v2 }
 0xe5e   :  { %6385 = vmatpush3.msk.msra.mxu0 %vm6993_vm9, %v5460_v18  ;;  %6382 = vmatmul.mubr.msk.f32.vlgmr.msra.gmra.mrb[64].mxu1 %vm273_vm12, %v223_v50 }
 0xe5f   :  { %6386 = vmatprep.mubr.msk.f32.mxu0 %vm7561_vm2, %v6531_v2  ;;  %6391 = vmatprep.mubr.msk.f32.mxu1 %vm273_vm12, %v225_v61 }
 0xe61   :  { %6387 = vmatmul.mubr.msk.f32.vlgmr.msra.gmra.mrb[68].mxu0 %vm273_vm12, %v224_v46 }
 0xe6c   :  { %v5540_v39 = vpop.permute.xlu1 %5539 }
 0xf24   :  { %v4917_v60 = vpop.f32.mrb[60].mxu0  ;;  %v4990_v22 = vpop.f32.mrb[58].mxu1 }
 0xf25   :  { %v4991_v23 = vadd.f32 %v4990_v22, %v4917_v60  ;;  %v6348_v24 = vpop.f32.mrb[61].mxu0  ;;  %v6353_v26 = vpop.f32.mrb[59].mxu1 }
 0xf28   :  { %v5067_v27 = vpop.f32.mrb[62].mxu0 }
 0xf29   :  { %v5071_v44 = vadd.f32 %v5067_v27, %v4991_v23  ;;  %v5145_v2 = vpop.f32.mrb[60].mxu1  ;;  %v6358_v52 = vpop.f32.mrb[63].mxu0 }
 0xf2a   :  { %v6363_v30 = vpop.f32.mrb[61].mxu1 }
 0xf2b   :  { %v5149_v3 = vadd.f32 %v5145_v2, %v5071_v44 }
 0xf2c   :  { %v5220_v5 = vpop.f32.mrb[64].mxu0 }
 0xf2d   :  { %v5224_v7 = vadd.f32 %v5220_v5, %v5149_v3  ;;  %v5298_v9 = vpop.f32.mrb[62].mxu1  ;;  %v6368_v16 = vpop.f32.mrb[65].mxu0 }
 0xf2e   :  { %v6373_v48 = vpop.f32.mrb[63].mxu1 }
 0xf2f   :  { %v5302_v20 = vadd.f32 %v5298_v9, %v5224_v7 }
 0xf30   :  { %v5376_v49 = vpop.f32.mrb[66].mxu0 }
 0xf31   :  { %v5380_v17 = vadd.f32 %v5376_v49, %v5302_v20  ;;  %v5454_v31 = vpop.f32.mrb[64].mxu1  ;;  %v6378_v32 = vpop.f32.mrb[67].mxu0 }
 0xf32   :  { %v6383_v33 = vpop.f32.mrb[65].mxu1 }
 0xf33   :  { %v5458_v34 = vadd.f32 %v5454_v31, %v5380_v17 }
 0xf34   :  { %v5532_v35 = vpop.f32.mrb[68].mxu0 }
 0xf35   :  { %v5536_v38 = vadd.f32 %v5532_v35, %v5458_v34  ;;  %v6388_v15 = vpop.f32.mrb[69].mxu0 }
 0xf37   :  { %v5542_v40 = vadd.f32 %v5540_v39, %v5536_v38 }
 0xf39   :  { %v5543_v42 = vmax.f32 %v5542_v40, 0.0 }
 0xf3b   :  { %6389 = vmatprep.subr.mxu1 %v5543_v42 }
 0xf3c   :  { %6390 = vmatpush3.msra.mxu1 %v5543_v42 }
 0xf3d   :  { %6392 = vmatmul.mubr.msk.f32.vlgmr.msra.gmra.mrb[66].mxu1 %vm273_vm12, %v226_v43 }
 0xf3e   :  { %6394 = vmatprep.mubr.msk.f32.mxu1 %vm273_vm12, %v227_v62 }
 0xf41   :  { %6395 = vmatmul.mubr.msk.f32.gmra.mrb[68].mxu1 %vm273_vm12, %v228_v29 }
0x1010   :  { %v6393_v1 = vpop.f32.mrb[66].mxu1 }
0x1011   :  { %v5642_v28 = vadd.f32 %v6393_v1, %v7413_v41  ;;  %v5622_v53 = vpop.f32.mrb[67].mxu1 }
0x1012   :  { %v5641_v54 = vadd.f32 %v5622_v53, %v7419_v45 }
0x1013   :  { %vm5646_vm8 = vcmp.ge.f32.partialorder %v5642_v28, 0.0  ;;  %v5650_v56 = vmul.f32 0.25, %v5642_v28 }
0x1014   :  { %vm5645_vm10 = vcmp.ge.f32.partialorder %v5641_v54, 0.0  ;;  %v5649_v57 = vmul.f32 0.25, %v5641_v54  ;;  %v6396_v58 = vpop.f32.mrb[68].mxu1 }
0x1015   :  { %v5654_v13 = vsel %vm5646_vm8, %v5642_v28, %v5650_v56  ;;  %v5644_v59 = vadd.f32 %v6396_v58, %v7424_v8  ;;  %v5632_v0 = vpop.f32.mrb[69].mxu1 }
0x1016   :  { %5658 = vst [vmem:[%s5699_s14 + $0x8] sm:$0xff] %v5654_v13  ;;  %v5653_v21 = vsel %vm5645_vm10, %v5641_v54, %v5649_v57  ;;  %v5643_v55 = vadd.f32 %v5632_v0, %v7426_v4 }
0x1017   :  { %5657 = vst [vmem:[%s5699_s14] sm:$0xff] %v5653_v21  ;;  %vm5648_vm1 = vcmp.ge.f32.partialorder %v5644_v59, 0.0  ;;  %v5652_v63 = vmul.f32 0.25, %v5644_v59 }
0x1018   :  { %vm5647_vm0 = vcmp.ge.f32.partialorder %v5643_v55, 0.0  ;;  %v5651_v41 = vmul.f32 0.25, %v5643_v55 }
0x1019   :  { %v5656_v6 = vsel %vm5648_vm1, %v5644_v59, %v5652_v63 }
0x101a   :  { %5660 = vst [vmem:[%s5699_s14 + $0x18] sm:$0xff] %v5656_v6  ;;  %v5655_v45 = vsel %vm5647_vm0, %v5643_v55, %v5651_v41 }
0x101b   :  { %5659 = vst [vmem:[%s5699_s14 + $0x10] sm:$0xff] %v5655_v45 }

</bundles_post_ra>
